<compile_context>
chip_gen: v7x
topology: tpu7x:2x2x1
jax: 0.10.0
libtpu: 0.0.40
codegen_flags: <defaults>
</compile_context>

<pallas_src>
import jax
import jax.numpy as jnp
from jax import lax
from jax.experimental import pallas as pl
from jax.experimental.pallas import tpu as pltpu


_BIG_Z = 1.0e9                         # sigmoid(_BIG_Z) == 1.0 exactly -> pad steps are no-ops
_MAX_UNROLL = 32                       # max GRU steps per grid iteration (code-size bound)
_VMEM_DATA_BUDGET = 36 * 1024 * 1024   # budget used to size the time chunk
_VMEM_LIMIT_BYTES = 48 * 1024 * 1024   # > all default scoped limits, < v7x's 64 MiB physical


def _round_up(x, m):
    return ((x + m - 1) // m) * m


def _ceil_div(a, b):
    return -(-a // b)


def _gru_kernel(xi_ref, w_h_ref, b_hn_ref, h_out_ref, h_ref):
    """One grid step = T GRU time steps for one batch tile.

    Grid: (batch_tiles [parallel], time_chunks [arbitrary / serial recurrence]).

    xi_ref   : (T, tb, GL) bf16  precomputed x W_i (+ folded biases), time-major
    w_h_ref  : (Hh, GL)    bf16  [W_hr | W_hz | W_hn] packed along lanes, stride Hh
    b_hn_ref : (tb, Hh)    f32   b_hn broadcast over the batch tile
    h_out_ref: (tb, Hh)    f32   final hidden state (written on the last chunk)
    h_ref    : (tb, Hh)    f32   VMEM scratch carrying h across time chunks
    """
    c = pl.program_id(1)
    hdim = w_h_ref.shape[0]

    @pl.when(c == 0)
    def _():
        h_ref[...] = jnp.zeros_like(h_ref)

    def step(t, h):
        xi = xi_ref[t].astype(jnp.float32)                        # (tb, GL)
        # bf16 operands on the serial-dependency matmul (f32 accumulate): one MXU
        # pass instead of the ~3-pass f32 decomposition.  Refs are indexed here
        # rather than hoisted -- the weights live in VMEM, not vregs.
        hh = jnp.dot(h.astype(jnp.bfloat16), w_h_ref[...],
                     preferred_element_type=jnp.float32)          # (tb, GL)
        r = jax.nn.sigmoid(xi[:, 0:hdim] + hh[:, 0:hdim])
        z = jax.nn.sigmoid(xi[:, hdim:2 * hdim] + hh[:, hdim:2 * hdim])
        n = jnp.tanh(xi[:, 2 * hdim:3 * hdim]
                     + r * (hh[:, 2 * hdim:3 * hdim] + b_hn_ref[...]))
        return (1.0 - z) * n + z * h

    h = lax.fori_loop(0, xi_ref.shape[0], step, h_ref[...], unroll=True)
    h_ref[...] = h

    @pl.when(c == pl.num_programs(1) - 1)
    def _():
        h_out_ref[...] = h


def gru_model_forward(x, params):
    """x: (batch, seq, input_size) float32; params: dict of GRU + FC weights."""
    B, S, D = x.shape
    H = params["w_hr"].shape[0]
    f32, bf16 = jnp.float32, jnp.bfloat16

    # ---- Gate-packing geometry ---------------------------------------------
    # Hh is both the hidden width carried in the kernel and the gate stride on
    # the packed lane axis.  Small H: one shared 128-lane block; large H: each
    # gate padded to a 128-lane multiple (lane-aligned gate slices).
    Hh = H if 3 * H <= 128 else _round_up(H, 128)
    GL = _round_up(3 * Hh, 128)        # total packed gate lanes

    # ---- Batch tiling (megacore) --------------------------------------------
    nb = 1 if B <= 8 else 2            # v7x: 2 TensorCores; no effect on v5e/v6e
    Bp = _round_up(B, 8 * nb)
    tb = Bp // nb

    # ---- Time chunking from a VMEM budget ------------------------------------
    fixed = (Hh * GL * 2               # W_h_cat (bf16, single-buffered)
             + 2 * tb * Hh * 4         # b_hn + h scratch
             + 2 * tb * Hh * 4)        # output (double-buffered)
    per_step = 2 * tb * GL * 2         # xi, bf16, double-buffered
    t_cap = max(1, min(S, _MAX_UNROLL, (_VMEM_DATA_BUDGET - fixed) // per_step))
    nc = _ceil_div(S, t_cap)           # number of time chunks (grid steps)
    T = _ceil_div(S, nc)               # balanced chunk length
    Sp = nc * T                        # padded sequence length (pad steps are no-ops)

    # ---- Fused / padded parameters (one-time, wrapper-side) ------------------
    w_i_cat = jnp.zeros((D, GL), f32)
    w_h_cat = jnp.zeros((Hh, GL), f32)
    b_i_cat = jnp.zeros((GL,), f32)
    gate_w_i = (params["w_ir"], params["w_iz"], params["w_in"])
    gate_w_h = (params["w_hr"], params["w_hz"], params["w_hn"])
    gate_b = ((params["b_ir"] + params["b_hr"])[0],   # b_ir+b_hr folded into xi
              (params["b_iz"] + params["b_hz"])[0],   # b_iz+b_hz folded into xi
              params["b_in"][0])                      # b_hn stays inside r*(...)
    for g in range(3):
        lo = g * Hh
        w_i_cat = w_i_cat.at[:, lo:lo + H].set(gate_w_i[g])
        w_h_cat = w_h_cat.at[:H, lo:lo + H].set(gate_w_h[g])
        b_i_cat = b_i_cat.at[lo:lo + H].set(gate_b[g])
    w_h_cat = w_h_cat.astype(bf16)     # bf16 recurrent weights (f32 accumulate)
    # NOTE: for extreme H (bf16 W_h_cat alone > ~32 MiB, i.e. Hh >~ 2.5k) the hidden
    # matmul should additionally be tiled over the gate axis; not needed for the
    # hidden sizes this module targets.

    b_hn_b = jnp.zeros((tb, Hh), f32).at[:, :H].set(
        jnp.broadcast_to(params["b_hn"], (tb, H)))

    # ---- Input projections: one big MXU matmul, emitted time-major -----------
    xt = jnp.transpose(x.astype(f32), (1, 0, 2)).reshape(S * B, D)
    xi = (xt @ w_i_cat + b_i_cat).reshape(S, B, GL)
    xi = jnp.pad(xi, ((0, Sp - S), (0, Bp - B), (0, 0)))
    if Sp > S:
        # Exact no-op pad steps: z-gate lanes = BIG  =>  z == 1  =>  h' == h.
        xi = xi.at[S:, :, Hh:2 * Hh].set(_BIG_Z)
    xi = xi.astype(bf16)               # halves the per-chunk HBM->VMEM DMA stream

    # ---- pallas_call ----------------------------------------------------------
    def run(single_buffer_weights):
        def const_spec(shape):
            # Constant-index inputs: single-buffer to halve their VMEM footprint.
            if single_buffer_weights:
                return pl.BlockSpec(shape, lambda b, c: (0,) * len(shape),
                                    pipeline_mode=pl.Buffered(1))
            return pl.BlockSpec(shape, lambda b, c: (0,) * len(shape))

        return pl.pallas_call(
            _gru_kernel,
            out_shape=jax.ShapeDtypeStruct((Bp, Hh), f32),
            grid_spec=pltpu.PrefetchScalarGridSpec(
                num_scalar_prefetch=0,
                grid=(nb, nc),
                in_specs=[
                    pl.BlockSpec((T, tb, GL), lambda b, c: (c, b, 0)),  # xi chunk
                    const_spec((Hh, GL)),                               # W_h_cat
                    const_spec((tb, Hh)),                               # b_hn
                ],
                out_specs=pl.BlockSpec((tb, Hh), lambda b, c: (b, 0)),
                scratch_shapes=[pltpu.VMEM((tb, Hh), f32)],             # hidden state
            ),
            compiler_params=pltpu.CompilerParams(
                dimension_semantics=("parallel", "arbitrary"),
                vmem_limit_bytes=_VMEM_LIMIT_BYTES),
        )(xi, w_h_cat, b_hn_b)

    try:
        h_final = run(single_buffer_weights=True)
    except Exception:   # compatibility fallback: default double-buffered weights
        h_final = run(single_buffer_weights=False)

    # Final Linear evicted from the recurrence kernel (used exactly once); a plain
    # XLA f32 matmul, keeping VMEM free for a larger time chunk.
    return h_final[:B, :H] @ params["w_fc"] + params["b_fc"]


def gru_model_reference(x, params):
    """Pure-JAX f32 reference of the same forward pass (for correctness check)."""
    B = x.shape[0]
    H = params["w_hr"].shape[0]
    h = jnp.zeros((B, H), jnp.float32)
    for t in range(x.shape[1]):
        x_t = x[:, t, :]
        r = jax.nn.sigmoid(x_t @ params["w_ir"] + params["b_ir"]
                           + h @ params["w_hr"] + params["b_hr"])
        z = jax.nn.sigmoid(x_t @ params["w_iz"] + params["b_iz"]
                           + h @ params["w_hz"] + params["b_hz"])
        n = jnp.tanh(x_t @ params["w_in"] + params["b_in"]
                     + r * (h @ params["w_hn"] + params["b_hn"]))
        h = (1.0 - z) * n + z * h
    return h @ params["w_fc"] + params["b_fc"]


def init_params(key, input_size, hidden_size, output_size):
    """Deterministic init mimicking PyTorch's default uniform(-1/sqrt(H), 1/sqrt(H))."""
    k = 1.0 / jnp.sqrt(jnp.float32(hidden_size))
    names_shapes = [
        ("w_ir", (input_size, hidden_size)), ("w_iz", (input_size, hidden_size)),
        ("w_in", (input_size, hidden_size)),
        ("w_hr", (hidden_size, hidden_size)), ("w_hz", (hidden_size, hidden_size)),
        ("w_hn", (hidden_size, hidden_size)),
        ("b_ir", (1, hidden_size)), ("b_iz", (1, hidden_size)), ("b_in", (1, hidden_size)),
        ("b_hr", (1, hidden_size)), ("b_hz", (1, hidden_size)), ("b_hn", (1, hidden_size)),
        ("w_fc", (hidden_size, output_size)), ("b_fc", (1, output_size)),
    ]
    keys = jax.random.split(key, len(names_shapes))
    return {
        name: jax.random.uniform(kk, shape, jnp.float32, -k, k)
        for kk, (name, shape) in zip(keys, names_shapes)
    }


if __name__ == "__main__":
    key = jax.random.PRNGKey(0)

    # Two configs: (1) packed-gate path (3H <= 128) with a seq length that does not
    # divide the time chunk (exercises the no-op padding); (2) per-gate-padded path.
    configs = [
        (2, 37, 4, 32, 8),     # batch, seq, input, hidden, output
        (2, 12, 4, 160, 8),
    ]
    for i, (batch, seq, d_in, hidden, d_out) in enumerate(configs):
        kx, kp, key = jax.random.split(key, 3)
        x = jax.random.normal(kx, (batch, seq, d_in), jnp.float32)
        params = init_params(kp, d_in, hidden, d_out)

        out = jax.block_until_ready(gru_model_forward(x, params))
        ref = jax.jit(gru_model_reference)(x, params)

        assert out.shape == (batch, d_out)
        # bf16 recurrent matmul operands (f32 accumulate) -> relaxed tolerance.
        assert jnp.allclose(out, ref, atol=2e-2, rtol=2e-2), (i, out, ref)

    print("KERNEL_OK")
</pallas_src>

<mosaic_0001>
module attributes {stable_mosaic.version = 11 : i64} {
  func.func @_gru_kernel(%arg0: i32, %arg1: i32, %arg2: memref<19x8x128xbf16, #tpu.memory_space<vmem>>, %arg3: memref<32x128xbf16, #tpu.memory_space<vmem>>, %arg4: memref<8x32xf32, #tpu.memory_space<vmem>>, %arg5: memref<8x32xf32, #tpu.memory_space<vmem>>, %arg6: memref<8x32xf32, #tpu.memory_space<vmem>>) attributes {dimension_semantics = [#tpu.dimension_semantics<parallel>, #tpu.dimension_semantics<arbitrary>], iteration_bounds = array<i64: 1, 2>, scalar_prefetch = 0 : i64, scratch_operands = 1 : i64, tpu.core_type = #tpu.core_type<tc>, window_params = [{transform_indices = @transform_0, window_bounds = array<i64: 19, 8, 128>}, {pipeline_mode = #tpu.pipeline_mode<synchronous>, transform_indices = @transform_1, window_bounds = array<i64: 32, 128>}, {pipeline_mode = #tpu.pipeline_mode<synchronous>, transform_indices = @transform_2, window_bounds = array<i64: 8, 32>}, {transform_indices = @transform_3, window_bounds = array<i64: 8, 32>}]} {
    %c0_i32 = arith.constant 0 : i32
    %0 = arith.cmpi eq, %arg1, %c0_i32 : i32
    %1 = arith.extui %0 : i1 to i32
    %c0_i32_0 = arith.constant 0 : i32
    %2 = arith.cmpi ne, %1, %c0_i32_0 : i32
    scf.if %2 {
      %cst_196 = arith.constant 0.000000e+00 : f32
      %673 = vector.broadcast %cst_196 : f32 to vector<8x32xf32>
      %c0_197 = arith.constant 0 : index
      %c0_198 = arith.constant 0 : index
      %674 = vector.load %arg6[%c0_197, %c0_198] : memref<8x32xf32, #tpu.memory_space<vmem>>, vector<8x32xf32>
      tpu.vector_store %arg6[%c0_197, %c0_198], %673 {strides = array<i32>} : memref<8x32xf32, #tpu.memory_space<vmem>>, vector<8x32xf32>,
    } else {
    }
    %c0 = arith.constant 0 : index
    %c0_1 = arith.constant 0 : index
    %3 = vector.load %arg6[%c0, %c0_1] : memref<8x32xf32, #tpu.memory_space<vmem>>, vector<8x32xf32>
    %c0_i32_2 = arith.constant 0 : i32
    %4 = arith.index_cast %c0_i32_2 : i32 to index
    %c0_3 = arith.constant 0 : index
    %c0_4 = arith.constant 0 : index
    %5 = vector.load %arg2[%4, %c0_3, %c0_4] : memref<19x8x128xbf16, #tpu.memory_space<vmem>>, vector<1x8x128xbf16>
    %6 = vector.shape_cast %5 : vector<1x8x128xbf16> to vector<8x128xbf16>
    %7 = arith.extf %6 : vector<8x128xbf16> to vector<8x128xf32>
    %8 = arith.truncf %3 : vector<8x32xf32> to vector<8x32xbf16>
    %c0_5 = arith.constant 0 : index
    %c0_6 = arith.constant 0 : index
    %9 = vector.load %arg3[%c0_5, %c0_6] : memref<32x128xbf16, #tpu.memory_space<vmem>>, vector<32x128xbf16>
    %cst = arith.constant dense<0.000000e+00> : vector<8x128xf32>
    %10 = tpu.matmul %8, %9, %cst {dimension_numbers = #tpu.dot_dimension_numbers<[1], [0], [0], [1], [0, 0, 1, 1], [], []>} : vector<8x32xbf16>, vector<32x128xbf16>, vector<8x128xf32> -> vector<8x128xf32>
    %11 = vector.extract_strided_slice %7 {offsets = [0, 0], sizes = [8, 32], strides = [1, 1]} : vector<8x128xf32> to vector<8x32xf32>
    %12 = vector.extract_strided_slice %10 {offsets = [0, 0], sizes = [8, 32], strides = [1, 1]} : vector<8x128xf32> to vector<8x32xf32>
    %13 = arith.addf %11, %12 : vector<8x32xf32>
    %14 = arith.negf %13 : vector<8x32xf32>
    %15 = math.exp %14 : vector<8x32xf32>
    %cst_7 = arith.constant 1.000000e+00 : f32
    %16 = vector.broadcast %cst_7 : f32 to vector<8x32xf32>
    %17 = arith.addf %16, %15 : vector<8x32xf32>
    %18 = arith.divf %16, %17 : vector<8x32xf32>
    %19 = vector.extract_strided_slice %7 {offsets = [0, 32], sizes = [8, 32], strides = [1, 1]} : vector<8x128xf32> to vector<8x32xf32>
    %20 = vector.extract_strided_slice %10 {offsets = [0, 32], sizes = [8, 32], strides = [1, 1]} : vector<8x128xf32> to vector<8x32xf32>
    %21 = arith.addf %19, %20 : vector<8x32xf32>
    %22 = arith.negf %21 : vector<8x32xf32>
    %23 = math.exp %22 : vector<8x32xf32>
    %cst_8 = arith.constant 1.000000e+00 : f32
    %24 = vector.broadcast %cst_8 : f32 to vector<8x32xf32>
    %25 = arith.addf %24, %23 : vector<8x32xf32>
    %26 = arith.divf %24, %25 : vector<8x32xf32>
    %27 = vector.extract_strided_slice %7 {offsets = [0, 64], sizes = [8, 32], strides = [1, 1]} : vector<8x128xf32> to vector<8x32xf32>
    %28 = vector.extract_strided_slice %10 {offsets = [0, 64], sizes = [8, 32], strides = [1, 1]} : vector<8x128xf32> to vector<8x32xf32>
    %c0_9 = arith.constant 0 : index
    %c0_10 = arith.constant 0 : index
    %29 = vector.load %arg4[%c0_9, %c0_10] : memref<8x32xf32, #tpu.memory_space<vmem>>, vector<8x32xf32>
    %30 = arith.addf %28, %29 : vector<8x32xf32>
    %31 = arith.mulf %18, %30 : vector<8x32xf32>
    %32 = arith.addf %27, %31 : vector<8x32xf32>
    %33 = math.tanh %32 : vector<8x32xf32>
    %cst_11 = arith.constant 1.000000e+00 : f32
    %34 = vector.broadcast %cst_11 : f32 to vector<8x32xf32>
    %35 = arith.subf %34, %26 : vector<8x32xf32>
    %36 = arith.mulf %35, %33 : vector<8x32xf32>
    %37 = arith.mulf %26, %3 : vector<8x32xf32>
    %38 = arith.addf %36, %37 : vector<8x32xf32>
    %c1_i32 = arith.constant 1 : i32
    %39 = arith.index_cast %c1_i32 : i32 to index
    %c0_12 = arith.constant 0 : index
    %c0_13 = arith.constant 0 : index
    %40 = vector.load %arg2[%39, %c0_12, %c0_13] : memref<19x8x128xbf16, #tpu.memory_space<vmem>>, vector<1x8x128xbf16>
    %41 = vector.shape_cast %40 : vector<1x8x128xbf16> to vector<8x128xbf16>
    %42 = arith.extf %41 : vector<8x128xbf16> to vector<8x128xf32>
    %43 = arith.truncf %38 : vector<8x32xf32> to vector<8x32xbf16>
    %c0_14 = arith.constant 0 : index
    %c0_15 = arith.constant 0 : index
    %44 = vector.load %arg3[%c0_14, %c0_15] : memref<32x128xbf16, #tpu.memory_space<vmem>>, vector<32x128xbf16>
    %cst_16 = arith.constant dense<0.000000e+00> : vector<8x128xf32>
    %45 = tpu.matmul %43, %44, %cst_16 {dimension_numbers = #tpu.dot_dimension_numbers<[1], [0], [0], [1], [0, 0, 1, 1], [], []>} : vector<8x32xbf16>, vector<32x128xbf16>, vector<8x128xf32> -> vector<8x128xf32>
    %46 = vector.extract_strided_slice %42 {offsets = [0, 0], sizes = [8, 32], strides = [1, 1]} : vector<8x128xf32> to vector<8x32xf32>
    %47 = vector.extract_strided_slice %45 {offsets = [0, 0], sizes = [8, 32], strides = [1, 1]} : vector<8x128xf32> to vector<8x32xf32>
    %48 = arith.addf %46, %47 : vector<8x32xf32>
    %49 = arith.negf %48 : vector<8x32xf32>
    %50 = math.exp %49 : vector<8x32xf32>
    %cst_17 = arith.constant 1.000000e+00 : f32
    %51 = vector.broadcast %cst_17 : f32 to vector<8x32xf32>
    %52 = arith.addf %51, %50 : vector<8x32xf32>
    %53 = arith.divf %51, %52 : vector<8x32xf32>
    %54 = vector.extract_strided_slice %42 {offsets = [0, 32], sizes = [8, 32], strides = [1, 1]} : vector<8x128xf32> to vector<8x32xf32>
    %55 = vector.extract_strided_slice %45 {offsets = [0, 32], sizes = [8, 32], strides = [1, 1]} : vector<8x128xf32> to vector<8x32xf32>
    %56 = arith.addf %54, %55 : vector<8x32xf32>
    %57 = arith.negf %56 : vector<8x32xf32>
    %58 = math.exp %57 : vector<8x32xf32>
    %cst_18 = arith.constant 1.000000e+00 : f32
    %59 = vector.broadcast %cst_18 : f32 to vector<8x32xf32>
    %60 = arith.addf %59, %58 : vector<8x32xf32>
    %61 = arith.divf %59, %60 : vector<8x32xf32>
    %62 = vector.extract_strided_slice %42 {offsets = [0, 64], sizes = [8, 32], strides = [1, 1]} : vector<8x128xf32> to vector<8x32xf32>
    %63 = vector.extract_strided_slice %45 {offsets = [0, 64], sizes = [8, 32], strides = [1, 1]} : vector<8x128xf32> to vector<8x32xf32>
    %c0_19 = arith.constant 0 : index
    %c0_20 = arith.constant 0 : index
    %64 = vector.load %arg4[%c0_19, %c0_20] : memref<8x32xf32, #tpu.memory_space<vmem>>, vector<8x32xf32>
    %65 = arith.addf %63, %64 : vector<8x32xf32>
    %66 = arith.mulf %53, %65 : vector<8x32xf32>
    %67 = arith.addf %62, %66 : vector<8x32xf32>
    %68 = math.tanh %67 : vector<8x32xf32>
    %cst_21 = arith.constant 1.000000e+00 : f32
    %69 = vector.broadcast %cst_21 : f32 to vector<8x32xf32>
    %70 = arith.subf %69, %61 : vector<8x32xf32>
    %71 = arith.mulf %70, %68 : vector<8x32xf32>
    %72 = arith.mulf %61, %38 : vector<8x32xf32>
    %73 = arith.addf %71, %72 : vector<8x32xf32>
    %c2_i32 = arith.constant 2 : i32
    %74 = arith.index_cast %c2_i32 : i32 to index
    %c0_22 = arith.constant 0 : index
    %c0_23 = arith.constant 0 : index
    %75 = vector.load %arg2[%74, %c0_22, %c0_23] : memref<19x8x128xbf16, #tpu.memory_space<vmem>>, vector<1x8x128xbf16>
    %76 = vector.shape_cast %75 : vector<1x8x128xbf16> to vector<8x128xbf16>
    %77 = arith.extf %76 : vector<8x128xbf16> to vector<8x128xf32>
    %78 = arith.truncf %73 : vector<8x32xf32> to vector<8x32xbf16>
    %c0_24 = arith.constant 0 : index
    %c0_25 = arith.constant 0 : index
    %79 = vector.load %arg3[%c0_24, %c0_25] : memref<32x128xbf16, #tpu.memory_space<vmem>>, vector<32x128xbf16>
    %cst_26 = arith.constant dense<0.000000e+00> : vector<8x128xf32>
    %80 = tpu.matmul %78, %79, %cst_26 {dimension_numbers = #tpu.dot_dimension_numbers<[1], [0], [0], [1], [0, 0, 1, 1], [], []>} : vector<8x32xbf16>, vector<32x128xbf16>, vector<8x128xf32> -> vector<8x128xf32>
    %81 = vector.extract_strided_slice %77 {offsets = [0, 0], sizes = [8, 32], strides = [1, 1]} : vector<8x128xf32> to vector<8x32xf32>
    %82 = vector.extract_strided_slice %80 {offsets = [0, 0], sizes = [8, 32], strides = [1, 1]} : vector<8x128xf32> to vector<8x32xf32>
    %83 = arith.addf %81, %82 : vector<8x32xf32>
    %84 = arith.negf %83 : vector<8x32xf32>
    %85 = math.exp %84 : vector<8x32xf32>
    %cst_27 = arith.constant 1.000000e+00 : f32
    %86 = vector.broadcast %cst_27 : f32 to vector<8x32xf32>
    %87 = arith.addf %86, %85 : vector<8x32xf32>
    %88 = arith.divf %86, %87 : vector<8x32xf32>
    %89 = vector.extract_strided_slice %77 {offsets = [0, 32], sizes = [8, 32], strides = [1, 1]} : vector<8x128xf32> to vector<8x32xf32>
    %90 = vector.extract_strided_slice %80 {offsets = [0, 32], sizes = [8, 32], strides = [1, 1]} : vector<8x128xf32> to vector<8x32xf32>
    %91 = arith.addf %89, %90 : vector<8x32xf32>
    %92 = arith.negf %91 : vector<8x32xf32>
    %93 = math.exp %92 : vector<8x32xf32>
    %cst_28 = arith.constant 1.000000e+00 : f32
    %94 = vector.broadcast %cst_28 : f32 to vector<8x32xf32>
    %95 = arith.addf %94, %93 : vector<8x32xf32>
    %96 = arith.divf %94, %95 : vector<8x32xf32>
    %97 = vector.extract_strided_slice %77 {offsets = [0, 64], sizes = [8, 32], strides = [1, 1]} : vector<8x128xf32> to vector<8x32xf32>
    %98 = vector.extract_strided_slice %80 {offsets = [0, 64], sizes = [8, 32], strides = [1, 1]} : vector<8x128xf32> to vector<8x32xf32>
    %c0_29 = arith.constant 0 : index
    %c0_30 = arith.constant 0 : index
    %99 = vector.load %arg4[%c0_29, %c0_30] : memref<8x32xf32, #tpu.memory_space<vmem>>, vector<8x32xf32>
    %100 = arith.addf %98, %99 : vector<8x32xf32>
    %101 = arith.mulf %88, %100 : vector<8x32xf32>
    %102 = arith.addf %97, %101 : vector<8x32xf32>
    %103 = math.tanh %102 : vector<8x32xf32>
    %cst_31 = arith.constant 1.000000e+00 : f32
    %104 = vector.broadcast %cst_31 : f32 to vector<8x32xf32>
    %105 = arith.subf %104, %96 : vector<8x32xf32>
    %106 = arith.mulf %105, %103 : vector<8x32xf32>
    %107 = arith.mulf %96, %73 : vector<8x32xf32>
    %108 = arith.addf %106, %107 : vector<8x32xf32>
    %c3_i32 = arith.constant 3 : i32
    %109 = arith.index_cast %c3_i32 : i32 to index
    %c0_32 = arith.constant 0 : index
    %c0_33 = arith.constant 0 : index
    %110 = vector.load %arg2[%109, %c0_32, %c0_33] : memref<19x8x128xbf16, #tpu.memory_space<vmem>>, vector<1x8x128xbf16>
    %111 = vector.shape_cast %110 : vector<1x8x128xbf16> to vector<8x128xbf16>
    %112 = arith.extf %111 : vector<8x128xbf16> to vector<8x128xf32>
    %113 = arith.truncf %108 : vector<8x32xf32> to vector<8x32xbf16>
    %c0_34 = arith.constant 0 : index
    %c0_35 = arith.constant 0 : index
    %114 = vector.load %arg3[%c0_34, %c0_35] : memref<32x128xbf16, #tpu.memory_space<vmem>>, vector<32x128xbf16>
    %cst_36 = arith.constant dense<0.000000e+00> : vector<8x128xf32>
    %115 = tpu.matmul %113, %114, %cst_36 {dimension_numbers = #tpu.dot_dimension_numbers<[1], [0], [0], [1], [0, 0, 1, 1], [], []>} : vector<8x32xbf16>, vector<32x128xbf16>, vector<8x128xf32> -> vector<8x128xf32>
    %116 = vector.extract_strided_slice %112 {offsets = [0, 0], sizes = [8, 32], strides = [1, 1]} : vector<8x128xf32> to vector<8x32xf32>
    %117 = vector.extract_strided_slice %115 {offsets = [0, 0], sizes = [8, 32], strides = [1, 1]} : vector<8x128xf32> to vector<8x32xf32>
    %118 = arith.addf %116, %117 : vector<8x32xf32>
    %119 = arith.negf %118 : vector<8x32xf32>
    %120 = math.exp %119 : vector<8x32xf32>
    %cst_37 = arith.constant 1.000000e+00 : f32
    %121 = vector.broadcast %cst_37 : f32 to vector<8x32xf32>
    %122 = arith.addf %121, %120 : vector<8x32xf32>
    %123 = arith.divf %121, %122 : vector<8x32xf32>
    %124 = vector.extract_strided_slice %112 {offsets = [0, 32], sizes = [8, 32], strides = [1, 1]} : vector<8x128xf32> to vector<8x32xf32>
    %125 = vector.extract_strided_slice %115 {offsets = [0, 32], sizes = [8, 32], strides = [1, 1]} : vector<8x128xf32> to vector<8x32xf32>
    %126 = arith.addf %124, %125 : vector<8x32xf32>
    %127 = arith.negf %126 : vector<8x32xf32>
    %128 = math.exp %127 : vector<8x32xf32>
    %cst_38 = arith.constant 1.000000e+00 : f32
    %129 = vector.broadcast %cst_38 : f32 to vector<8x32xf32>
    %130 = arith.addf %129, %128 : vector<8x32xf32>
    %131 = arith.divf %129, %130 : vector<8x32xf32>
    %132 = vector.extract_strided_slice %112 {offsets = [0, 64], sizes = [8, 32], strides = [1, 1]} : vector<8x128xf32> to vector<8x32xf32>
    %133 = vector.extract_strided_slice %115 {offsets = [0, 64], sizes = [8, 32], strides = [1, 1]} : vector<8x128xf32> to vector<8x32xf32>
    %c0_39 = arith.constant 0 : index
    %c0_40 = arith.constant 0 : index
    %134 = vector.load %arg4[%c0_39, %c0_40] : memref<8x32xf32, #tpu.memory_space<vmem>>, vector<8x32xf32>
    %135 = arith.addf %133, %134 : vector<8x32xf32>
    %136 = arith.mulf %123, %135 : vector<8x32xf32>
    %137 = arith.addf %132, %136 : vector<8x32xf32>
    %138 = math.tanh %137 : vector<8x32xf32>
    %cst_41 = arith.constant 1.000000e+00 : f32
    %139 = vector.broadcast %cst_41 : f32 to vector<8x32xf32>
    %140 = arith.subf %139, %131 : vector<8x32xf32>
    %141 = arith.mulf %140, %138 : vector<8x32xf32>
    %142 = arith.mulf %131, %108 : vector<8x32xf32>
    %143 = arith.addf %141, %142 : vector<8x32xf32>
    %c4_i32 = arith.constant 4 : i32
    %144 = arith.index_cast %c4_i32 : i32 to index
    %c0_42 = arith.constant 0 : index
    %c0_43 = arith.constant 0 : index
    %145 = vector.load %arg2[%144, %c0_42, %c0_43] : memref<19x8x128xbf16, #tpu.memory_space<vmem>>, vector<1x8x128xbf16>
    %146 = vector.shape_cast %145 : vector<1x8x128xbf16> to vector<8x128xbf16>
    %147 = arith.extf %146 : vector<8x128xbf16> to vector<8x128xf32>
    %148 = arith.truncf %143 : vector<8x32xf32> to vector<8x32xbf16>
    %c0_44 = arith.constant 0 : index
    %c0_45 = arith.constant 0 : index
    %149 = vector.load %arg3[%c0_44, %c0_45] : memref<32x128xbf16, #tpu.memory_space<vmem>>, vector<32x128xbf16>
    %cst_46 = arith.constant dense<0.000000e+00> : vector<8x128xf32>
    %150 = tpu.matmul %148, %149, %cst_46 {dimension_numbers = #tpu.dot_dimension_numbers<[1], [0], [0], [1], [0, 0, 1, 1], [], []>} : vector<8x32xbf16>, vector<32x128xbf16>, vector<8x128xf32> -> vector<8x128xf32>
    %151 = vector.extract_strided_slice %147 {offsets = [0, 0], sizes = [8, 32], strides = [1, 1]} : vector<8x128xf32> to vector<8x32xf32>
    %152 = vector.extract_strided_slice %150 {offsets = [0, 0], sizes = [8, 32], strides = [1, 1]} : vector<8x128xf32> to vector<8x32xf32>
    %153 = arith.addf %151, %152 : vector<8x32xf32>
    %154 = arith.negf %153 : vector<8x32xf32>
    %155 = math.exp %154 : vector<8x32xf32>
    %cst_47 = arith.constant 1.000000e+00 : f32
    %156 = vector.broadcast %cst_47 : f32 to vector<8x32xf32>
    %157 = arith.addf %156, %155 : vector<8x32xf32>
    %158 = arith.divf %156, %157 : vector<8x32xf32>
    %159 = vector.extract_strided_slice %147 {offsets = [0, 32], sizes = [8, 32], strides = [1, 1]} : vector<8x128xf32> to vector<8x32xf32>
    %160 = vector.extract_strided_slice %150 {offsets = [0, 32], sizes = [8, 32], strides = [1, 1]} : vector<8x128xf32> to vector<8x32xf32>
    %161 = arith.addf %159, %160 : vector<8x32xf32>
    %162 = arith.negf %161 : vector<8x32xf32>
    %163 = math.exp %162 : vector<8x32xf32>
    %cst_48 = arith.constant 1.000000e+00 : f32
    %164 = vector.broadcast %cst_48 : f32 to vector<8x32xf32>
    %165 = arith.addf %164, %163 : vector<8x32xf32>
    %166 = arith.divf %164, %165 : vector<8x32xf32>
    %167 = vector.extract_strided_slice %147 {offsets = [0, 64], sizes = [8, 32], strides = [1, 1]} : vector<8x128xf32> to vector<8x32xf32>
    %168 = vector.extract_strided_slice %150 {offsets = [0, 64], sizes = [8, 32], strides = [1, 1]} : vector<8x128xf32> to vector<8x32xf32>
    %c0_49 = arith.constant 0 : index
    %c0_50 = arith.constant 0 : index
    %169 = vector.load %arg4[%c0_49, %c0_50] : memref<8x32xf32, #tpu.memory_space<vmem>>, vector<8x32xf32>
    %170 = arith.addf %168, %169 : vector<8x32xf32>
    %171 = arith.mulf %158, %170 : vector<8x32xf32>
    %172 = arith.addf %167, %171 : vector<8x32xf32>
    %173 = math.tanh %172 : vector<8x32xf32>
    %cst_51 = arith.constant 1.000000e+00 : f32
    %174 = vector.broadcast %cst_51 : f32 to vector<8x32xf32>
    %175 = arith.subf %174, %166 : vector<8x32xf32>
    %176 = arith.mulf %175, %173 : vector<8x32xf32>
    %177 = arith.mulf %166, %143 : vector<8x32xf32>
    %178 = arith.addf %176, %177 : vector<8x32xf32>
    %c5_i32 = arith.constant 5 : i32
    %179 = arith.index_cast %c5_i32 : i32 to index
    %c0_52 = arith.constant 0 : index
    %c0_53 = arith.constant 0 : index
    %180 = vector.load %arg2[%179, %c0_52, %c0_53] : memref<19x8x128xbf16, #tpu.memory_space<vmem>>, vector<1x8x128xbf16>
    %181 = vector.shape_cast %180 : vector<1x8x128xbf16> to vector<8x128xbf16>
    %182 = arith.extf %181 : vector<8x128xbf16> to vector<8x128xf32>
    %183 = arith.truncf %178 : vector<8x32xf32> to vector<8x32xbf16>
    %c0_54 = arith.constant 0 : index
    %c0_55 = arith.constant 0 : index
    %184 = vector.load %arg3[%c0_54, %c0_55] : memref<32x128xbf16, #tpu.memory_space<vmem>>, vector<32x128xbf16>
    %cst_56 = arith.constant dense<0.000000e+00> : vector<8x128xf32>
    %185 = tpu.matmul %183, %184, %cst_56 {dimension_numbers = #tpu.dot_dimension_numbers<[1], [0], [0], [1], [0, 0, 1, 1], [], []>} : vector<8x32xbf16>, vector<32x128xbf16>, vector<8x128xf32> -> vector<8x128xf32>
    %186 = vector.extract_strided_slice %182 {offsets = [0, 0], sizes = [8, 32], strides = [1, 1]} : vector<8x128xf32> to vector<8x32xf32>
    %187 = vector.extract_strided_slice %185 {offsets = [0, 0], sizes = [8, 32], strides = [1, 1]} : vector<8x128xf32> to vector<8x32xf32>
    %188 = arith.addf %186, %187 : vector<8x32xf32>
    %189 = arith.negf %188 : vector<8x32xf32>
    %190 = math.exp %189 : vector<8x32xf32>
    %cst_57 = arith.constant 1.000000e+00 : f32
    %191 = vector.broadcast %cst_57 : f32 to vector<8x32xf32>
    %192 = arith.addf %191, %190 : vector<8x32xf32>
    %193 = arith.divf %191, %192 : vector<8x32xf32>
    %194 = vector.extract_strided_slice %182 {offsets = [0, 32], sizes = [8, 32], strides = [1, 1]} : vector<8x128xf32> to vector<8x32xf32>
    %195 = vector.extract_strided_slice %185 {offsets = [0, 32], sizes = [8, 32], strides = [1, 1]} : vector<8x128xf32> to vector<8x32xf32>
    %196 = arith.addf %194, %195 : vector<8x32xf32>
    %197 = arith.negf %196 : vector<8x32xf32>
    %198 = math.exp %197 : vector<8x32xf32>
    %cst_58 = arith.constant 1.000000e+00 : f32
    %199 = vector.broadcast %cst_58 : f32 to vector<8x32xf32>
    %200 = arith.addf %199, %198 : vector<8x32xf32>
    %201 = arith.divf %199, %200 : vector<8x32xf32>
    %202 = vector.extract_strided_slice %182 {offsets = [0, 64], sizes = [8, 32], strides = [1, 1]} : vector<8x128xf32> to vector<8x32xf32>
    %203 = vector.extract_strided_slice %185 {offsets = [0, 64], sizes = [8, 32], strides = [1, 1]} : vector<8x128xf32> to vector<8x32xf32>
    %c0_59 = arith.constant 0 : index
    %c0_60 = arith.constant 0 : index
    %204 = vector.load %arg4[%c0_59, %c0_60] : memref<8x32xf32, #tpu.memory_space<vmem>>, vector<8x32xf32>
    %205 = arith.addf %203, %204 : vector<8x32xf32>
    %206 = arith.mulf %193, %205 : vector<8x32xf32>
    %207 = arith.addf %202, %206 : vector<8x32xf32>
    %208 = math.tanh %207 : vector<8x32xf32>
    %cst_61 = arith.constant 1.000000e+00 : f32
    %209 = vector.broadcast %cst_61 : f32 to vector<8x32xf32>
    %210 = arith.subf %209, %201 : vector<8x32xf32>
    %211 = arith.mulf %210, %208 : vector<8x32xf32>
    %212 = arith.mulf %201, %178 : vector<8x32xf32>
    %213 = arith.addf %211, %212 : vector<8x32xf32>
    %c6_i32 = arith.constant 6 : i32
    %214 = arith.index_cast %c6_i32 : i32 to index
    %c0_62 = arith.constant 0 : index
    %c0_63 = arith.constant 0 : index
    %215 = vector.load %arg2[%214, %c0_62, %c0_63] : memref<19x8x128xbf16, #tpu.memory_space<vmem>>, vector<1x8x128xbf16>
    %216 = vector.shape_cast %215 : vector<1x8x128xbf16> to vector<8x128xbf16>
    %217 = arith.extf %216 : vector<8x128xbf16> to vector<8x128xf32>
    %218 = arith.truncf %213 : vector<8x32xf32> to vector<8x32xbf16>
    %c0_64 = arith.constant 0 : index
    %c0_65 = arith.constant 0 : index
    %219 = vector.load %arg3[%c0_64, %c0_65] : memref<32x128xbf16, #tpu.memory_space<vmem>>, vector<32x128xbf16>
    %cst_66 = arith.constant dense<0.000000e+00> : vector<8x128xf32>
    %220 = tpu.matmul %218, %219, %cst_66 {dimension_numbers = #tpu.dot_dimension_numbers<[1], [0], [0], [1], [0, 0, 1, 1], [], []>} : vector<8x32xbf16>, vector<32x128xbf16>, vector<8x128xf32> -> vector<8x128xf32>
    %221 = vector.extract_strided_slice %217 {offsets = [0, 0], sizes = [8, 32], strides = [1, 1]} : vector<8x128xf32> to vector<8x32xf32>
    %222 = vector.extract_strided_slice %220 {offsets = [0, 0], sizes = [8, 32], strides = [1, 1]} : vector<8x128xf32> to vector<8x32xf32>
    %223 = arith.addf %221, %222 : vector<8x32xf32>
    %224 = arith.negf %223 : vector<8x32xf32>
    %225 = math.exp %224 : vector<8x32xf32>
    %cst_67 = arith.constant 1.000000e+00 : f32
    %226 = vector.broadcast %cst_67 : f32 to vector<8x32xf32>
    %227 = arith.addf %226, %225 : vector<8x32xf32>
    %228 = arith.divf %226, %227 : vector<8x32xf32>
    %229 = vector.extract_strided_slice %217 {offsets = [0, 32], sizes = [8, 32], strides = [1, 1]} : vector<8x128xf32> to vector<8x32xf32>
    %230 = vector.extract_strided_slice %220 {offsets = [0, 32], sizes = [8, 32], strides = [1, 1]} : vector<8x128xf32> to vector<8x32xf32>
    %231 = arith.addf %229, %230 : vector<8x32xf32>
    %232 = arith.negf %231 : vector<8x32xf32>
    %233 = math.exp %232 : vector<8x32xf32>
    %cst_68 = arith.constant 1.000000e+00 : f32
    %234 = vector.broadcast %cst_68 : f32 to vector<8x32xf32>
    %235 = arith.addf %234, %233 : vector<8x32xf32>
    %236 = arith.divf %234, %235 : vector<8x32xf32>
    %237 = vector.extract_strided_slice %217 {offsets = [0, 64], sizes = [8, 32], strides = [1, 1]} : vector<8x128xf32> to vector<8x32xf32>
    %238 = vector.extract_strided_slice %220 {offsets = [0, 64], sizes = [8, 32], strides = [1, 1]} : vector<8x128xf32> to vector<8x32xf32>
    %c0_69 = arith.constant 0 : index
    %c0_70 = arith.constant 0 : index
    %239 = vector.load %arg4[%c0_69, %c0_70] : memref<8x32xf32, #tpu.memory_space<vmem>>, vector<8x32xf32>
    %240 = arith.addf %238, %239 : vector<8x32xf32>
    %241 = arith.mulf %228, %240 : vector<8x32xf32>
    %242 = arith.addf %237, %241 : vector<8x32xf32>
    %243 = math.tanh %242 : vector<8x32xf32>
    %cst_71 = arith.constant 1.000000e+00 : f32
    %244 = vector.broadcast %cst_71 : f32 to vector<8x32xf32>
    %245 = arith.subf %244, %236 : vector<8x32xf32>
    %246 = arith.mulf %245, %243 : vector<8x32xf32>
    %247 = arith.mulf %236, %213 : vector<8x32xf32>
    %248 = arith.addf %246, %247 : vector<8x32xf32>
    %c7_i32 = arith.constant 7 : i32
    %249 = arith.index_cast %c7_i32 : i32 to index
    %c0_72 = arith.constant 0 : index
    %c0_73 = arith.constant 0 : index
    %250 = vector.load %arg2[%249, %c0_72, %c0_73] : memref<19x8x128xbf16, #tpu.memory_space<vmem>>, vector<1x8x128xbf16>
    %251 = vector.shape_cast %250 : vector<1x8x128xbf16> to vector<8x128xbf16>
    %252 = arith.extf %251 : vector<8x128xbf16> to vector<8x128xf32>
    %253 = arith.truncf %248 : vector<8x32xf32> to vector<8x32xbf16>
    %c0_74 = arith.constant 0 : index
    %c0_75 = arith.constant 0 : index
    %254 = vector.load %arg3[%c0_74, %c0_75] : memref<32x128xbf16, #tpu.memory_space<vmem>>, vector<32x128xbf16>
    %cst_76 = arith.constant dense<0.000000e+00> : vector<8x128xf32>
    %255 = tpu.matmul %253, %254, %cst_76 {dimension_numbers = #tpu.dot_dimension_numbers<[1], [0], [0], [1], [0, 0, 1, 1], [], []>} : vector<8x32xbf16>, vector<32x128xbf16>, vector<8x128xf32> -> vector<8x128xf32>
    %256 = vector.extract_strided_slice %252 {offsets = [0, 0], sizes = [8, 32], strides = [1, 1]} : vector<8x128xf32> to vector<8x32xf32>
    %257 = vector.extract_strided_slice %255 {offsets = [0, 0], sizes = [8, 32], strides = [1, 1]} : vector<8x128xf32> to vector<8x32xf32>
    %258 = arith.addf %256, %257 : vector<8x32xf32>
    %259 = arith.negf %258 : vector<8x32xf32>
    %260 = math.exp %259 : vector<8x32xf32>
    %cst_77 = arith.constant 1.000000e+00 : f32
    %261 = vector.broadcast %cst_77 : f32 to vector<8x32xf32>
    %262 = arith.addf %261, %260 : vector<8x32xf32>
    %263 = arith.divf %261, %262 : vector<8x32xf32>
    %264 = vector.extract_strided_slice %252 {offsets = [0, 32], sizes = [8, 32], strides = [1, 1]} : vector<8x128xf32> to vector<8x32xf32>
    %265 = vector.extract_strided_slice %255 {offsets = [0, 32], sizes = [8, 32], strides = [1, 1]} : vector<8x128xf32> to vector<8x32xf32>
    %266 = arith.addf %264, %265 : vector<8x32xf32>
    %267 = arith.negf %266 : vector<8x32xf32>
    %268 = math.exp %267 : vector<8x32xf32>
    %cst_78 = arith.constant 1.000000e+00 : f32
    %269 = vector.broadcast %cst_78 : f32 to vector<8x32xf32>
    %270 = arith.addf %269, %268 : vector<8x32xf32>
    %271 = arith.divf %269, %270 : vector<8x32xf32>
    %272 = vector.extract_strided_slice %252 {offsets = [0, 64], sizes = [8, 32], strides = [1, 1]} : vector<8x128xf32> to vector<8x32xf32>
    %273 = vector.extract_strided_slice %255 {offsets = [0, 64], sizes = [8, 32], strides = [1, 1]} : vector<8x128xf32> to vector<8x32xf32>
    %c0_79 = arith.constant 0 : index
    %c0_80 = arith.constant 0 : index
    %274 = vector.load %arg4[%c0_79, %c0_80] : memref<8x32xf32, #tpu.memory_space<vmem>>, vector<8x32xf32>
    %275 = arith.addf %273, %274 : vector<8x32xf32>
    %276 = arith.mulf %263, %275 : vector<8x32xf32>
    %277 = arith.addf %272, %276 : vector<8x32xf32>
    %278 = math.tanh %277 : vector<8x32xf32>
    %cst_81 = arith.constant 1.000000e+00 : f32
    %279 = vector.broadcast %cst_81 : f32 to vector<8x32xf32>
    %280 = arith.subf %279, %271 : vector<8x32xf32>
    %281 = arith.mulf %280, %278 : vector<8x32xf32>
    %282 = arith.mulf %271, %248 : vector<8x32xf32>
    %283 = arith.addf %281, %282 : vector<8x32xf32>
    %c8_i32 = arith.constant 8 : i32
    %284 = arith.index_cast %c8_i32 : i32 to index
    %c0_82 = arith.constant 0 : index
    %c0_83 = arith.constant 0 : index
    %285 = vector.load %arg2[%284, %c0_82, %c0_83] : memref<19x8x128xbf16, #tpu.memory_space<vmem>>, vector<1x8x128xbf16>
    %286 = vector.shape_cast %285 : vector<1x8x128xbf16> to vector<8x128xbf16>
    %287 = arith.extf %286 : vector<8x128xbf16> to vector<8x128xf32>
    %288 = arith.truncf %283 : vector<8x32xf32> to vector<8x32xbf16>
    %c0_84 = arith.constant 0 : index
    %c0_85 = arith.constant 0 : index
    %289 = vector.load %arg3[%c0_84, %c0_85] : memref<32x128xbf16, #tpu.memory_space<vmem>>, vector<32x128xbf16>
    %cst_86 = arith.constant dense<0.000000e+00> : vector<8x128xf32>
    %290 = tpu.matmul %288, %289, %cst_86 {dimension_numbers = #tpu.dot_dimension_numbers<[1], [0], [0], [1], [0, 0, 1, 1], [], []>} : vector<8x32xbf16>, vector<32x128xbf16>, vector<8x128xf32> -> vector<8x128xf32>
    %291 = vector.extract_strided_slice %287 {offsets = [0, 0], sizes = [8, 32], strides = [1, 1]} : vector<8x128xf32> to vector<8x32xf32>
    %292 = vector.extract_strided_slice %290 {offsets = [0, 0], sizes = [8, 32], strides = [1, 1]} : vector<8x128xf32> to vector<8x32xf32>
    %293 = arith.addf %291, %292 : vector<8x32xf32>
    %294 = arith.negf %293 : vector<8x32xf32>
    %295 = math.exp %294 : vector<8x32xf32>
    %cst_87 = arith.constant 1.000000e+00 : f32
    %296 = vector.broadcast %cst_87 : f32 to vector<8x32xf32>
    %297 = arith.addf %296, %295 : vector<8x32xf32>
    %298 = arith.divf %296, %297 : vector<8x32xf32>
    %299 = vector.extract_strided_slice %287 {offsets = [0, 32], sizes = [8, 32], strides = [1, 1]} : vector<8x128xf32> to vector<8x32xf32>
    %300 = vector.extract_strided_slice %290 {offsets = [0, 32], sizes = [8, 32], strides = [1, 1]} : vector<8x128xf32> to vector<8x32xf32>
    %301 = arith.addf %299, %300 : vector<8x32xf32>
    %302 = arith.negf %301 : vector<8x32xf32>
    %303 = math.exp %302 : vector<8x32xf32>
    %cst_88 = arith.constant 1.000000e+00 : f32
    %304 = vector.broadcast %cst_88 : f32 to vector<8x32xf32>
    %305 = arith.addf %304, %303 : vector<8x32xf32>
    %306 = arith.divf %304, %305 : vector<8x32xf32>
    %307 = vector.extract_strided_slice %287 {offsets = [0, 64], sizes = [8, 32], strides = [1, 1]} : vector<8x128xf32> to vector<8x32xf32>
    %308 = vector.extract_strided_slice %290 {offsets = [0, 64], sizes = [8, 32], strides = [1, 1]} : vector<8x128xf32> to vector<8x32xf32>
    %c0_89 = arith.constant 0 : index
    %c0_90 = arith.constant 0 : index
    %309 = vector.load %arg4[%c0_89, %c0_90] : memref<8x32xf32, #tpu.memory_space<vmem>>, vector<8x32xf32>
    %310 = arith.addf %308, %309 : vector<8x32xf32>
    %311 = arith.mulf %298, %310 : vector<8x32xf32>
    %312 = arith.addf %307, %311 : vector<8x32xf32>
    %313 = math.tanh %312 : vector<8x32xf32>
    %cst_91 = arith.constant 1.000000e+00 : f32
    %314 = vector.broadcast %cst_91 : f32 to vector<8x32xf32>
    %315 = arith.subf %314, %306 : vector<8x32xf32>
    %316 = arith.mulf %315, %313 : vector<8x32xf32>
    %317 = arith.mulf %306, %283 : vector<8x32xf32>
    %318 = arith.addf %316, %317 : vector<8x32xf32>
    %c9_i32 = arith.constant 9 : i32
    %319 = arith.index_cast %c9_i32 : i32 to index
    %c0_92 = arith.constant 0 : index
    %c0_93 = arith.constant 0 : index
    %320 = vector.load %arg2[%319, %c0_92, %c0_93] : memref<19x8x128xbf16, #tpu.memory_space<vmem>>, vector<1x8x128xbf16>
    %321 = vector.shape_cast %320 : vector<1x8x128xbf16> to vector<8x128xbf16>
    %322 = arith.extf %321 : vector<8x128xbf16> to vector<8x128xf32>
    %323 = arith.truncf %318 : vector<8x32xf32> to vector<8x32xbf16>
    %c0_94 = arith.constant 0 : index
    %c0_95 = arith.constant 0 : index
    %324 = vector.load %arg3[%c0_94, %c0_95] : memref<32x128xbf16, #tpu.memory_space<vmem>>, vector<32x128xbf16>
    %cst_96 = arith.constant dense<0.000000e+00> : vector<8x128xf32>
    %325 = tpu.matmul %323, %324, %cst_96 {dimension_numbers = #tpu.dot_dimension_numbers<[1], [0], [0], [1], [0, 0, 1, 1], [], []>} : vector<8x32xbf16>, vector<32x128xbf16>, vector<8x128xf32> -> vector<8x128xf32>
    %326 = vector.extract_strided_slice %322 {offsets = [0, 0], sizes = [8, 32], strides = [1, 1]} : vector<8x128xf32> to vector<8x32xf32>
    %327 = vector.extract_strided_slice %325 {offsets = [0, 0], sizes = [8, 32], strides = [1, 1]} : vector<8x128xf32> to vector<8x32xf32>
    %328 = arith.addf %326, %327 : vector<8x32xf32>
    %329 = arith.negf %328 : vector<8x32xf32>
    %330 = math.exp %329 : vector<8x32xf32>
    %cst_97 = arith.constant 1.000000e+00 : f32
    %331 = vector.broadcast %cst_97 : f32 to vector<8x32xf32>
    %332 = arith.addf %331, %330 : vector<8x32xf32>
    %333 = arith.divf %331, %332 : vector<8x32xf32>
    %334 = vector.extract_strided_slice %322 {offsets = [0, 32], sizes = [8, 32], strides = [1, 1]} : vector<8x128xf32> to vector<8x32xf32>
    %335 = vector.extract_strided_slice %325 {offsets = [0, 32], sizes = [8, 32], strides = [1, 1]} : vector<8x128xf32> to vector<8x32xf32>
    %336 = arith.addf %334, %335 : vector<8x32xf32>
    %337 = arith.negf %336 : vector<8x32xf32>
    %338 = math.exp %337 : vector<8x32xf32>
    %cst_98 = arith.constant 1.000000e+00 : f32
    %339 = vector.broadcast %cst_98 : f32 to vector<8x32xf32>
    %340 = arith.addf %339, %338 : vector<8x32xf32>
    %341 = arith.divf %339, %340 : vector<8x32xf32>
    %342 = vector.extract_strided_slice %322 {offsets = [0, 64], sizes = [8, 32], strides = [1, 1]} : vector<8x128xf32> to vector<8x32xf32>
    %343 = vector.extract_strided_slice %325 {offsets = [0, 64], sizes = [8, 32], strides = [1, 1]} : vector<8x128xf32> to vector<8x32xf32>
    %c0_99 = arith.constant 0 : index
    %c0_100 = arith.constant 0 : index
    %344 = vector.load %arg4[%c0_99, %c0_100] : memref<8x32xf32, #tpu.memory_space<vmem>>, vector<8x32xf32>
    %345 = arith.addf %343, %344 : vector<8x32xf32>
    %346 = arith.mulf %333, %345 : vector<8x32xf32>
    %347 = arith.addf %342, %346 : vector<8x32xf32>
    %348 = math.tanh %347 : vector<8x32xf32>
    %cst_101 = arith.constant 1.000000e+00 : f32
    %349 = vector.broadcast %cst_101 : f32 to vector<8x32xf32>
    %350 = arith.subf %349, %341 : vector<8x32xf32>
    %351 = arith.mulf %350, %348 : vector<8x32xf32>
    %352 = arith.mulf %341, %318 : vector<8x32xf32>
    %353 = arith.addf %351, %352 : vector<8x32xf32>
    %c10_i32 = arith.constant 10 : i32
    %354 = arith.index_cast %c10_i32 : i32 to index
    %c0_102 = arith.constant 0 : index
    %c0_103 = arith.constant 0 : index
    %355 = vector.load %arg2[%354, %c0_102, %c0_103] : memref<19x8x128xbf16, #tpu.memory_space<vmem>>, vector<1x8x128xbf16>
    %356 = vector.shape_cast %355 : vector<1x8x128xbf16> to vector<8x128xbf16>
    %357 = arith.extf %356 : vector<8x128xbf16> to vector<8x128xf32>
    %358 = arith.truncf %353 : vector<8x32xf32> to vector<8x32xbf16>
    %c0_104 = arith.constant 0 : index
    %c0_105 = arith.constant 0 : index
    %359 = vector.load %arg3[%c0_104, %c0_105] : memref<32x128xbf16, #tpu.memory_space<vmem>>, vector<32x128xbf16>
    %cst_106 = arith.constant dense<0.000000e+00> : vector<8x128xf32>
    %360 = tpu.matmul %358, %359, %cst_106 {dimension_numbers = #tpu.dot_dimension_numbers<[1], [0], [0], [1], [0, 0, 1, 1], [], []>} : vector<8x32xbf16>, vector<32x128xbf16>, vector<8x128xf32> -> vector<8x128xf32>
    %361 = vector.extract_strided_slice %357 {offsets = [0, 0], sizes = [8, 32], strides = [1, 1]} : vector<8x128xf32> to vector<8x32xf32>
    %362 = vector.extract_strided_slice %360 {offsets = [0, 0], sizes = [8, 32], strides = [1, 1]} : vector<8x128xf32> to vector<8x32xf32>
    %363 = arith.addf %361, %362 : vector<8x32xf32>
    %364 = arith.negf %363 : vector<8x32xf32>
    %365 = math.exp %364 : vector<8x32xf32>
    %cst_107 = arith.constant 1.000000e+00 : f32
    %366 = vector.broadcast %cst_107 : f32 to vector<8x32xf32>
    %367 = arith.addf %366, %365 : vector<8x32xf32>
    %368 = arith.divf %366, %367 : vector<8x32xf32>
    %369 = vector.extract_strided_slice %357 {offsets = [0, 32], sizes = [8, 32], strides = [1, 1]} : vector<8x128xf32> to vector<8x32xf32>
    %370 = vector.extract_strided_slice %360 {offsets = [0, 32], sizes = [8, 32], strides = [1, 1]} : vector<8x128xf32> to vector<8x32xf32>
    %371 = arith.addf %369, %370 : vector<8x32xf32>
    %372 = arith.negf %371 : vector<8x32xf32>
    %373 = math.exp %372 : vector<8x32xf32>
    %cst_108 = arith.constant 1.000000e+00 : f32
    %374 = vector.broadcast %cst_108 : f32 to vector<8x32xf32>
    %375 = arith.addf %374, %373 : vector<8x32xf32>
    %376 = arith.divf %374, %375 : vector<8x32xf32>
    %377 = vector.extract_strided_slice %357 {offsets = [0, 64], sizes = [8, 32], strides = [1, 1]} : vector<8x128xf32> to vector<8x32xf32>
    %378 = vector.extract_strided_slice %360 {offsets = [0, 64], sizes = [8, 32], strides = [1, 1]} : vector<8x128xf32> to vector<8x32xf32>
    %c0_109 = arith.constant 0 : index
    %c0_110 = arith.constant 0 : index
    %379 = vector.load %arg4[%c0_109, %c0_110] : memref<8x32xf32, #tpu.memory_space<vmem>>, vector<8x32xf32>
    %380 = arith.addf %378, %379 : vector<8x32xf32>
    %381 = arith.mulf %368, %380 : vector<8x32xf32>
    %382 = arith.addf %377, %381 : vector<8x32xf32>
    %383 = math.tanh %382 : vector<8x32xf32>
    %cst_111 = arith.constant 1.000000e+00 : f32
    %384 = vector.broadcast %cst_111 : f32 to vector<8x32xf32>
    %385 = arith.subf %384, %376 : vector<8x32xf32>
    %386 = arith.mulf %385, %383 : vector<8x32xf32>
    %387 = arith.mulf %376, %353 : vector<8x32xf32>
    %388 = arith.addf %386, %387 : vector<8x32xf32>
    %c11_i32 = arith.constant 11 : i32
    %389 = arith.index_cast %c11_i32 : i32 to index
    %c0_112 = arith.constant 0 : index
    %c0_113 = arith.constant 0 : index
    %390 = vector.load %arg2[%389, %c0_112, %c0_113] : memref<19x8x128xbf16, #tpu.memory_space<vmem>>, vector<1x8x128xbf16>
    %391 = vector.shape_cast %390 : vector<1x8x128xbf16> to vector<8x128xbf16>
    %392 = arith.extf %391 : vector<8x128xbf16> to vector<8x128xf32>
    %393 = arith.truncf %388 : vector<8x32xf32> to vector<8x32xbf16>
    %c0_114 = arith.constant 0 : index
    %c0_115 = arith.constant 0 : index
    %394 = vector.load %arg3[%c0_114, %c0_115] : memref<32x128xbf16, #tpu.memory_space<vmem>>, vector<32x128xbf16>
    %cst_116 = arith.constant dense<0.000000e+00> : vector<8x128xf32>
    %395 = tpu.matmul %393, %394, %cst_116 {dimension_numbers = #tpu.dot_dimension_numbers<[1], [0], [0], [1], [0, 0, 1, 1], [], []>} : vector<8x32xbf16>, vector<32x128xbf16>, vector<8x128xf32> -> vector<8x128xf32>
    %396 = vector.extract_strided_slice %392 {offsets = [0, 0], sizes = [8, 32], strides = [1, 1]} : vector<8x128xf32> to vector<8x32xf32>
    %397 = vector.extract_strided_slice %395 {offsets = [0, 0], sizes = [8, 32], strides = [1, 1]} : vector<8x128xf32> to vector<8x32xf32>
    %398 = arith.addf %396, %397 : vector<8x32xf32>
    %399 = arith.negf %398 : vector<8x32xf32>
    %400 = math.exp %399 : vector<8x32xf32>
    %cst_117 = arith.constant 1.000000e+00 : f32
    %401 = vector.broadcast %cst_117 : f32 to vector<8x32xf32>
    %402 = arith.addf %401, %400 : vector<8x32xf32>
    %403 = arith.divf %401, %402 : vector<8x32xf32>
    %404 = vector.extract_strided_slice %392 {offsets = [0, 32], sizes = [8, 32], strides = [1, 1]} : vector<8x128xf32> to vector<8x32xf32>
    %405 = vector.extract_strided_slice %395 {offsets = [0, 32], sizes = [8, 32], strides = [1, 1]} : vector<8x128xf32> to vector<8x32xf32>
    %406 = arith.addf %404, %405 : vector<8x32xf32>
    %407 = arith.negf %406 : vector<8x32xf32>
    %408 = math.exp %407 : vector<8x32xf32>
    %cst_118 = arith.constant 1.000000e+00 : f32
    %409 = vector.broadcast %cst_118 : f32 to vector<8x32xf32>
    %410 = arith.addf %409, %408 : vector<8x32xf32>
    %411 = arith.divf %409, %410 : vector<8x32xf32>
    %412 = vector.extract_strided_slice %392 {offsets = [0, 64], sizes = [8, 32], strides = [1, 1]} : vector<8x128xf32> to vector<8x32xf32>
    %413 = vector.extract_strided_slice %395 {offsets = [0, 64], sizes = [8, 32], strides = [1, 1]} : vector<8x128xf32> to vector<8x32xf32>
    %c0_119 = arith.constant 0 : index
    %c0_120 = arith.constant 0 : index
    %414 = vector.load %arg4[%c0_119, %c0_120] : memref<8x32xf32, #tpu.memory_space<vmem>>, vector<8x32xf32>
    %415 = arith.addf %413, %414 : vector<8x32xf32>
    %416 = arith.mulf %403, %415 : vector<8x32xf32>
    %417 = arith.addf %412, %416 : vector<8x32xf32>
    %418 = math.tanh %417 : vector<8x32xf32>
    %cst_121 = arith.constant 1.000000e+00 : f32
    %419 = vector.broadcast %cst_121 : f32 to vector<8x32xf32>
    %420 = arith.subf %419, %411 : vector<8x32xf32>
    %421 = arith.mulf %420, %418 : vector<8x32xf32>
    %422 = arith.mulf %411, %388 : vector<8x32xf32>
    %423 = arith.addf %421, %422 : vector<8x32xf32>
    %c12_i32 = arith.constant 12 : i32
    %424 = arith.index_cast %c12_i32 : i32 to index
    %c0_122 = arith.constant 0 : index
    %c0_123 = arith.constant 0 : index
    %425 = vector.load %arg2[%424, %c0_122, %c0_123] : memref<19x8x128xbf16, #tpu.memory_space<vmem>>, vector<1x8x128xbf16>
    %426 = vector.shape_cast %425 : vector<1x8x128xbf16> to vector<8x128xbf16>
    %427 = arith.extf %426 : vector<8x128xbf16> to vector<8x128xf32>
    %428 = arith.truncf %423 : vector<8x32xf32> to vector<8x32xbf16>
    %c0_124 = arith.constant 0 : index
    %c0_125 = arith.constant 0 : index
    %429 = vector.load %arg3[%c0_124, %c0_125] : memref<32x128xbf16, #tpu.memory_space<vmem>>, vector<32x128xbf16>
    %cst_126 = arith.constant dense<0.000000e+00> : vector<8x128xf32>
    %430 = tpu.matmul %428, %429, %cst_126 {dimension_numbers = #tpu.dot_dimension_numbers<[1], [0], [0], [1], [0, 0, 1, 1], [], []>} : vector<8x32xbf16>, vector<32x128xbf16>, vector<8x128xf32> -> vector<8x128xf32>
    %431 = vector.extract_strided_slice %427 {offsets = [0, 0], sizes = [8, 32], strides = [1, 1]} : vector<8x128xf32> to vector<8x32xf32>
    %432 = vector.extract_strided_slice %430 {offsets = [0, 0], sizes = [8, 32], strides = [1, 1]} : vector<8x128xf32> to vector<8x32xf32>
    %433 = arith.addf %431, %432 : vector<8x32xf32>
    %434 = arith.negf %433 : vector<8x32xf32>
    %435 = math.exp %434 : vector<8x32xf32>
    %cst_127 = arith.constant 1.000000e+00 : f32
    %436 = vector.broadcast %cst_127 : f32 to vector<8x32xf32>
    %437 = arith.addf %436, %435 : vector<8x32xf32>
    %438 = arith.divf %436, %437 : vector<8x32xf32>
    %439 = vector.extract_strided_slice %427 {offsets = [0, 32], sizes = [8, 32], strides = [1, 1]} : vector<8x128xf32> to vector<8x32xf32>
    %440 = vector.extract_strided_slice %430 {offsets = [0, 32], sizes = [8, 32], strides = [1, 1]} : vector<8x128xf32> to vector<8x32xf32>
    %441 = arith.addf %439, %440 : vector<8x32xf32>
    %442 = arith.negf %441 : vector<8x32xf32>
    %443 = math.exp %442 : vector<8x32xf32>
    %cst_128 = arith.constant 1.000000e+00 : f32
    %444 = vector.broadcast %cst_128 : f32 to vector<8x32xf32>
    %445 = arith.addf %444, %443 : vector<8x32xf32>
    %446 = arith.divf %444, %445 : vector<8x32xf32>
    %447 = vector.extract_strided_slice %427 {offsets = [0, 64], sizes = [8, 32], strides = [1, 1]} : vector<8x128xf32> to vector<8x32xf32>
    %448 = vector.extract_strided_slice %430 {offsets = [0, 64], sizes = [8, 32], strides = [1, 1]} : vector<8x128xf32> to vector<8x32xf32>
    %c0_129 = arith.constant 0 : index
    %c0_130 = arith.constant 0 : index
    %449 = vector.load %arg4[%c0_129, %c0_130] : memref<8x32xf32, #tpu.memory_space<vmem>>, vector<8x32xf32>
    %450 = arith.addf %448, %449 : vector<8x32xf32>
    %451 = arith.mulf %438, %450 : vector<8x32xf32>
    %452 = arith.addf %447, %451 : vector<8x32xf32>
    %453 = math.tanh %452 : vector<8x32xf32>
    %cst_131 = arith.constant 1.000000e+00 : f32
    %454 = vector.broadcast %cst_131 : f32 to vector<8x32xf32>
    %455 = arith.subf %454, %446 : vector<8x32xf32>
    %456 = arith.mulf %455, %453 : vector<8x32xf32>
    %457 = arith.mulf %446, %423 : vector<8x32xf32>
    %458 = arith.addf %456, %457 : vector<8x32xf32>
    %c13_i32 = arith.constant 13 : i32
    %459 = arith.index_cast %c13_i32 : i32 to index
    %c0_132 = arith.constant 0 : index
    %c0_133 = arith.constant 0 : index
    %460 = vector.load %arg2[%459, %c0_132, %c0_133] : memref<19x8x128xbf16, #tpu.memory_space<vmem>>, vector<1x8x128xbf16>
    %461 = vector.shape_cast %460 : vector<1x8x128xbf16> to vector<8x128xbf16>
    %462 = arith.extf %461 : vector<8x128xbf16> to vector<8x128xf32>
    %463 = arith.truncf %458 : vector<8x32xf32> to vector<8x32xbf16>
    %c0_134 = arith.constant 0 : index
    %c0_135 = arith.constant 0 : index
    %464 = vector.load %arg3[%c0_134, %c0_135] : memref<32x128xbf16, #tpu.memory_space<vmem>>, vector<32x128xbf16>
    %cst_136 = arith.constant dense<0.000000e+00> : vector<8x128xf32>
    %465 = tpu.matmul %463, %464, %cst_136 {dimension_numbers = #tpu.dot_dimension_numbers<[1], [0], [0], [1], [0, 0, 1, 1], [], []>} : vector<8x32xbf16>, vector<32x128xbf16>, vector<8x128xf32> -> vector<8x128xf32>
    %466 = vector.extract_strided_slice %462 {offsets = [0, 0], sizes = [8, 32], strides = [1, 1]} : vector<8x128xf32> to vector<8x32xf32>
    %467 = vector.extract_strided_slice %465 {offsets = [0, 0], sizes = [8, 32], strides = [1, 1]} : vector<8x128xf32> to vector<8x32xf32>
    %468 = arith.addf %466, %467 : vector<8x32xf32>
    %469 = arith.negf %468 : vector<8x32xf32>
    %470 = math.exp %469 : vector<8x32xf32>
    %cst_137 = arith.constant 1.000000e+00 : f32
    %471 = vector.broadcast %cst_137 : f32 to vector<8x32xf32>
    %472 = arith.addf %471, %470 : vector<8x32xf32>
    %473 = arith.divf %471, %472 : vector<8x32xf32>
    %474 = vector.extract_strided_slice %462 {offsets = [0, 32], sizes = [8, 32], strides = [1, 1]} : vector<8x128xf32> to vector<8x32xf32>
    %475 = vector.extract_strided_slice %465 {offsets = [0, 32], sizes = [8, 32], strides = [1, 1]} : vector<8x128xf32> to vector<8x32xf32>
    %476 = arith.addf %474, %475 : vector<8x32xf32>
    %477 = arith.negf %476 : vector<8x32xf32>
    %478 = math.exp %477 : vector<8x32xf32>
    %cst_138 = arith.constant 1.000000e+00 : f32
    %479 = vector.broadcast %cst_138 : f32 to vector<8x32xf32>
    %480 = arith.addf %479, %478 : vector<8x32xf32>
    %481 = arith.divf %479, %480 : vector<8x32xf32>
    %482 = vector.extract_strided_slice %462 {offsets = [0, 64], sizes = [8, 32], strides = [1, 1]} : vector<8x128xf32> to vector<8x32xf32>
    %483 = vector.extract_strided_slice %465 {offsets = [0, 64], sizes = [8, 32], strides = [1, 1]} : vector<8x128xf32> to vector<8x32xf32>
    %c0_139 = arith.constant 0 : index
    %c0_140 = arith.constant 0 : index
    %484 = vector.load %arg4[%c0_139, %c0_140] : memref<8x32xf32, #tpu.memory_space<vmem>>, vector<8x32xf32>
    %485 = arith.addf %483, %484 : vector<8x32xf32>
    %486 = arith.mulf %473, %485 : vector<8x32xf32>
    %487 = arith.addf %482, %486 : vector<8x32xf32>
    %488 = math.tanh %487 : vector<8x32xf32>
    %cst_141 = arith.constant 1.000000e+00 : f32
    %489 = vector.broadcast %cst_141 : f32 to vector<8x32xf32>
    %490 = arith.subf %489, %481 : vector<8x32xf32>
    %491 = arith.mulf %490, %488 : vector<8x32xf32>
    %492 = arith.mulf %481, %458 : vector<8x32xf32>
    %493 = arith.addf %491, %492 : vector<8x32xf32>
    %c14_i32 = arith.constant 14 : i32
    %494 = arith.index_cast %c14_i32 : i32 to index
    %c0_142 = arith.constant 0 : index
    %c0_143 = arith.constant 0 : index
    %495 = vector.load %arg2[%494, %c0_142, %c0_143] : memref<19x8x128xbf16, #tpu.memory_space<vmem>>, vector<1x8x128xbf16>
    %496 = vector.shape_cast %495 : vector<1x8x128xbf16> to vector<8x128xbf16>
    %497 = arith.extf %496 : vector<8x128xbf16> to vector<8x128xf32>
    %498 = arith.truncf %493 : vector<8x32xf32> to vector<8x32xbf16>
    %c0_144 = arith.constant 0 : index
    %c0_145 = arith.constant 0 : index
    %499 = vector.load %arg3[%c0_144, %c0_145] : memref<32x128xbf16, #tpu.memory_space<vmem>>, vector<32x128xbf16>
    %cst_146 = arith.constant dense<0.000000e+00> : vector<8x128xf32>
    %500 = tpu.matmul %498, %499, %cst_146 {dimension_numbers = #tpu.dot_dimension_numbers<[1], [0], [0], [1], [0, 0, 1, 1], [], []>} : vector<8x32xbf16>, vector<32x128xbf16>, vector<8x128xf32> -> vector<8x128xf32>
    %501 = vector.extract_strided_slice %497 {offsets = [0, 0], sizes = [8, 32], strides = [1, 1]} : vector<8x128xf32> to vector<8x32xf32>
    %502 = vector.extract_strided_slice %500 {offsets = [0, 0], sizes = [8, 32], strides = [1, 1]} : vector<8x128xf32> to vector<8x32xf32>
    %503 = arith.addf %501, %502 : vector<8x32xf32>
    %504 = arith.negf %503 : vector<8x32xf32>
    %505 = math.exp %504 : vector<8x32xf32>
    %cst_147 = arith.constant 1.000000e+00 : f32
    %506 = vector.broadcast %cst_147 : f32 to vector<8x32xf32>
    %507 = arith.addf %506, %505 : vector<8x32xf32>
    %508 = arith.divf %506, %507 : vector<8x32xf32>
    %509 = vector.extract_strided_slice %497 {offsets = [0, 32], sizes = [8, 32], strides = [1, 1]} : vector<8x128xf32> to vector<8x32xf32>
    %510 = vector.extract_strided_slice %500 {offsets = [0, 32], sizes = [8, 32], strides = [1, 1]} : vector<8x128xf32> to vector<8x32xf32>
    %511 = arith.addf %509, %510 : vector<8x32xf32>
    %512 = arith.negf %511 : vector<8x32xf32>
    %513 = math.exp %512 : vector<8x32xf32>
    %cst_148 = arith.constant 1.000000e+00 : f32
    %514 = vector.broadcast %cst_148 : f32 to vector<8x32xf32>
    %515 = arith.addf %514, %513 : vector<8x32xf32>
    %516 = arith.divf %514, %515 : vector<8x32xf32>
    %517 = vector.extract_strided_slice %497 {offsets = [0, 64], sizes = [8, 32], strides = [1, 1]} : vector<8x128xf32> to vector<8x32xf32>
    %518 = vector.extract_strided_slice %500 {offsets = [0, 64], sizes = [8, 32], strides = [1, 1]} : vector<8x128xf32> to vector<8x32xf32>
    %c0_149 = arith.constant 0 : index
    %c0_150 = arith.constant 0 : index
    %519 = vector.load %arg4[%c0_149, %c0_150] : memref<8x32xf32, #tpu.memory_space<vmem>>, vector<8x32xf32>
    %520 = arith.addf %518, %519 : vector<8x32xf32>
    %521 = arith.mulf %508, %520 : vector<8x32xf32>
    %522 = arith.addf %517, %521 : vector<8x32xf32>
    %523 = math.tanh %522 : vector<8x32xf32>
    %cst_151 = arith.constant 1.000000e+00 : f32
    %524 = vector.broadcast %cst_151 : f32 to vector<8x32xf32>
    %525 = arith.subf %524, %516 : vector<8x32xf32>
    %526 = arith.mulf %525, %523 : vector<8x32xf32>
    %527 = arith.mulf %516, %493 : vector<8x32xf32>
    %528 = arith.addf %526, %527 : vector<8x32xf32>
    %c15_i32 = arith.constant 15 : i32
    %529 = arith.index_cast %c15_i32 : i32 to index
    %c0_152 = arith.constant 0 : index
    %c0_153 = arith.constant 0 : index
    %530 = vector.load %arg2[%529, %c0_152, %c0_153] : memref<19x8x128xbf16, #tpu.memory_space<vmem>>, vector<1x8x128xbf16>
    %531 = vector.shape_cast %530 : vector<1x8x128xbf16> to vector<8x128xbf16>
    %532 = arith.extf %531 : vector<8x128xbf16> to vector<8x128xf32>
    %533 = arith.truncf %528 : vector<8x32xf32> to vector<8x32xbf16>
    %c0_154 = arith.constant 0 : index
    %c0_155 = arith.constant 0 : index
    %534 = vector.load %arg3[%c0_154, %c0_155] : memref<32x128xbf16, #tpu.memory_space<vmem>>, vector<32x128xbf16>
    %cst_156 = arith.constant dense<0.000000e+00> : vector<8x128xf32>
    %535 = tpu.matmul %533, %534, %cst_156 {dimension_numbers = #tpu.dot_dimension_numbers<[1], [0], [0], [1], [0, 0, 1, 1], [], []>} : vector<8x32xbf16>, vector<32x128xbf16>, vector<8x128xf32> -> vector<8x128xf32>
    %536 = vector.extract_strided_slice %532 {offsets = [0, 0], sizes = [8, 32], strides = [1, 1]} : vector<8x128xf32> to vector<8x32xf32>
    %537 = vector.extract_strided_slice %535 {offsets = [0, 0], sizes = [8, 32], strides = [1, 1]} : vector<8x128xf32> to vector<8x32xf32>
    %538 = arith.addf %536, %537 : vector<8x32xf32>
    %539 = arith.negf %538 : vector<8x32xf32>
    %540 = math.exp %539 : vector<8x32xf32>
    %cst_157 = arith.constant 1.000000e+00 : f32
    %541 = vector.broadcast %cst_157 : f32 to vector<8x32xf32>
    %542 = arith.addf %541, %540 : vector<8x32xf32>
    %543 = arith.divf %541, %542 : vector<8x32xf32>
    %544 = vector.extract_strided_slice %532 {offsets = [0, 32], sizes = [8, 32], strides = [1, 1]} : vector<8x128xf32> to vector<8x32xf32>
    %545 = vector.extract_strided_slice %535 {offsets = [0, 32], sizes = [8, 32], strides = [1, 1]} : vector<8x128xf32> to vector<8x32xf32>
    %546 = arith.addf %544, %545 : vector<8x32xf32>
    %547 = arith.negf %546 : vector<8x32xf32>
    %548 = math.exp %547 : vector<8x32xf32>
    %cst_158 = arith.constant 1.000000e+00 : f32
    %549 = vector.broadcast %cst_158 : f32 to vector<8x32xf32>
    %550 = arith.addf %549, %548 : vector<8x32xf32>
    %551 = arith.divf %549, %550 : vector<8x32xf32>
    %552 = vector.extract_strided_slice %532 {offsets = [0, 64], sizes = [8, 32], strides = [1, 1]} : vector<8x128xf32> to vector<8x32xf32>
    %553 = vector.extract_strided_slice %535 {offsets = [0, 64], sizes = [8, 32], strides = [1, 1]} : vector<8x128xf32> to vector<8x32xf32>
    %c0_159 = arith.constant 0 : index
    %c0_160 = arith.constant 0 : index
    %554 = vector.load %arg4[%c0_159, %c0_160] : memref<8x32xf32, #tpu.memory_space<vmem>>, vector<8x32xf32>
    %555 = arith.addf %553, %554 : vector<8x32xf32>
    %556 = arith.mulf %543, %555 : vector<8x32xf32>
    %557 = arith.addf %552, %556 : vector<8x32xf32>
    %558 = math.tanh %557 : vector<8x32xf32>
    %cst_161 = arith.constant 1.000000e+00 : f32
    %559 = vector.broadcast %cst_161 : f32 to vector<8x32xf32>
    %560 = arith.subf %559, %551 : vector<8x32xf32>
    %561 = arith.mulf %560, %558 : vector<8x32xf32>
    %562 = arith.mulf %551, %528 : vector<8x32xf32>
    %563 = arith.addf %561, %562 : vector<8x32xf32>
    %c16_i32 = arith.constant 16 : i32
    %564 = arith.index_cast %c16_i32 : i32 to index
    %c0_162 = arith.constant 0 : index
    %c0_163 = arith.constant 0 : index
    %565 = vector.load %arg2[%564, %c0_162, %c0_163] : memref<19x8x128xbf16, #tpu.memory_space<vmem>>, vector<1x8x128xbf16>
    %566 = vector.shape_cast %565 : vector<1x8x128xbf16> to vector<8x128xbf16>
    %567 = arith.extf %566 : vector<8x128xbf16> to vector<8x128xf32>
    %568 = arith.truncf %563 : vector<8x32xf32> to vector<8x32xbf16>
    %c0_164 = arith.constant 0 : index
    %c0_165 = arith.constant 0 : index
    %569 = vector.load %arg3[%c0_164, %c0_165] : memref<32x128xbf16, #tpu.memory_space<vmem>>, vector<32x128xbf16>
    %cst_166 = arith.constant dense<0.000000e+00> : vector<8x128xf32>
    %570 = tpu.matmul %568, %569, %cst_166 {dimension_numbers = #tpu.dot_dimension_numbers<[1], [0], [0], [1], [0, 0, 1, 1], [], []>} : vector<8x32xbf16>, vector<32x128xbf16>, vector<8x128xf32> -> vector<8x128xf32>
    %571 = vector.extract_strided_slice %567 {offsets = [0, 0], sizes = [8, 32], strides = [1, 1]} : vector<8x128xf32> to vector<8x32xf32>
    %572 = vector.extract_strided_slice %570 {offsets = [0, 0], sizes = [8, 32], strides = [1, 1]} : vector<8x128xf32> to vector<8x32xf32>
    %573 = arith.addf %571, %572 : vector<8x32xf32>
    %574 = arith.negf %573 : vector<8x32xf32>
    %575 = math.exp %574 : vector<8x32xf32>
    %cst_167 = arith.constant 1.000000e+00 : f32
    %576 = vector.broadcast %cst_167 : f32 to vector<8x32xf32>
    %577 = arith.addf %576, %575 : vector<8x32xf32>
    %578 = arith.divf %576, %577 : vector<8x32xf32>
    %579 = vector.extract_strided_slice %567 {offsets = [0, 32], sizes = [8, 32], strides = [1, 1]} : vector<8x128xf32> to vector<8x32xf32>
    %580 = vector.extract_strided_slice %570 {offsets = [0, 32], sizes = [8, 32], strides = [1, 1]} : vector<8x128xf32> to vector<8x32xf32>
    %581 = arith.addf %579, %580 : vector<8x32xf32>
    %582 = arith.negf %581 : vector<8x32xf32>
    %583 = math.exp %582 : vector<8x32xf32>
    %cst_168 = arith.constant 1.000000e+00 : f32
    %584 = vector.broadcast %cst_168 : f32 to vector<8x32xf32>
    %585 = arith.addf %584, %583 : vector<8x32xf32>
    %586 = arith.divf %584, %585 : vector<8x32xf32>
    %587 = vector.extract_strided_slice %567 {offsets = [0, 64], sizes = [8, 32], strides = [1, 1]} : vector<8x128xf32> to vector<8x32xf32>
    %588 = vector.extract_strided_slice %570 {offsets = [0, 64], sizes = [8, 32], strides = [1, 1]} : vector<8x128xf32> to vector<8x32xf32>
    %c0_169 = arith.constant 0 : index
    %c0_170 = arith.constant 0 : index
    %589 = vector.load %arg4[%c0_169, %c0_170] : memref<8x32xf32, #tpu.memory_space<vmem>>, vector<8x32xf32>
    %590 = arith.addf %588, %589 : vector<8x32xf32>
    %591 = arith.mulf %578, %590 : vector<8x32xf32>
    %592 = arith.addf %587, %591 : vector<8x32xf32>
    %593 = math.tanh %592 : vector<8x32xf32>
    %cst_171 = arith.constant 1.000000e+00 : f32
    %594 = vector.broadcast %cst_171 : f32 to vector<8x32xf32>
    %595 = arith.subf %594, %586 : vector<8x32xf32>
    %596 = arith.mulf %595, %593 : vector<8x32xf32>
    %597 = arith.mulf %586, %563 : vector<8x32xf32>
    %598 = arith.addf %596, %597 : vector<8x32xf32>
    %c17_i32 = arith.constant 17 : i32
    %599 = arith.index_cast %c17_i32 : i32 to index
    %c0_172 = arith.constant 0 : index
    %c0_173 = arith.constant 0 : index
    %600 = vector.load %arg2[%599, %c0_172, %c0_173] : memref<19x8x128xbf16, #tpu.memory_space<vmem>>, vector<1x8x128xbf16>
    %601 = vector.shape_cast %600 : vector<1x8x128xbf16> to vector<8x128xbf16>
    %602 = arith.extf %601 : vector<8x128xbf16> to vector<8x128xf32>
    %603 = arith.truncf %598 : vector<8x32xf32> to vector<8x32xbf16>
    %c0_174 = arith.constant 0 : index
    %c0_175 = arith.constant 0 : index
    %604 = vector.load %arg3[%c0_174, %c0_175] : memref<32x128xbf16, #tpu.memory_space<vmem>>, vector<32x128xbf16>
    %cst_176 = arith.constant dense<0.000000e+00> : vector<8x128xf32>
    %605 = tpu.matmul %603, %604, %cst_176 {dimension_numbers = #tpu.dot_dimension_numbers<[1], [0], [0], [1], [0, 0, 1, 1], [], []>} : vector<8x32xbf16>, vector<32x128xbf16>, vector<8x128xf32> -> vector<8x128xf32>
    %606 = vector.extract_strided_slice %602 {offsets = [0, 0], sizes = [8, 32], strides = [1, 1]} : vector<8x128xf32> to vector<8x32xf32>
    %607 = vector.extract_strided_slice %605 {offsets = [0, 0], sizes = [8, 32], strides = [1, 1]} : vector<8x128xf32> to vector<8x32xf32>
    %608 = arith.addf %606, %607 : vector<8x32xf32>
    %609 = arith.negf %608 : vector<8x32xf32>
    %610 = math.exp %609 : vector<8x32xf32>
    %cst_177 = arith.constant 1.000000e+00 : f32
    %611 = vector.broadcast %cst_177 : f32 to vector<8x32xf32>
    %612 = arith.addf %611, %610 : vector<8x32xf32>
    %613 = arith.divf %611, %612 : vector<8x32xf32>
    %614 = vector.extract_strided_slice %602 {offsets = [0, 32], sizes = [8, 32], strides = [1, 1]} : vector<8x128xf32> to vector<8x32xf32>
    %615 = vector.extract_strided_slice %605 {offsets = [0, 32], sizes = [8, 32], strides = [1, 1]} : vector<8x128xf32> to vector<8x32xf32>
    %616 = arith.addf %614, %615 : vector<8x32xf32>
    %617 = arith.negf %616 : vector<8x32xf32>
    %618 = math.exp %617 : vector<8x32xf32>
    %cst_178 = arith.constant 1.000000e+00 : f32
    %619 = vector.broadcast %cst_178 : f32 to vector<8x32xf32>
    %620 = arith.addf %619, %618 : vector<8x32xf32>
    %621 = arith.divf %619, %620 : vector<8x32xf32>
    %622 = vector.extract_strided_slice %602 {offsets = [0, 64], sizes = [8, 32], strides = [1, 1]} : vector<8x128xf32> to vector<8x32xf32>
    %623 = vector.extract_strided_slice %605 {offsets = [0, 64], sizes = [8, 32], strides = [1, 1]} : vector<8x128xf32> to vector<8x32xf32>
    %c0_179 = arith.constant 0 : index
    %c0_180 = arith.constant 0 : index
    %624 = vector.load %arg4[%c0_179, %c0_180] : memref<8x32xf32, #tpu.memory_space<vmem>>, vector<8x32xf32>
    %625 = arith.addf %623, %624 : vector<8x32xf32>
    %626 = arith.mulf %613, %625 : vector<8x32xf32>
    %627 = arith.addf %622, %626 : vector<8x32xf32>
    %628 = math.tanh %627 : vector<8x32xf32>
    %cst_181 = arith.constant 1.000000e+00 : f32
    %629 = vector.broadcast %cst_181 : f32 to vector<8x32xf32>
    %630 = arith.subf %629, %621 : vector<8x32xf32>
    %631 = arith.mulf %630, %628 : vector<8x32xf32>
    %632 = arith.mulf %621, %598 : vector<8x32xf32>
    %633 = arith.addf %631, %632 : vector<8x32xf32>
    %c18_i32 = arith.constant 18 : i32
    %634 = arith.index_cast %c18_i32 : i32 to index
    %c0_182 = arith.constant 0 : index
    %c0_183 = arith.constant 0 : index
    %635 = vector.load %arg2[%634, %c0_182, %c0_183] : memref<19x8x128xbf16, #tpu.memory_space<vmem>>, vector<1x8x128xbf16>
    %636 = vector.shape_cast %635 : vector<1x8x128xbf16> to vector<8x128xbf16>
    %637 = arith.extf %636 : vector<8x128xbf16> to vector<8x128xf32>
    %638 = arith.truncf %633 : vector<8x32xf32> to vector<8x32xbf16>
    %c0_184 = arith.constant 0 : index
    %c0_185 = arith.constant 0 : index
    %639 = vector.load %arg3[%c0_184, %c0_185] : memref<32x128xbf16, #tpu.memory_space<vmem>>, vector<32x128xbf16>
    %cst_186 = arith.constant dense<0.000000e+00> : vector<8x128xf32>
    %640 = tpu.matmul %638, %639, %cst_186 {dimension_numbers = #tpu.dot_dimension_numbers<[1], [0], [0], [1], [0, 0, 1, 1], [], []>} : vector<8x32xbf16>, vector<32x128xbf16>, vector<8x128xf32> -> vector<8x128xf32>
    %641 = vector.extract_strided_slice %637 {offsets = [0, 0], sizes = [8, 32], strides = [1, 1]} : vector<8x128xf32> to vector<8x32xf32>
    %642 = vector.extract_strided_slice %640 {offsets = [0, 0], sizes = [8, 32], strides = [1, 1]} : vector<8x128xf32> to vector<8x32xf32>
    %643 = arith.addf %641, %642 : vector<8x32xf32>
    %644 = arith.negf %643 : vector<8x32xf32>
    %645 = math.exp %644 : vector<8x32xf32>
    %cst_187 = arith.constant 1.000000e+00 : f32
    %646 = vector.broadcast %cst_187 : f32 to vector<8x32xf32>
    %647 = arith.addf %646, %645 : vector<8x32xf32>
    %648 = arith.divf %646, %647 : vector<8x32xf32>
    %649 = vector.extract_strided_slice %637 {offsets = [0, 32], sizes = [8, 32], strides = [1, 1]} : vector<8x128xf32> to vector<8x32xf32>
    %650 = vector.extract_strided_slice %640 {offsets = [0, 32], sizes = [8, 32], strides = [1, 1]} : vector<8x128xf32> to vector<8x32xf32>
    %651 = arith.addf %649, %650 : vector<8x32xf32>
    %652 = arith.negf %651 : vector<8x32xf32>
    %653 = math.exp %652 : vector<8x32xf32>
    %cst_188 = arith.constant 1.000000e+00 : f32
    %654 = vector.broadcast %cst_188 : f32 to vector<8x32xf32>
    %655 = arith.addf %654, %653 : vector<8x32xf32>
    %656 = arith.divf %654, %655 : vector<8x32xf32>
    %657 = vector.extract_strided_slice %637 {offsets = [0, 64], sizes = [8, 32], strides = [1, 1]} : vector<8x128xf32> to vector<8x32xf32>
    %658 = vector.extract_strided_slice %640 {offsets = [0, 64], sizes = [8, 32], strides = [1, 1]} : vector<8x128xf32> to vector<8x32xf32>
    %c0_189 = arith.constant 0 : index
    %c0_190 = arith.constant 0 : index
    %659 = vector.load %arg4[%c0_189, %c0_190] : memref<8x32xf32, #tpu.memory_space<vmem>>, vector<8x32xf32>
    %660 = arith.addf %658, %659 : vector<8x32xf32>
    %661 = arith.mulf %648, %660 : vector<8x32xf32>
    %662 = arith.addf %657, %661 : vector<8x32xf32>
    %663 = math.tanh %662 : vector<8x32xf32>
    %cst_191 = arith.constant 1.000000e+00 : f32
    %664 = vector.broadcast %cst_191 : f32 to vector<8x32xf32>
    %665 = arith.subf %664, %656 : vector<8x32xf32>
    %666 = arith.mulf %665, %663 : vector<8x32xf32>
    %667 = arith.mulf %656, %633 : vector<8x32xf32>
    %668 = arith.addf %666, %667 : vector<8x32xf32>
    %c19_i32 = arith.constant 19 : i32
    %c0_192 = arith.constant 0 : index
    %c0_193 = arith.constant 0 : index
    %669 = vector.load %arg6[%c0_192, %c0_193] : memref<8x32xf32, #tpu.memory_space<vmem>>, vector<8x32xf32>
    tpu.vector_store %arg6[%c0_192, %c0_193], %668 {strides = array<i32>} : memref<8x32xf32, #tpu.memory_space<vmem>>, vector<8x32xf32>,
    %c1_i32_194 = arith.constant 1 : i32
    %670 = arith.cmpi eq, %arg1, %c1_i32_194 : i32
    %671 = arith.extui %670 : i1 to i32
    %c0_i32_195 = arith.constant 0 : i32
    %672 = arith.cmpi ne, %671, %c0_i32_195 : i32
    scf.if %672 {
      %c0_196 = arith.constant 0 : index
      %c0_197 = arith.constant 0 : index
      %673 = vector.load %arg5[%c0_196, %c0_197] : memref<8x32xf32, #tpu.memory_space<vmem>>, vector<8x32xf32>
      tpu.vector_store %arg5[%c0_196, %c0_197], %668 {strides = array<i32>} : memref<8x32xf32, #tpu.memory_space<vmem>>, vector<8x32xf32>,
    } else {
    }
    return
  }
  func.func @transform_0(%arg0: i32, %arg1: i32) -> (i32, i32, i32) {
    %c0_i32 = arith.constant 0 : i32
    %c0_i32_0 = arith.constant 0 : i32
    return %arg1, %arg0, %c0_i32 : i32, i32, i32
  }
  func.func @transform_1(%arg0: i32, %arg1: i32) -> (i32, i32) {
    %c0_i32 = arith.constant 0 : i32
    %c0_i32_0 = arith.constant 0 : i32
    %c0_i32_1 = arith.constant 0 : i32
    return %c0_i32, %c0_i32_0 : i32, i32
  }
  func.func @transform_2(%arg0: i32, %arg1: i32) -> (i32, i32) {
    %c0_i32 = arith.constant 0 : i32
    %c0_i32_0 = arith.constant 0 : i32
    %c0_i32_1 = arith.constant 0 : i32
    return %c0_i32, %c0_i32_0 : i32, i32
  }
  func.func @transform_3(%arg0: i32, %arg1: i32) -> (i32, i32) {
    %c0_i32 = arith.constant 0 : i32
    %c0_i32_0 = arith.constant 0 : i32
    return %arg0, %c0_i32 : i32, i32
  }
}

module attributes {stable_mosaic.version = 11 : i64} {
  func.func @_gru_kernel(%arg0: i32, %arg1: i32, %arg2: memref<19x8x128xbf16, #tpu.memory_space<vmem>>, %arg3: memref<32x128xbf16, #tpu.memory_space<vmem>>, %arg4: memref<8x32xf32, #tpu.memory_space<vmem>>, %arg5: memref<8x32xf32, #tpu.memory_space<vmem>>, %arg6: memref<8x32xf32, #tpu.memory_space<vmem>>) attributes {dimension_semantics = [#tpu.dimension_semantics<parallel>, #tpu.dimension_semantics<arbitrary>], iteration_bounds = array<i64: 1, 2>, scalar_prefetch = 0 : i64, scratch_operands = 1 : i64, tpu.core_type = #tpu.core_type<tc>, window_params = [{transform_indices = @transform_0, window_bounds = array<i64: 19, 8, 128>}, {pipeline_mode = #tpu.pipeline_mode<synchronous>, transform_indices = @transform_1, window_bounds = array<i64: 32, 128>}, {pipeline_mode = #tpu.pipeline_mode<synchronous>, transform_indices = @transform_2, window_bounds = array<i64: 8, 32>}, {transform_indices = @transform_3, window_bounds = array<i64: 8, 32>}]} {
    %c0_i32 = arith.constant 0 : i32
    %0 = arith.cmpi eq, %arg1, %c0_i32 : i32
    %1 = arith.extui %0 : i1 to i32
    %c0_i32_0 = arith.constant 0 : i32
    %2 = arith.cmpi ne, %1, %c0_i32_0 : i32
    scf.if %2 {
      %cst_196 = arith.constant 0.000000e+00 : f32
      %673 = vector.broadcast %cst_196 : f32 to vector<8x32xf32>
      %c0_197 = arith.constant 0 : index
      %c0_198 = arith.constant 0 : index
      %674 = vector.load %arg6[%c0_197, %c0_198] : memref<8x32xf32, #tpu.memory_space<vmem>>, vector<8x32xf32>
      tpu.vector_store %arg6[%c0_197, %c0_198], %673 {strides = array<i32>} : memref<8x32xf32, #tpu.memory_space<vmem>>, vector<8x32xf32>,
    } else {
    }
    %c0 = arith.constant 0 : index
    %c0_1 = arith.constant 0 : index
    %3 = vector.load %arg6[%c0, %c0_1] : memref<8x32xf32, #tpu.memory_space<vmem>>, vector<8x32xf32>
    %c0_i32_2 = arith.constant 0 : i32
    %4 = arith.index_cast %c0_i32_2 : i32 to index
    %c0_3 = arith.constant 0 : index
    %c0_4 = arith.constant 0 : index
    %5 = vector.load %arg2[%4, %c0_3, %c0_4] : memref<19x8x128xbf16, #tpu.memory_space<vmem>>, vector<1x8x128xbf16>
    %6 = vector.shape_cast %5 : vector<1x8x128xbf16> to vector<8x128xbf16>
    %7 = arith.extf %6 : vector<8x128xbf16> to vector<8x128xf32>
    %8 = arith.truncf %3 : vector<8x32xf32> to vector<8x32xbf16>
    %c0_5 = arith.constant 0 : index
    %c0_6 = arith.constant 0 : index
    %9 = vector.load %arg3[%c0_5, %c0_6] : memref<32x128xbf16, #tpu.memory_space<vmem>>, vector<32x128xbf16>
    %cst = arith.constant dense<0.000000e+00> : vector<8x128xf32>
    %10 = tpu.matmul %8, %9, %cst {dimension_numbers = #tpu.dot_dimension_numbers<[1], [0], [0], [1], [0, 0, 1, 1], [], []>} : vector<8x32xbf16>, vector<32x128xbf16>, vector<8x128xf32> -> vector<8x128xf32>
    %11 = vector.extract_strided_slice %7 {offsets = [0, 0], sizes = [8, 32], strides = [1, 1]} : vector<8x128xf32> to vector<8x32xf32>
    %12 = vector.extract_strided_slice %10 {offsets = [0, 0], sizes = [8, 32], strides = [1, 1]} : vector<8x128xf32> to vector<8x32xf32>
    %13 = arith.addf %11, %12 : vector<8x32xf32>
    %14 = arith.negf %13 : vector<8x32xf32>
    %15 = math.exp %14 : vector<8x32xf32>
    %cst_7 = arith.constant 1.000000e+00 : f32
    %16 = vector.broadcast %cst_7 : f32 to vector<8x32xf32>
    %17 = arith.addf %16, %15 : vector<8x32xf32>
    %18 = arith.divf %16, %17 : vector<8x32xf32>
    %19 = vector.extract_strided_slice %7 {offsets = [0, 32], sizes = [8, 32], strides = [1, 1]} : vector<8x128xf32> to vector<8x32xf32>
    %20 = vector.extract_strided_slice %10 {offsets = [0, 32], sizes = [8, 32], strides = [1, 1]} : vector<8x128xf32> to vector<8x32xf32>
    %21 = arith.addf %19, %20 : vector<8x32xf32>
    %22 = arith.negf %21 : vector<8x32xf32>
    %23 = math.exp %22 : vector<8x32xf32>
    %cst_8 = arith.constant 1.000000e+00 : f32
    %24 = vector.broadcast %cst_8 : f32 to vector<8x32xf32>
    %25 = arith.addf %24, %23 : vector<8x32xf32>
    %26 = arith.divf %24, %25 : vector<8x32xf32>
    %27 = vector.extract_strided_slice %7 {offsets = [0, 64], sizes = [8, 32], strides = [1, 1]} : vector<8x128xf32> to vector<8x32xf32>
    %28 = vector.extract_strided_slice %10 {offsets = [0, 64], sizes = [8, 32], strides = [1, 1]} : vector<8x128xf32> to vector<8x32xf32>
    %c0_9 = arith.constant 0 : index
    %c0_10 = arith.constant 0 : index
    %29 = vector.load %arg4[%c0_9, %c0_10] : memref<8x32xf32, #tpu.memory_space<vmem>>, vector<8x32xf32>
    %30 = arith.addf %28, %29 : vector<8x32xf32>
    %31 = arith.mulf %18, %30 : vector<8x32xf32>
    %32 = arith.addf %27, %31 : vector<8x32xf32>
    %33 = math.tanh %32 : vector<8x32xf32>
    %cst_11 = arith.constant 1.000000e+00 : f32
    %34 = vector.broadcast %cst_11 : f32 to vector<8x32xf32>
    %35 = arith.subf %34, %26 : vector<8x32xf32>
    %36 = arith.mulf %35, %33 : vector<8x32xf32>
    %37 = arith.mulf %26, %3 : vector<8x32xf32>
    %38 = arith.addf %36, %37 : vector<8x32xf32>
    %c1_i32 = arith.constant 1 : i32
    %39 = arith.index_cast %c1_i32 : i32 to index
    %c0_12 = arith.constant 0 : index
    %c0_13 = arith.constant 0 : index
    %40 = vector.load %arg2[%39, %c0_12, %c0_13] : memref<19x8x128xbf16, #tpu.memory_space<vmem>>, vector<1x8x128xbf16>
    %41 = vector.shape_cast %40 : vector<1x8x128xbf16> to vector<8x128xbf16>
    %42 = arith.extf %41 : vector<8x128xbf16> to vector<8x128xf32>
    %43 = arith.truncf %38 : vector<8x32xf32> to vector<8x32xbf16>
    %c0_14 = arith.constant 0 : index
    %c0_15 = arith.constant 0 : index
    %44 = vector.load %arg3[%c0_14, %c0_15] : memref<32x128xbf16, #tpu.memory_space<vmem>>, vector<32x128xbf16>
    %cst_16 = arith.constant dense<0.000000e+00> : vector<8x128xf32>
    %45 = tpu.matmul %43, %44, %cst_16 {dimension_numbers = #tpu.dot_dimension_numbers<[1], [0], [0], [1], [0, 0, 1, 1], [], []>} : vector<8x32xbf16>, vector<32x128xbf16>, vector<8x128xf32> -> vector<8x128xf32>
    %46 = vector.extract_strided_slice %42 {offsets = [0, 0], sizes = [8, 32], strides = [1, 1]} : vector<8x128xf32> to vector<8x32xf32>
    %47 = vector.extract_strided_slice %45 {offsets = [0, 0], sizes = [8, 32], strides = [1, 1]} : vector<8x128xf32> to vector<8x32xf32>
    %48 = arith.addf %46, %47 : vector<8x32xf32>
    %49 = arith.negf %48 : vector<8x32xf32>
    %50 = math.exp %49 : vector<8x32xf32>
    %cst_17 = arith.constant 1.000000e+00 : f32
    %51 = vector.broadcast %cst_17 : f32 to vector<8x32xf32>
    %52 = arith.addf %51, %50 : vector<8x32xf32>
    %53 = arith.divf %51, %52 : vector<8x32xf32>
    %54 = vector.extract_strided_slice %42 {offsets = [0, 32], sizes = [8, 32], strides = [1, 1]} : vector<8x128xf32> to vector<8x32xf32>
    %55 = vector.extract_strided_slice %45 {offsets = [0, 32], sizes = [8, 32], strides = [1, 1]} : vector<8x128xf32> to vector<8x32xf32>
    %56 = arith.addf %54, %55 : vector<8x32xf32>
    %57 = arith.negf %56 : vector<8x32xf32>
    %58 = math.exp %57 : vector<8x32xf32>
    %cst_18 = arith.constant 1.000000e+00 : f32
    %59 = vector.broadcast %cst_18 : f32 to vector<8x32xf32>
    %60 = arith.addf %59, %58 : vector<8x32xf32>
    %61 = arith.divf %59, %60 : vector<8x32xf32>
    %62 = vector.extract_strided_slice %42 {offsets = [0, 64], sizes = [8, 32], strides = [1, 1]} : vector<8x128xf32> to vector<8x32xf32>
    %63 = vector.extract_strided_slice %45 {offsets = [0, 64], sizes = [8, 32], strides = [1, 1]} : vector<8x128xf32> to vector<8x32xf32>
    %c0_19 = arith.constant 0 : index
    %c0_20 = arith.constant 0 : index
    %64 = vector.load %arg4[%c0_19, %c0_20] : memref<8x32xf32, #tpu.memory_space<vmem>>, vector<8x32xf32>
    %65 = arith.addf %63, %64 : vector<8x32xf32>
    %66 = arith.mulf %53, %65 : vector<8x32xf32>
    %67 = arith.addf %62, %66 : vector<8x32xf32>
    %68 = math.tanh %67 : vector<8x32xf32>
    %cst_21 = arith.constant 1.000000e+00 : f32
    %69 = vector.broadcast %cst_21 : f32 to vector<8x32xf32>
    %70 = arith.subf %69, %61 : vector<8x32xf32>
    %71 = arith.mulf %70, %68 : vector<8x32xf32>
    %72 = arith.mulf %61, %38 : vector<8x32xf32>
    %73 = arith.addf %71, %72 : vector<8x32xf32>
    %c2_i32 = arith.constant 2 : i32
    %74 = arith.index_cast %c2_i32 : i32 to index
    %c0_22 = arith.constant 0 : index
    %c0_23 = arith.constant 0 : index
    %75 = vector.load %arg2[%74, %c0_22, %c0_23] : memref<19x8x128xbf16, #tpu.memory_space<vmem>>, vector<1x8x128xbf16>
    %76 = vector.shape_cast %75 : vector<1x8x128xbf16> to vector<8x128xbf16>
    %77 = arith.extf %76 : vector<8x128xbf16> to vector<8x128xf32>
    %78 = arith.truncf %73 : vector<8x32xf32> to vector<8x32xbf16>
    %c0_24 = arith.constant 0 : index
    %c0_25 = arith.constant 0 : index
    %79 = vector.load %arg3[%c0_24, %c0_25] : memref<32x128xbf16, #tpu.memory_space<vmem>>, vector<32x128xbf16>
    %cst_26 = arith.constant dense<0.000000e+00> : vector<8x128xf32>
    %80 = tpu.matmul %78, %79, %cst_26 {dimension_numbers = #tpu.dot_dimension_numbers<[1], [0], [0], [1], [0, 0, 1, 1], [], []>} : vector<8x32xbf16>, vector<32x128xbf16>, vector<8x128xf32> -> vector<8x128xf32>
    %81 = vector.extract_strided_slice %77 {offsets = [0, 0], sizes = [8, 32], strides = [1, 1]} : vector<8x128xf32> to vector<8x32xf32>
    %82 = vector.extract_strided_slice %80 {offsets = [0, 0], sizes = [8, 32], strides = [1, 1]} : vector<8x128xf32> to vector<8x32xf32>
    %83 = arith.addf %81, %82 : vector<8x32xf32>
    %84 = arith.negf %83 : vector<8x32xf32>
    %85 = math.exp %84 : vector<8x32xf32>
    %cst_27 = arith.constant 1.000000e+00 : f32
    %86 = vector.broadcast %cst_27 : f32 to vector<8x32xf32>
    %87 = arith.addf %86, %85 : vector<8x32xf32>
    %88 = arith.divf %86, %87 : vector<8x32xf32>
    %89 = vector.extract_strided_slice %77 {offsets = [0, 32], sizes = [8, 32], strides = [1, 1]} : vector<8x128xf32> to vector<8x32xf32>
    %90 = vector.extract_strided_slice %80 {offsets = [0, 32], sizes = [8, 32], strides = [1, 1]} : vector<8x128xf32> to vector<8x32xf32>
    %91 = arith.addf %89, %90 : vector<8x32xf32>
    %92 = arith.negf %91 : vector<8x32xf32>
    %93 = math.exp %92 : vector<8x32xf32>
    %cst_28 = arith.constant 1.000000e+00 : f32
    %94 = vector.broadcast %cst_28 : f32 to vector<8x32xf32>
    %95 = arith.addf %94, %93 : vector<8x32xf32>
    %96 = arith.divf %94, %95 : vector<8x32xf32>
    %97 = vector.extract_strided_slice %77 {offsets = [0, 64], sizes = [8, 32], strides = [1, 1]} : vector<8x128xf32> to vector<8x32xf32>
    %98 = vector.extract_strided_slice %80 {offsets = [0, 64], sizes = [8, 32], strides = [1, 1]} : vector<8x128xf32> to vector<8x32xf32>
    %c0_29 = arith.constant 0 : index
    %c0_30 = arith.constant 0 : index
    %99 = vector.load %arg4[%c0_29, %c0_30] : memref<8x32xf32, #tpu.memory_space<vmem>>, vector<8x32xf32>
    %100 = arith.addf %98, %99 : vector<8x32xf32>
    %101 = arith.mulf %88, %100 : vector<8x32xf32>
    %102 = arith.addf %97, %101 : vector<8x32xf32>
    %103 = math.tanh %102 : vector<8x32xf32>
    %cst_31 = arith.constant 1.000000e+00 : f32
    %104 = vector.broadcast %cst_31 : f32 to vector<8x32xf32>
    %105 = arith.subf %104, %96 : vector<8x32xf32>
    %106 = arith.mulf %105, %103 : vector<8x32xf32>
    %107 = arith.mulf %96, %73 : vector<8x32xf32>
    %108 = arith.addf %106, %107 : vector<8x32xf32>
    %c3_i32 = arith.constant 3 : i32
    %109 = arith.index_cast %c3_i32 : i32 to index
    %c0_32 = arith.constant 0 : index
    %c0_33 = arith.constant 0 : index
    %110 = vector.load %arg2[%109, %c0_32, %c0_33] : memref<19x8x128xbf16, #tpu.memory_space<vmem>>, vector<1x8x128xbf16>
    %111 = vector.shape_cast %110 : vector<1x8x128xbf16> to vector<8x128xbf16>
    %112 = arith.extf %111 : vector<8x128xbf16> to vector<8x128xf32>
    %113 = arith.truncf %108 : vector<8x32xf32> to vector<8x32xbf16>
    %c0_34 = arith.constant 0 : index
    %c0_35 = arith.constant 0 : index
    %114 = vector.load %arg3[%c0_34, %c0_35] : memref<32x128xbf16, #tpu.memory_space<vmem>>, vector<32x128xbf16>
    %cst_36 = arith.constant dense<0.000000e+00> : vector<8x128xf32>
    %115 = tpu.matmul %113, %114, %cst_36 {dimension_numbers = #tpu.dot_dimension_numbers<[1], [0], [0], [1], [0, 0, 1, 1], [], []>} : vector<8x32xbf16>, vector<32x128xbf16>, vector<8x128xf32> -> vector<8x128xf32>
    %116 = vector.extract_strided_slice %112 {offsets = [0, 0], sizes = [8, 32], strides = [1, 1]} : vector<8x128xf32> to vector<8x32xf32>
    %117 = vector.extract_strided_slice %115 {offsets = [0, 0], sizes = [8, 32], strides = [1, 1]} : vector<8x128xf32> to vector<8x32xf32>
    %118 = arith.addf %116, %117 : vector<8x32xf32>
    %119 = arith.negf %118 : vector<8x32xf32>
    %120 = math.exp %119 : vector<8x32xf32>
    %cst_37 = arith.constant 1.000000e+00 : f32
    %121 = vector.broadcast %cst_37 : f32 to vector<8x32xf32>
    %122 = arith.addf %121, %120 : vector<8x32xf32>
    %123 = arith.divf %121, %122 : vector<8x32xf32>
    %124 = vector.extract_strided_slice %112 {offsets = [0, 32], sizes = [8, 32], strides = [1, 1]} : vector<8x128xf32> to vector<8x32xf32>
    %125 = vector.extract_strided_slice %115 {offsets = [0, 32], sizes = [8, 32], strides = [1, 1]} : vector<8x128xf32> to vector<8x32xf32>
    %126 = arith.addf %124, %125 : vector<8x32xf32>
    %127 = arith.negf %126 : vector<8x32xf32>
    %128 = math.exp %127 : vector<8x32xf32>
    %cst_38 = arith.constant 1.000000e+00 : f32
    %129 = vector.broadcast %cst_38 : f32 to vector<8x32xf32>
    %130 = arith.addf %129, %128 : vector<8x32xf32>
    %131 = arith.divf %129, %130 : vector<8x32xf32>
    %132 = vector.extract_strided_slice %112 {offsets = [0, 64], sizes = [8, 32], strides = [1, 1]} : vector<8x128xf32> to vector<8x32xf32>
    %133 = vector.extract_strided_slice %115 {offsets = [0, 64], sizes = [8, 32], strides = [1, 1]} : vector<8x128xf32> to vector<8x32xf32>
    %c0_39 = arith.constant 0 : index
    %c0_40 = arith.constant 0 : index
    %134 = vector.load %arg4[%c0_39, %c0_40] : memref<8x32xf32, #tpu.memory_space<vmem>>, vector<8x32xf32>
    %135 = arith.addf %133, %134 : vector<8x32xf32>
    %136 = arith.mulf %123, %135 : vector<8x32xf32>
    %137 = arith.addf %132, %136 : vector<8x32xf32>
    %138 = math.tanh %137 : vector<8x32xf32>
    %cst_41 = arith.constant 1.000000e+00 : f32
    %139 = vector.broadcast %cst_41 : f32 to vector<8x32xf32>
    %140 = arith.subf %139, %131 : vector<8x32xf32>
    %141 = arith.mulf %140, %138 : vector<8x32xf32>
    %142 = arith.mulf %131, %108 : vector<8x32xf32>
    %143 = arith.addf %141, %142 : vector<8x32xf32>
    %c4_i32 = arith.constant 4 : i32
    %144 = arith.index_cast %c4_i32 : i32 to index
    %c0_42 = arith.constant 0 : index
    %c0_43 = arith.constant 0 : index
    %145 = vector.load %arg2[%144, %c0_42, %c0_43] : memref<19x8x128xbf16, #tpu.memory_space<vmem>>, vector<1x8x128xbf16>
    %146 = vector.shape_cast %145 : vector<1x8x128xbf16> to vector<8x128xbf16>
    %147 = arith.extf %146 : vector<8x128xbf16> to vector<8x128xf32>
    %148 = arith.truncf %143 : vector<8x32xf32> to vector<8x32xbf16>
    %c0_44 = arith.constant 0 : index
    %c0_45 = arith.constant 0 : index
    %149 = vector.load %arg3[%c0_44, %c0_45] : memref<32x128xbf16, #tpu.memory_space<vmem>>, vector<32x128xbf16>
    %cst_46 = arith.constant dense<0.000000e+00> : vector<8x128xf32>
    %150 = tpu.matmul %148, %149, %cst_46 {dimension_numbers = #tpu.dot_dimension_numbers<[1], [0], [0], [1], [0, 0, 1, 1], [], []>} : vector<8x32xbf16>, vector<32x128xbf16>, vector<8x128xf32> -> vector<8x128xf32>
    %151 = vector.extract_strided_slice %147 {offsets = [0, 0], sizes = [8, 32], strides = [1, 1]} : vector<8x128xf32> to vector<8x32xf32>
    %152 = vector.extract_strided_slice %150 {offsets = [0, 0], sizes = [8, 32], strides = [1, 1]} : vector<8x128xf32> to vector<8x32xf32>
    %153 = arith.addf %151, %152 : vector<8x32xf32>
    %154 = arith.negf %153 : vector<8x32xf32>
    %155 = math.exp %154 : vector<8x32xf32>
    %cst_47 = arith.constant 1.000000e+00 : f32
    %156 = vector.broadcast %cst_47 : f32 to vector<8x32xf32>
    %157 = arith.addf %156, %155 : vector<8x32xf32>
    %158 = arith.divf %156, %157 : vector<8x32xf32>
    %159 = vector.extract_strided_slice %147 {offsets = [0, 32], sizes = [8, 32], strides = [1, 1]} : vector<8x128xf32> to vector<8x32xf32>
    %160 = vector.extract_strided_slice %150 {offsets = [0, 32], sizes = [8, 32], strides = [1, 1]} : vector<8x128xf32> to vector<8x32xf32>
    %161 = arith.addf %159, %160 : vector<8x32xf32>
    %162 = arith.negf %161 : vector<8x32xf32>
    %163 = math.exp %162 : vector<8x32xf32>
    %cst_48 = arith.constant 1.000000e+00 : f32
    %164 = vector.broadcast %cst_48 : f32 to vector<8x32xf32>
    %165 = arith.addf %164, %163 : vector<8x32xf32>
    %166 = arith.divf %164, %165 : vector<8x32xf32>
    %167 = vector.extract_strided_slice %147 {offsets = [0, 64], sizes = [8, 32], strides = [1, 1]} : vector<8x128xf32> to vector<8x32xf32>
    %168 = vector.extract_strided_slice %150 {offsets = [0, 64], sizes = [8, 32], strides = [1, 1]} : vector<8x128xf32> to vector<8x32xf32>
    %c0_49 = arith.constant 0 : index
    %c0_50 = arith.constant 0 : index
    %169 = vector.load %arg4[%c0_49, %c0_50] : memref<8x32xf32, #tpu.memory_space<vmem>>, vector<8x32xf32>
    %170 = arith.addf %168, %169 : vector<8x32xf32>
    %171 = arith.mulf %158, %170 : vector<8x32xf32>
    %172 = arith.addf %167, %171 : vector<8x32xf32>
    %173 = math.tanh %172 : vector<8x32xf32>
    %cst_51 = arith.constant 1.000000e+00 : f32
    %174 = vector.broadcast %cst_51 : f32 to vector<8x32xf32>
    %175 = arith.subf %174, %166 : vector<8x32xf32>
    %176 = arith.mulf %175, %173 : vector<8x32xf32>
    %177 = arith.mulf %166, %143 : vector<8x32xf32>
    %178 = arith.addf %176, %177 : vector<8x32xf32>
    %c5_i32 = arith.constant 5 : i32
    %179 = arith.index_cast %c5_i32 : i32 to index
    %c0_52 = arith.constant 0 : index
    %c0_53 = arith.constant 0 : index
    %180 = vector.load %arg2[%179, %c0_52, %c0_53] : memref<19x8x128xbf16, #tpu.memory_space<vmem>>, vector<1x8x128xbf16>
    %181 = vector.shape_cast %180 : vector<1x8x128xbf16> to vector<8x128xbf16>
    %182 = arith.extf %181 : vector<8x128xbf16> to vector<8x128xf32>
    %183 = arith.truncf %178 : vector<8x32xf32> to vector<8x32xbf16>
    %c0_54 = arith.constant 0 : index
    %c0_55 = arith.constant 0 : index
    %184 = vector.load %arg3[%c0_54, %c0_55] : memref<32x128xbf16, #tpu.memory_space<vmem>>, vector<32x128xbf16>
    %cst_56 = arith.constant dense<0.000000e+00> : vector<8x128xf32>
    %185 = tpu.matmul %183, %184, %cst_56 {dimension_numbers = #tpu.dot_dimension_numbers<[1], [0], [0], [1], [0, 0, 1, 1], [], []>} : vector<8x32xbf16>, vector<32x128xbf16>, vector<8x128xf32> -> vector<8x128xf32>
    %186 = vector.extract_strided_slice %182 {offsets = [0, 0], sizes = [8, 32], strides = [1, 1]} : vector<8x128xf32> to vector<8x32xf32>
    %187 = vector.extract_strided_slice %185 {offsets = [0, 0], sizes = [8, 32], strides = [1, 1]} : vector<8x128xf32> to vector<8x32xf32>
    %188 = arith.addf %186, %187 : vector<8x32xf32>
    %189 = arith.negf %188 : vector<8x32xf32>
    %190 = math.exp %189 : vector<8x32xf32>
    %cst_57 = arith.constant 1.000000e+00 : f32
    %191 = vector.broadcast %cst_57 : f32 to vector<8x32xf32>
    %192 = arith.addf %191, %190 : vector<8x32xf32>
    %193 = arith.divf %191, %192 : vector<8x32xf32>
    %194 = vector.extract_strided_slice %182 {offsets = [0, 32], sizes = [8, 32], strides = [1, 1]} : vector<8x128xf32> to vector<8x32xf32>
    %195 = vector.extract_strided_slice %185 {offsets = [0, 32], sizes = [8, 32], strides = [1, 1]} : vector<8x128xf32> to vector<8x32xf32>
    %196 = arith.addf %194, %195 : vector<8x32xf32>
    %197 = arith.negf %196 : vector<8x32xf32>
    %198 = math.exp %197 : vector<8x32xf32>
    %cst_58 = arith.constant 1.000000e+00 : f32
    %199 = vector.broadcast %cst_58 : f32 to vector<8x32xf32>
    %200 = arith.addf %199, %198 : vector<8x32xf32>
    %201 = arith.divf %199, %200 : vector<8x32xf32>
    %202 = vector.extract_strided_slice %182 {offsets = [0, 64], sizes = [8, 32], strides = [1, 1]} : vector<8x128xf32> to vector<8x32xf32>
    %203 = vector.extract_strided_slice %185 {offsets = [0, 64], sizes = [8, 32], strides = [1, 1]} : vector<8x128xf32> to vector<8x32xf32>
    %c0_59 = arith.constant 0 : index
    %c0_60 = arith.constant 0 : index
    %204 = vector.load %arg4[%c0_59, %c0_60] : memref<8x32xf32, #tpu.memory_space<vmem>>, vector<8x32xf32>
    %205 = arith.addf %203, %204 : vector<8x32xf32>
    %206 = arith.mulf %193, %205 : vector<8x32xf32>
    %207 = arith.addf %202, %206 : vector<8x32xf32>
    %208 = math.tanh %207 : vector<8x32xf32>
    %cst_61 = arith.constant 1.000000e+00 : f32
    %209 = vector.broadcast %cst_61 : f32 to vector<8x32xf32>
    %210 = arith.subf %209, %201 : vector<8x32xf32>
    %211 = arith.mulf %210, %208 : vector<8x32xf32>
    %212 = arith.mulf %201, %178 : vector<8x32xf32>
    %213 = arith.addf %211, %212 : vector<8x32xf32>
    %c6_i32 = arith.constant 6 : i32
    %214 = arith.index_cast %c6_i32 : i32 to index
    %c0_62 = arith.constant 0 : index
    %c0_63 = arith.constant 0 : index
    %215 = vector.load %arg2[%214, %c0_62, %c0_63] : memref<19x8x128xbf16, #tpu.memory_space<vmem>>, vector<1x8x128xbf16>
    %216 = vector.shape_cast %215 : vector<1x8x128xbf16> to vector<8x128xbf16>
    %217 = arith.extf %216 : vector<8x128xbf16> to vector<8x128xf32>
    %218 = arith.truncf %213 : vector<8x32xf32> to vector<8x32xbf16>
    %c0_64 = arith.constant 0 : index
    %c0_65 = arith.constant 0 : index
    %219 = vector.load %arg3[%c0_64, %c0_65] : memref<32x128xbf16, #tpu.memory_space<vmem>>, vector<32x128xbf16>
    %cst_66 = arith.constant dense<0.000000e+00> : vector<8x128xf32>
    %220 = tpu.matmul %218, %219, %cst_66 {dimension_numbers = #tpu.dot_dimension_numbers<[1], [0], [0], [1], [0, 0, 1, 1], [], []>} : vector<8x32xbf16>, vector<32x128xbf16>, vector<8x128xf32> -> vector<8x128xf32>
    %221 = vector.extract_strided_slice %217 {offsets = [0, 0], sizes = [8, 32], strides = [1, 1]} : vector<8x128xf32> to vector<8x32xf32>
    %222 = vector.extract_strided_slice %220 {offsets = [0, 0], sizes = [8, 32], strides = [1, 1]} : vector<8x128xf32> to vector<8x32xf32>
    %223 = arith.addf %221, %222 : vector<8x32xf32>
    %224 = arith.negf %223 : vector<8x32xf32>
    %225 = math.exp %224 : vector<8x32xf32>
    %cst_67 = arith.constant 1.000000e+00 : f32
    %226 = vector.broadcast %cst_67 : f32 to vector<8x32xf32>
    %227 = arith.addf %226, %225 : vector<8x32xf32>
    %228 = arith.divf %226, %227 : vector<8x32xf32>
    %229 = vector.extract_strided_slice %217 {offsets = [0, 32], sizes = [8, 32], strides = [1, 1]} : vector<8x128xf32> to vector<8x32xf32>
    %230 = vector.extract_strided_slice %220 {offsets = [0, 32], sizes = [8, 32], strides = [1, 1]} : vector<8x128xf32> to vector<8x32xf32>
    %231 = arith.addf %229, %230 : vector<8x32xf32>
    %232 = arith.negf %231 : vector<8x32xf32>
    %233 = math.exp %232 : vector<8x32xf32>
    %cst_68 = arith.constant 1.000000e+00 : f32
    %234 = vector.broadcast %cst_68 : f32 to vector<8x32xf32>
    %235 = arith.addf %234, %233 : vector<8x32xf32>
    %236 = arith.divf %234, %235 : vector<8x32xf32>
    %237 = vector.extract_strided_slice %217 {offsets = [0, 64], sizes = [8, 32], strides = [1, 1]} : vector<8x128xf32> to vector<8x32xf32>
    %238 = vector.extract_strided_slice %220 {offsets = [0, 64], sizes = [8, 32], strides = [1, 1]} : vector<8x128xf32> to vector<8x32xf32>
    %c0_69 = arith.constant 0 : index
    %c0_70 = arith.constant 0 : index
    %239 = vector.load %arg4[%c0_69, %c0_70] : memref<8x32xf32, #tpu.memory_space<vmem>>, vector<8x32xf32>
    %240 = arith.addf %238, %239 : vector<8x32xf32>
    %241 = arith.mulf %228, %240 : vector<8x32xf32>
    %242 = arith.addf %237, %241 : vector<8x32xf32>
    %243 = math.tanh %242 : vector<8x32xf32>
    %cst_71 = arith.constant 1.000000e+00 : f32
    %244 = vector.broadcast %cst_71 : f32 to vector<8x32xf32>
    %245 = arith.subf %244, %236 : vector<8x32xf32>
    %246 = arith.mulf %245, %243 : vector<8x32xf32>
    %247 = arith.mulf %236, %213 : vector<8x32xf32>
    %248 = arith.addf %246, %247 : vector<8x32xf32>
    %c7_i32 = arith.constant 7 : i32
    %249 = arith.index_cast %c7_i32 : i32 to index
    %c0_72 = arith.constant 0 : index
    %c0_73 = arith.constant 0 : index
    %250 = vector.load %arg2[%249, %c0_72, %c0_73] : memref<19x8x128xbf16, #tpu.memory_space<vmem>>, vector<1x8x128xbf16>
    %251 = vector.shape_cast %250 : vector<1x8x128xbf16> to vector<8x128xbf16>
    %252 = arith.extf %251 : vector<8x128xbf16> to vector<8x128xf32>
    %253 = arith.truncf %248 : vector<8x32xf32> to vector<8x32xbf16>
    %c0_74 = arith.constant 0 : index
    %c0_75 = arith.constant 0 : index
    %254 = vector.load %arg3[%c0_74, %c0_75] : memref<32x128xbf16, #tpu.memory_space<vmem>>, vector<32x128xbf16>
    %cst_76 = arith.constant dense<0.000000e+00> : vector<8x128xf32>
    %255 = tpu.matmul %253, %254, %cst_76 {dimension_numbers = #tpu.dot_dimension_numbers<[1], [0], [0], [1], [0, 0, 1, 1], [], []>} : vector<8x32xbf16>, vector<32x128xbf16>, vector<8x128xf32> -> vector<8x128xf32>
    %256 = vector.extract_strided_slice %252 {offsets = [0, 0], sizes = [8, 32], strides = [1, 1]} : vector<8x128xf32> to vector<8x32xf32>
    %257 = vector.extract_strided_slice %255 {offsets = [0, 0], sizes = [8, 32], strides = [1, 1]} : vector<8x128xf32> to vector<8x32xf32>
    %258 = arith.addf %256, %257 : vector<8x32xf32>
    %259 = arith.negf %258 : vector<8x32xf32>
    %260 = math.exp %259 : vector<8x32xf32>
    %cst_77 = arith.constant 1.000000e+00 : f32
    %261 = vector.broadcast %cst_77 : f32 to vector<8x32xf32>
    %262 = arith.addf %261, %260 : vector<8x32xf32>
    %263 = arith.divf %261, %262 : vector<8x32xf32>
    %264 = vector.extract_strided_slice %252 {offsets = [0, 32], sizes = [8, 32], strides = [1, 1]} : vector<8x128xf32> to vector<8x32xf32>
    %265 = vector.extract_strided_slice %255 {offsets = [0, 32], sizes = [8, 32], strides = [1, 1]} : vector<8x128xf32> to vector<8x32xf32>
    %266 = arith.addf %264, %265 : vector<8x32xf32>
    %267 = arith.negf %266 : vector<8x32xf32>
    %268 = math.exp %267 : vector<8x32xf32>
    %cst_78 = arith.constant 1.000000e+00 : f32
    %269 = vector.broadcast %cst_78 : f32 to vector<8x32xf32>
    %270 = arith.addf %269, %268 : vector<8x32xf32>
    %271 = arith.divf %269, %270 : vector<8x32xf32>
    %272 = vector.extract_strided_slice %252 {offsets = [0, 64], sizes = [8, 32], strides = [1, 1]} : vector<8x128xf32> to vector<8x32xf32>
    %273 = vector.extract_strided_slice %255 {offsets = [0, 64], sizes = [8, 32], strides = [1, 1]} : vector<8x128xf32> to vector<8x32xf32>
    %c0_79 = arith.constant 0 : index
    %c0_80 = arith.constant 0 : index
    %274 = vector.load %arg4[%c0_79, %c0_80] : memref<8x32xf32, #tpu.memory_space<vmem>>, vector<8x32xf32>
    %275 = arith.addf %273, %274 : vector<8x32xf32>
    %276 = arith.mulf %263, %275 : vector<8x32xf32>
    %277 = arith.addf %272, %276 : vector<8x32xf32>
    %278 = math.tanh %277 : vector<8x32xf32>
    %cst_81 = arith.constant 1.000000e+00 : f32
    %279 = vector.broadcast %cst_81 : f32 to vector<8x32xf32>
    %280 = arith.subf %279, %271 : vector<8x32xf32>
    %281 = arith.mulf %280, %278 : vector<8x32xf32>
    %282 = arith.mulf %271, %248 : vector<8x32xf32>
    %283 = arith.addf %281, %282 : vector<8x32xf32>
    %c8_i32 = arith.constant 8 : i32
    %284 = arith.index_cast %c8_i32 : i32 to index
    %c0_82 = arith.constant 0 : index
    %c0_83 = arith.constant 0 : index
    %285 = vector.load %arg2[%284, %c0_82, %c0_83] : memref<19x8x128xbf16, #tpu.memory_space<vmem>>, vector<1x8x128xbf16>
    %286 = vector.shape_cast %285 : vector<1x8x128xbf16> to vector<8x128xbf16>
    %287 = arith.extf %286 : vector<8x128xbf16> to vector<8x128xf32>
    %288 = arith.truncf %283 : vector<8x32xf32> to vector<8x32xbf16>
    %c0_84 = arith.constant 0 : index
    %c0_85 = arith.constant 0 : index
    %289 = vector.load %arg3[%c0_84, %c0_85] : memref<32x128xbf16, #tpu.memory_space<vmem>>, vector<32x128xbf16>
    %cst_86 = arith.constant dense<0.000000e+00> : vector<8x128xf32>
    %290 = tpu.matmul %288, %289, %cst_86 {dimension_numbers = #tpu.dot_dimension_numbers<[1], [0], [0], [1], [0, 0, 1, 1], [], []>} : vector<8x32xbf16>, vector<32x128xbf16>, vector<8x128xf32> -> vector<8x128xf32>
    %291 = vector.extract_strided_slice %287 {offsets = [0, 0], sizes = [8, 32], strides = [1, 1]} : vector<8x128xf32> to vector<8x32xf32>
    %292 = vector.extract_strided_slice %290 {offsets = [0, 0], sizes = [8, 32], strides = [1, 1]} : vector<8x128xf32> to vector<8x32xf32>
    %293 = arith.addf %291, %292 : vector<8x32xf32>
    %294 = arith.negf %293 : vector<8x32xf32>
    %295 = math.exp %294 : vector<8x32xf32>
    %cst_87 = arith.constant 1.000000e+00 : f32
    %296 = vector.broadcast %cst_87 : f32 to vector<8x32xf32>
    %297 = arith.addf %296, %295 : vector<8x32xf32>
    %298 = arith.divf %296, %297 : vector<8x32xf32>
    %299 = vector.extract_strided_slice %287 {offsets = [0, 32], sizes = [8, 32], strides = [1, 1]} : vector<8x128xf32> to vector<8x32xf32>
    %300 = vector.extract_strided_slice %290 {offsets = [0, 32], sizes = [8, 32], strides = [1, 1]} : vector<8x128xf32> to vector<8x32xf32>
    %301 = arith.addf %299, %300 : vector<8x32xf32>
    %302 = arith.negf %301 : vector<8x32xf32>
    %303 = math.exp %302 : vector<8x32xf32>
    %cst_88 = arith.constant 1.000000e+00 : f32
    %304 = vector.broadcast %cst_88 : f32 to vector<8x32xf32>
    %305 = arith.addf %304, %303 : vector<8x32xf32>
    %306 = arith.divf %304, %305 : vector<8x32xf32>
    %307 = vector.extract_strided_slice %287 {offsets = [0, 64], sizes = [8, 32], strides = [1, 1]} : vector<8x128xf32> to vector<8x32xf32>
    %308 = vector.extract_strided_slice %290 {offsets = [0, 64], sizes = [8, 32], strides = [1, 1]} : vector<8x128xf32> to vector<8x32xf32>
    %c0_89 = arith.constant 0 : index
    %c0_90 = arith.constant 0 : index
    %309 = vector.load %arg4[%c0_89, %c0_90] : memref<8x32xf32, #tpu.memory_space<vmem>>, vector<8x32xf32>
    %310 = arith.addf %308, %309 : vector<8x32xf32>
    %311 = arith.mulf %298, %310 : vector<8x32xf32>
    %312 = arith.addf %307, %311 : vector<8x32xf32>
    %313 = math.tanh %312 : vector<8x32xf32>
    %cst_91 = arith.constant 1.000000e+00 : f32
    %314 = vector.broadcast %cst_91 : f32 to vector<8x32xf32>
    %315 = arith.subf %314, %306 : vector<8x32xf32>
    %316 = arith.mulf %315, %313 : vector<8x32xf32>
    %317 = arith.mulf %306, %283 : vector<8x32xf32>
    %318 = arith.addf %316, %317 : vector<8x32xf32>
    %c9_i32 = arith.constant 9 : i32
    %319 = arith.index_cast %c9_i32 : i32 to index
    %c0_92 = arith.constant 0 : index
    %c0_93 = arith.constant 0 : index
    %320 = vector.load %arg2[%319, %c0_92, %c0_93] : memref<19x8x128xbf16, #tpu.memory_space<vmem>>, vector<1x8x128xbf16>
    %321 = vector.shape_cast %320 : vector<1x8x128xbf16> to vector<8x128xbf16>
    %322 = arith.extf %321 : vector<8x128xbf16> to vector<8x128xf32>
    %323 = arith.truncf %318 : vector<8x32xf32> to vector<8x32xbf16>
    %c0_94 = arith.constant 0 : index
    %c0_95 = arith.constant 0 : index
    %324 = vector.load %arg3[%c0_94, %c0_95] : memref<32x128xbf16, #tpu.memory_space<vmem>>, vector<32x128xbf16>
    %cst_96 = arith.constant dense<0.000000e+00> : vector<8x128xf32>
    %325 = tpu.matmul %323, %324, %cst_96 {dimension_numbers = #tpu.dot_dimension_numbers<[1], [0], [0], [1], [0, 0, 1, 1], [], []>} : vector<8x32xbf16>, vector<32x128xbf16>, vector<8x128xf32> -> vector<8x128xf32>
    %326 = vector.extract_strided_slice %322 {offsets = [0, 0], sizes = [8, 32], strides = [1, 1]} : vector<8x128xf32> to vector<8x32xf32>
    %327 = vector.extract_strided_slice %325 {offsets = [0, 0], sizes = [8, 32], strides = [1, 1]} : vector<8x128xf32> to vector<8x32xf32>
    %328 = arith.addf %326, %327 : vector<8x32xf32>
    %329 = arith.negf %328 : vector<8x32xf32>
    %330 = math.exp %329 : vector<8x32xf32>
    %cst_97 = arith.constant 1.000000e+00 : f32
    %331 = vector.broadcast %cst_97 : f32 to vector<8x32xf32>
    %332 = arith.addf %331, %330 : vector<8x32xf32>
    %333 = arith.divf %331, %332 : vector<8x32xf32>
    %334 = vector.extract_strided_slice %322 {offsets = [0, 32], sizes = [8, 32], strides = [1, 1]} : vector<8x128xf32> to vector<8x32xf32>
    %335 = vector.extract_strided_slice %325 {offsets = [0, 32], sizes = [8, 32], strides = [1, 1]} : vector<8x128xf32> to vector<8x32xf32>
    %336 = arith.addf %334, %335 : vector<8x32xf32>
    %337 = arith.negf %336 : vector<8x32xf32>
    %338 = math.exp %337 : vector<8x32xf32>
    %cst_98 = arith.constant 1.000000e+00 : f32
    %339 = vector.broadcast %cst_98 : f32 to vector<8x32xf32>
    %340 = arith.addf %339, %338 : vector<8x32xf32>
    %341 = arith.divf %339, %340 : vector<8x32xf32>
    %342 = vector.extract_strided_slice %322 {offsets = [0, 64], sizes = [8, 32], strides = [1, 1]} : vector<8x128xf32> to vector<8x32xf32>
    %343 = vector.extract_strided_slice %325 {offsets = [0, 64], sizes = [8, 32], strides = [1, 1]} : vector<8x128xf32> to vector<8x32xf32>
    %c0_99 = arith.constant 0 : index
    %c0_100 = arith.constant 0 : index
    %344 = vector.load %arg4[%c0_99, %c0_100] : memref<8x32xf32, #tpu.memory_space<vmem>>, vector<8x32xf32>
    %345 = arith.addf %343, %344 : vector<8x32xf32>
    %346 = arith.mulf %333, %345 : vector<8x32xf32>
    %347 = arith.addf %342, %346 : vector<8x32xf32>
    %348 = math.tanh %347 : vector<8x32xf32>
    %cst_101 = arith.constant 1.000000e+00 : f32
    %349 = vector.broadcast %cst_101 : f32 to vector<8x32xf32>
    %350 = arith.subf %349, %341 : vector<8x32xf32>
    %351 = arith.mulf %350, %348 : vector<8x32xf32>
    %352 = arith.mulf %341, %318 : vector<8x32xf32>
    %353 = arith.addf %351, %352 : vector<8x32xf32>
    %c10_i32 = arith.constant 10 : i32
    %354 = arith.index_cast %c10_i32 : i32 to index
    %c0_102 = arith.constant 0 : index
    %c0_103 = arith.constant 0 : index
    %355 = vector.load %arg2[%354, %c0_102, %c0_103] : memref<19x8x128xbf16, #tpu.memory_space<vmem>>, vector<1x8x128xbf16>
    %356 = vector.shape_cast %355 : vector<1x8x128xbf16> to vector<8x128xbf16>
    %357 = arith.extf %356 : vector<8x128xbf16> to vector<8x128xf32>
    %358 = arith.truncf %353 : vector<8x32xf32> to vector<8x32xbf16>
    %c0_104 = arith.constant 0 : index
    %c0_105 = arith.constant 0 : index
    %359 = vector.load %arg3[%c0_104, %c0_105] : memref<32x128xbf16, #tpu.memory_space<vmem>>, vector<32x128xbf16>
    %cst_106 = arith.constant dense<0.000000e+00> : vector<8x128xf32>
    %360 = tpu.matmul %358, %359, %cst_106 {dimension_numbers = #tpu.dot_dimension_numbers<[1], [0], [0], [1], [0, 0, 1, 1], [], []>} : vector<8x32xbf16>, vector<32x128xbf16>, vector<8x128xf32> -> vector<8x128xf32>
    %361 = vector.extract_strided_slice %357 {offsets = [0, 0], sizes = [8, 32], strides = [1, 1]} : vector<8x128xf32> to vector<8x32xf32>
    %362 = vector.extract_strided_slice %360 {offsets = [0, 0], sizes = [8, 32], strides = [1, 1]} : vector<8x128xf32> to vector<8x32xf32>
    %363 = arith.addf %361, %362 : vector<8x32xf32>
    %364 = arith.negf %363 : vector<8x32xf32>
    %365 = math.exp %364 : vector<8x32xf32>
    %cst_107 = arith.constant 1.000000e+00 : f32
    %366 = vector.broadcast %cst_107 : f32 to vector<8x32xf32>
    %367 = arith.addf %366, %365 : vector<8x32xf32>
    %368 = arith.divf %366, %367 : vector<8x32xf32>
    %369 = vector.extract_strided_slice %357 {offsets = [0, 32], sizes = [8, 32], strides = [1, 1]} : vector<8x128xf32> to vector<8x32xf32>
    %370 = vector.extract_strided_slice %360 {offsets = [0, 32], sizes = [8, 32], strides = [1, 1]} : vector<8x128xf32> to vector<8x32xf32>
    %371 = arith.addf %369, %370 : vector<8x32xf32>
    %372 = arith.negf %371 : vector<8x32xf32>
    %373 = math.exp %372 : vector<8x32xf32>
    %cst_108 = arith.constant 1.000000e+00 : f32
    %374 = vector.broadcast %cst_108 : f32 to vector<8x32xf32>
    %375 = arith.addf %374, %373 : vector<8x32xf32>
    %376 = arith.divf %374, %375 : vector<8x32xf32>
    %377 = vector.extract_strided_slice %357 {offsets = [0, 64], sizes = [8, 32], strides = [1, 1]} : vector<8x128xf32> to vector<8x32xf32>
    %378 = vector.extract_strided_slice %360 {offsets = [0, 64], sizes = [8, 32], strides = [1, 1]} : vector<8x128xf32> to vector<8x32xf32>
    %c0_109 = arith.constant 0 : index
    %c0_110 = arith.constant 0 : index
    %379 = vector.load %arg4[%c0_109, %c0_110] : memref<8x32xf32, #tpu.memory_space<vmem>>, vector<8x32xf32>
    %380 = arith.addf %378, %379 : vector<8x32xf32>
    %381 = arith.mulf %368, %380 : vector<8x32xf32>
    %382 = arith.addf %377, %381 : vector<8x32xf32>
    %383 = math.tanh %382 : vector<8x32xf32>
    %cst_111 = arith.constant 1.000000e+00 : f32
    %384 = vector.broadcast %cst_111 : f32 to vector<8x32xf32>
    %385 = arith.subf %384, %376 : vector<8x32xf32>
    %386 = arith.mulf %385, %383 : vector<8x32xf32>
    %387 = arith.mulf %376, %353 : vector<8x32xf32>
    %388 = arith.addf %386, %387 : vector<8x32xf32>
    %c11_i32 = arith.constant 11 : i32
    %389 = arith.index_cast %c11_i32 : i32 to index
    %c0_112 = arith.constant 0 : index
    %c0_113 = arith.constant 0 : index
    %390 = vector.load %arg2[%389, %c0_112, %c0_113] : memref<19x8x128xbf16, #tpu.memory_space<vmem>>, vector<1x8x128xbf16>
    %391 = vector.shape_cast %390 : vector<1x8x128xbf16> to vector<8x128xbf16>
    %392 = arith.extf %391 : vector<8x128xbf16> to vector<8x128xf32>
    %393 = arith.truncf %388 : vector<8x32xf32> to vector<8x32xbf16>
    %c0_114 = arith.constant 0 : index
    %c0_115 = arith.constant 0 : index
    %394 = vector.load %arg3[%c0_114, %c0_115] : memref<32x128xbf16, #tpu.memory_space<vmem>>, vector<32x128xbf16>
    %cst_116 = arith.constant dense<0.000000e+00> : vector<8x128xf32>
    %395 = tpu.matmul %393, %394, %cst_116 {dimension_numbers = #tpu.dot_dimension_numbers<[1], [0], [0], [1], [0, 0, 1, 1], [], []>} : vector<8x32xbf16>, vector<32x128xbf16>, vector<8x128xf32> -> vector<8x128xf32>
    %396 = vector.extract_strided_slice %392 {offsets = [0, 0], sizes = [8, 32], strides = [1, 1]} : vector<8x128xf32> to vector<8x32xf32>
    %397 = vector.extract_strided_slice %395 {offsets = [0, 0], sizes = [8, 32], strides = [1, 1]} : vector<8x128xf32> to vector<8x32xf32>
    %398 = arith.addf %396, %397 : vector<8x32xf32>
    %399 = arith.negf %398 : vector<8x32xf32>
    %400 = math.exp %399 : vector<8x32xf32>
    %cst_117 = arith.constant 1.000000e+00 : f32
    %401 = vector.broadcast %cst_117 : f32 to vector<8x32xf32>
    %402 = arith.addf %401, %400 : vector<8x32xf32>
    %403 = arith.divf %401, %402 : vector<8x32xf32>
    %404 = vector.extract_strided_slice %392 {offsets = [0, 32], sizes = [8, 32], strides = [1, 1]} : vector<8x128xf32> to vector<8x32xf32>
    %405 = vector.extract_strided_slice %395 {offsets = [0, 32], sizes = [8, 32], strides = [1, 1]} : vector<8x128xf32> to vector<8x32xf32>
    %406 = arith.addf %404, %405 : vector<8x32xf32>
    %407 = arith.negf %406 : vector<8x32xf32>
    %408 = math.exp %407 : vector<8x32xf32>
    %cst_118 = arith.constant 1.000000e+00 : f32
    %409 = vector.broadcast %cst_118 : f32 to vector<8x32xf32>
    %410 = arith.addf %409, %408 : vector<8x32xf32>
    %411 = arith.divf %409, %410 : vector<8x32xf32>
    %412 = vector.extract_strided_slice %392 {offsets = [0, 64], sizes = [8, 32], strides = [1, 1]} : vector<8x128xf32> to vector<8x32xf32>
    %413 = vector.extract_strided_slice %395 {offsets = [0, 64], sizes = [8, 32], strides = [1, 1]} : vector<8x128xf32> to vector<8x32xf32>
    %c0_119 = arith.constant 0 : index
    %c0_120 = arith.constant 0 : index
    %414 = vector.load %arg4[%c0_119, %c0_120] : memref<8x32xf32, #tpu.memory_space<vmem>>, vector<8x32xf32>
    %415 = arith.addf %413, %414 : vector<8x32xf32>
    %416 = arith.mulf %403, %415 : vector<8x32xf32>
    %417 = arith.addf %412, %416 : vector<8x32xf32>
    %418 = math.tanh %417 : vector<8x32xf32>
    %cst_121 = arith.constant 1.000000e+00 : f32
    %419 = vector.broadcast %cst_121 : f32 to vector<8x32xf32>
    %420 = arith.subf %419, %411 : vector<8x32xf32>
    %421 = arith.mulf %420, %418 : vector<8x32xf32>
    %422 = arith.mulf %411, %388 : vector<8x32xf32>
    %423 = arith.addf %421, %422 : vector<8x32xf32>
    %c12_i32 = arith.constant 12 : i32
    %424 = arith.index_cast %c12_i32 : i32 to index
    %c0_122 = arith.constant 0 : index
    %c0_123 = arith.constant 0 : index
    %425 = vector.load %arg2[%424, %c0_122, %c0_123] : memref<19x8x128xbf16, #tpu.memory_space<vmem>>, vector<1x8x128xbf16>
    %426 = vector.shape_cast %425 : vector<1x8x128xbf16> to vector<8x128xbf16>
    %427 = arith.extf %426 : vector<8x128xbf16> to vector<8x128xf32>
    %428 = arith.truncf %423 : vector<8x32xf32> to vector<8x32xbf16>
    %c0_124 = arith.constant 0 : index
    %c0_125 = arith.constant 0 : index
    %429 = vector.load %arg3[%c0_124, %c0_125] : memref<32x128xbf16, #tpu.memory_space<vmem>>, vector<32x128xbf16>
    %cst_126 = arith.constant dense<0.000000e+00> : vector<8x128xf32>
    %430 = tpu.matmul %428, %429, %cst_126 {dimension_numbers = #tpu.dot_dimension_numbers<[1], [0], [0], [1], [0, 0, 1, 1], [], []>} : vector<8x32xbf16>, vector<32x128xbf16>, vector<8x128xf32> -> vector<8x128xf32>
    %431 = vector.extract_strided_slice %427 {offsets = [0, 0], sizes = [8, 32], strides = [1, 1]} : vector<8x128xf32> to vector<8x32xf32>
    %432 = vector.extract_strided_slice %430 {offsets = [0, 0], sizes = [8, 32], strides = [1, 1]} : vector<8x128xf32> to vector<8x32xf32>
    %433 = arith.addf %431, %432 : vector<8x32xf32>
    %434 = arith.negf %433 : vector<8x32xf32>
    %435 = math.exp %434 : vector<8x32xf32>
    %cst_127 = arith.constant 1.000000e+00 : f32
    %436 = vector.broadcast %cst_127 : f32 to vector<8x32xf32>
    %437 = arith.addf %436, %435 : vector<8x32xf32>
    %438 = arith.divf %436, %437 : vector<8x32xf32>
    %439 = vector.extract_strided_slice %427 {offsets = [0, 32], sizes = [8, 32], strides = [1, 1]} : vector<8x128xf32> to vector<8x32xf32>
    %440 = vector.extract_strided_slice %430 {offsets = [0, 32], sizes = [8, 32], strides = [1, 1]} : vector<8x128xf32> to vector<8x32xf32>
    %441 = arith.addf %439, %440 : vector<8x32xf32>
    %442 = arith.negf %441 : vector<8x32xf32>
    %443 = math.exp %442 : vector<8x32xf32>
    %cst_128 = arith.constant 1.000000e+00 : f32
    %444 = vector.broadcast %cst_128 : f32 to vector<8x32xf32>
    %445 = arith.addf %444, %443 : vector<8x32xf32>
    %446 = arith.divf %444, %445 : vector<8x32xf32>
    %447 = vector.extract_strided_slice %427 {offsets = [0, 64], sizes = [8, 32], strides = [1, 1]} : vector<8x128xf32> to vector<8x32xf32>
    %448 = vector.extract_strided_slice %430 {offsets = [0, 64], sizes = [8, 32], strides = [1, 1]} : vector<8x128xf32> to vector<8x32xf32>
    %c0_129 = arith.constant 0 : index
    %c0_130 = arith.constant 0 : index
    %449 = vector.load %arg4[%c0_129, %c0_130] : memref<8x32xf32, #tpu.memory_space<vmem>>, vector<8x32xf32>
    %450 = arith.addf %448, %449 : vector<8x32xf32>
    %451 = arith.mulf %438, %450 : vector<8x32xf32>
    %452 = arith.addf %447, %451 : vector<8x32xf32>
    %453 = math.tanh %452 : vector<8x32xf32>
    %cst_131 = arith.constant 1.000000e+00 : f32
    %454 = vector.broadcast %cst_131 : f32 to vector<8x32xf32>
    %455 = arith.subf %454, %446 : vector<8x32xf32>
    %456 = arith.mulf %455, %453 : vector<8x32xf32>
    %457 = arith.mulf %446, %423 : vector<8x32xf32>
    %458 = arith.addf %456, %457 : vector<8x32xf32>
    %c13_i32 = arith.constant 13 : i32
    %459 = arith.index_cast %c13_i32 : i32 to index
    %c0_132 = arith.constant 0 : index
    %c0_133 = arith.constant 0 : index
    %460 = vector.load %arg2[%459, %c0_132, %c0_133] : memref<19x8x128xbf16, #tpu.memory_space<vmem>>, vector<1x8x128xbf16>
    %461 = vector.shape_cast %460 : vector<1x8x128xbf16> to vector<8x128xbf16>
    %462 = arith.extf %461 : vector<8x128xbf16> to vector<8x128xf32>
    %463 = arith.truncf %458 : vector<8x32xf32> to vector<8x32xbf16>
    %c0_134 = arith.constant 0 : index
    %c0_135 = arith.constant 0 : index
    %464 = vector.load %arg3[%c0_134, %c0_135] : memref<32x128xbf16, #tpu.memory_space<vmem>>, vector<32x128xbf16>
    %cst_136 = arith.constant dense<0.000000e+00> : vector<8x128xf32>
    %465 = tpu.matmul %463, %464, %cst_136 {dimension_numbers = #tpu.dot_dimension_numbers<[1], [0], [0], [1], [0, 0, 1, 1], [], []>} : vector<8x32xbf16>, vector<32x128xbf16>, vector<8x128xf32> -> vector<8x128xf32>
    %466 = vector.extract_strided_slice %462 {offsets = [0, 0], sizes = [8, 32], strides = [1, 1]} : vector<8x128xf32> to vector<8x32xf32>
    %467 = vector.extract_strided_slice %465 {offsets = [0, 0], sizes = [8, 32], strides = [1, 1]} : vector<8x128xf32> to vector<8x32xf32>
    %468 = arith.addf %466, %467 : vector<8x32xf32>
    %469 = arith.negf %468 : vector<8x32xf32>
    %470 = math.exp %469 : vector<8x32xf32>
    %cst_137 = arith.constant 1.000000e+00 : f32
    %471 = vector.broadcast %cst_137 : f32 to vector<8x32xf32>
    %472 = arith.addf %471, %470 : vector<8x32xf32>
    %473 = arith.divf %471, %472 : vector<8x32xf32>
    %474 = vector.extract_strided_slice %462 {offsets = [0, 32], sizes = [8, 32], strides = [1, 1]} : vector<8x128xf32> to vector<8x32xf32>
    %475 = vector.extract_strided_slice %465 {offsets = [0, 32], sizes = [8, 32], strides = [1, 1]} : vector<8x128xf32> to vector<8x32xf32>
    %476 = arith.addf %474, %475 : vector<8x32xf32>
    %477 = arith.negf %476 : vector<8x32xf32>
    %478 = math.exp %477 : vector<8x32xf32>
    %cst_138 = arith.constant 1.000000e+00 : f32
    %479 = vector.broadcast %cst_138 : f32 to vector<8x32xf32>
    %480 = arith.addf %479, %478 : vector<8x32xf32>
    %481 = arith.divf %479, %480 : vector<8x32xf32>
    %482 = vector.extract_strided_slice %462 {offsets = [0, 64], sizes = [8, 32], strides = [1, 1]} : vector<8x128xf32> to vector<8x32xf32>
    %483 = vector.extract_strided_slice %465 {offsets = [0, 64], sizes = [8, 32], strides = [1, 1]} : vector<8x128xf32> to vector<8x32xf32>
    %c0_139 = arith.constant 0 : index
    %c0_140 = arith.constant 0 : index
    %484 = vector.load %arg4[%c0_139, %c0_140] : memref<8x32xf32, #tpu.memory_space<vmem>>, vector<8x32xf32>
    %485 = arith.addf %483, %484 : vector<8x32xf32>
    %486 = arith.mulf %473, %485 : vector<8x32xf32>
    %487 = arith.addf %482, %486 : vector<8x32xf32>
    %488 = math.tanh %487 : vector<8x32xf32>
    %cst_141 = arith.constant 1.000000e+00 : f32
    %489 = vector.broadcast %cst_141 : f32 to vector<8x32xf32>
    %490 = arith.subf %489, %481 : vector<8x32xf32>
    %491 = arith.mulf %490, %488 : vector<8x32xf32>
    %492 = arith.mulf %481, %458 : vector<8x32xf32>
    %493 = arith.addf %491, %492 : vector<8x32xf32>
    %c14_i32 = arith.constant 14 : i32
    %494 = arith.index_cast %c14_i32 : i32 to index
    %c0_142 = arith.constant 0 : index
    %c0_143 = arith.constant 0 : index
    %495 = vector.load %arg2[%494, %c0_142, %c0_143] : memref<19x8x128xbf16, #tpu.memory_space<vmem>>, vector<1x8x128xbf16>
    %496 = vector.shape_cast %495 : vector<1x8x128xbf16> to vector<8x128xbf16>
    %497 = arith.extf %496 : vector<8x128xbf16> to vector<8x128xf32>
    %498 = arith.truncf %493 : vector<8x32xf32> to vector<8x32xbf16>
    %c0_144 = arith.constant 0 : index
    %c0_145 = arith.constant 0 : index
    %499 = vector.load %arg3[%c0_144, %c0_145] : memref<32x128xbf16, #tpu.memory_space<vmem>>, vector<32x128xbf16>
    %cst_146 = arith.constant dense<0.000000e+00> : vector<8x128xf32>
    %500 = tpu.matmul %498, %499, %cst_146 {dimension_numbers = #tpu.dot_dimension_numbers<[1], [0], [0], [1], [0, 0, 1, 1], [], []>} : vector<8x32xbf16>, vector<32x128xbf16>, vector<8x128xf32> -> vector<8x128xf32>
    %501 = vector.extract_strided_slice %497 {offsets = [0, 0], sizes = [8, 32], strides = [1, 1]} : vector<8x128xf32> to vector<8x32xf32>
    %502 = vector.extract_strided_slice %500 {offsets = [0, 0], sizes = [8, 32], strides = [1, 1]} : vector<8x128xf32> to vector<8x32xf32>
    %503 = arith.addf %501, %502 : vector<8x32xf32>
    %504 = arith.negf %503 : vector<8x32xf32>
    %505 = math.exp %504 : vector<8x32xf32>
    %cst_147 = arith.constant 1.000000e+00 : f32
    %506 = vector.broadcast %cst_147 : f32 to vector<8x32xf32>
    %507 = arith.addf %506, %505 : vector<8x32xf32>
    %508 = arith.divf %506, %507 : vector<8x32xf32>
    %509 = vector.extract_strided_slice %497 {offsets = [0, 32], sizes = [8, 32], strides = [1, 1]} : vector<8x128xf32> to vector<8x32xf32>
    %510 = vector.extract_strided_slice %500 {offsets = [0, 32], sizes = [8, 32], strides = [1, 1]} : vector<8x128xf32> to vector<8x32xf32>
    %511 = arith.addf %509, %510 : vector<8x32xf32>
    %512 = arith.negf %511 : vector<8x32xf32>
    %513 = math.exp %512 : vector<8x32xf32>
    %cst_148 = arith.constant 1.000000e+00 : f32
    %514 = vector.broadcast %cst_148 : f32 to vector<8x32xf32>
    %515 = arith.addf %514, %513 : vector<8x32xf32>
    %516 = arith.divf %514, %515 : vector<8x32xf32>
    %517 = vector.extract_strided_slice %497 {offsets = [0, 64], sizes = [8, 32], strides = [1, 1]} : vector<8x128xf32> to vector<8x32xf32>
    %518 = vector.extract_strided_slice %500 {offsets = [0, 64], sizes = [8, 32], strides = [1, 1]} : vector<8x128xf32> to vector<8x32xf32>
    %c0_149 = arith.constant 0 : index
    %c0_150 = arith.constant 0 : index
    %519 = vector.load %arg4[%c0_149, %c0_150] : memref<8x32xf32, #tpu.memory_space<vmem>>, vector<8x32xf32>
    %520 = arith.addf %518, %519 : vector<8x32xf32>
    %521 = arith.mulf %508, %520 : vector<8x32xf32>
    %522 = arith.addf %517, %521 : vector<8x32xf32>
    %523 = math.tanh %522 : vector<8x32xf32>
    %cst_151 = arith.constant 1.000000e+00 : f32
    %524 = vector.broadcast %cst_151 : f32 to vector<8x32xf32>
    %525 = arith.subf %524, %516 : vector<8x32xf32>
    %526 = arith.mulf %525, %523 : vector<8x32xf32>
    %527 = arith.mulf %516, %493 : vector<8x32xf32>
    %528 = arith.addf %526, %527 : vector<8x32xf32>
    %c15_i32 = arith.constant 15 : i32
    %529 = arith.index_cast %c15_i32 : i32 to index
    %c0_152 = arith.constant 0 : index
    %c0_153 = arith.constant 0 : index
    %530 = vector.load %arg2[%529, %c0_152, %c0_153] : memref<19x8x128xbf16, #tpu.memory_space<vmem>>, vector<1x8x128xbf16>
    %531 = vector.shape_cast %530 : vector<1x8x128xbf16> to vector<8x128xbf16>
    %532 = arith.extf %531 : vector<8x128xbf16> to vector<8x128xf32>
    %533 = arith.truncf %528 : vector<8x32xf32> to vector<8x32xbf16>
    %c0_154 = arith.constant 0 : index
    %c0_155 = arith.constant 0 : index
    %534 = vector.load %arg3[%c0_154, %c0_155] : memref<32x128xbf16, #tpu.memory_space<vmem>>, vector<32x128xbf16>
    %cst_156 = arith.constant dense<0.000000e+00> : vector<8x128xf32>
    %535 = tpu.matmul %533, %534, %cst_156 {dimension_numbers = #tpu.dot_dimension_numbers<[1], [0], [0], [1], [0, 0, 1, 1], [], []>} : vector<8x32xbf16>, vector<32x128xbf16>, vector<8x128xf32> -> vector<8x128xf32>
    %536 = vector.extract_strided_slice %532 {offsets = [0, 0], sizes = [8, 32], strides = [1, 1]} : vector<8x128xf32> to vector<8x32xf32>
    %537 = vector.extract_strided_slice %535 {offsets = [0, 0], sizes = [8, 32], strides = [1, 1]} : vector<8x128xf32> to vector<8x32xf32>
    %538 = arith.addf %536, %537 : vector<8x32xf32>
    %539 = arith.negf %538 : vector<8x32xf32>
    %540 = math.exp %539 : vector<8x32xf32>
    %cst_157 = arith.constant 1.000000e+00 : f32
    %541 = vector.broadcast %cst_157 : f32 to vector<8x32xf32>
    %542 = arith.addf %541, %540 : vector<8x32xf32>
    %543 = arith.divf %541, %542 : vector<8x32xf32>
    %544 = vector.extract_strided_slice %532 {offsets = [0, 32], sizes = [8, 32], strides = [1, 1]} : vector<8x128xf32> to vector<8x32xf32>
    %545 = vector.extract_strided_slice %535 {offsets = [0, 32], sizes = [8, 32], strides = [1, 1]} : vector<8x128xf32> to vector<8x32xf32>
    %546 = arith.addf %544, %545 : vector<8x32xf32>
    %547 = arith.negf %546 : vector<8x32xf32>
    %548 = math.exp %547 : vector<8x32xf32>
    %cst_158 = arith.constant 1.000000e+00 : f32
    %549 = vector.broadcast %cst_158 : f32 to vector<8x32xf32>
    %550 = arith.addf %549, %548 : vector<8x32xf32>
    %551 = arith.divf %549, %550 : vector<8x32xf32>
    %552 = vector.extract_strided_slice %532 {offsets = [0, 64], sizes = [8, 32], strides = [1, 1]} : vector<8x128xf32> to vector<8x32xf32>
    %553 = vector.extract_strided_slice %535 {offsets = [0, 64], sizes = [8, 32], strides = [1, 1]} : vector<8x128xf32> to vector<8x32xf32>
    %c0_159 = arith.constant 0 : index
    %c0_160 = arith.constant 0 : index
    %554 = vector.load %arg4[%c0_159, %c0_160] : memref<8x32xf32, #tpu.memory_space<vmem>>, vector<8x32xf32>
    %555 = arith.addf %553, %554 : vector<8x32xf32>
    %556 = arith.mulf %543, %555 : vector<8x32xf32>
    %557 = arith.addf %552, %556 : vector<8x32xf32>
    %558 = math.tanh %557 : vector<8x32xf32>
    %cst_161 = arith.constant 1.000000e+00 : f32
    %559 = vector.broadcast %cst_161 : f32 to vector<8x32xf32>
    %560 = arith.subf %559, %551 : vector<8x32xf32>
    %561 = arith.mulf %560, %558 : vector<8x32xf32>
    %562 = arith.mulf %551, %528 : vector<8x32xf32>
    %563 = arith.addf %561, %562 : vector<8x32xf32>
    %c16_i32 = arith.constant 16 : i32
    %564 = arith.index_cast %c16_i32 : i32 to index
    %c0_162 = arith.constant 0 : index
    %c0_163 = arith.constant 0 : index
    %565 = vector.load %arg2[%564, %c0_162, %c0_163] : memref<19x8x128xbf16, #tpu.memory_space<vmem>>, vector<1x8x128xbf16>
    %566 = vector.shape_cast %565 : vector<1x8x128xbf16> to vector<8x128xbf16>
    %567 = arith.extf %566 : vector<8x128xbf16> to vector<8x128xf32>
    %568 = arith.truncf %563 : vector<8x32xf32> to vector<8x32xbf16>
    %c0_164 = arith.constant 0 : index
    %c0_165 = arith.constant 0 : index
    %569 = vector.load %arg3[%c0_164, %c0_165] : memref<32x128xbf16, #tpu.memory_space<vmem>>, vector<32x128xbf16>
    %cst_166 = arith.constant dense<0.000000e+00> : vector<8x128xf32>
    %570 = tpu.matmul %568, %569, %cst_166 {dimension_numbers = #tpu.dot_dimension_numbers<[1], [0], [0], [1], [0, 0, 1, 1], [], []>} : vector<8x32xbf16>, vector<32x128xbf16>, vector<8x128xf32> -> vector<8x128xf32>
    %571 = vector.extract_strided_slice %567 {offsets = [0, 0], sizes = [8, 32], strides = [1, 1]} : vector<8x128xf32> to vector<8x32xf32>
    %572 = vector.extract_strided_slice %570 {offsets = [0, 0], sizes = [8, 32], strides = [1, 1]} : vector<8x128xf32> to vector<8x32xf32>
    %573 = arith.addf %571, %572 : vector<8x32xf32>
    %574 = arith.negf %573 : vector<8x32xf32>
    %575 = math.exp %574 : vector<8x32xf32>
    %cst_167 = arith.constant 1.000000e+00 : f32
    %576 = vector.broadcast %cst_167 : f32 to vector<8x32xf32>
    %577 = arith.addf %576, %575 : vector<8x32xf32>
    %578 = arith.divf %576, %577 : vector<8x32xf32>
    %579 = vector.extract_strided_slice %567 {offsets = [0, 32], sizes = [8, 32], strides = [1, 1]} : vector<8x128xf32> to vector<8x32xf32>
    %580 = vector.extract_strided_slice %570 {offsets = [0, 32], sizes = [8, 32], strides = [1, 1]} : vector<8x128xf32> to vector<8x32xf32>
    %581 = arith.addf %579, %580 : vector<8x32xf32>
    %582 = arith.negf %581 : vector<8x32xf32>
    %583 = math.exp %582 : vector<8x32xf32>
    %cst_168 = arith.constant 1.000000e+00 : f32
    %584 = vector.broadcast %cst_168 : f32 to vector<8x32xf32>
    %585 = arith.addf %584, %583 : vector<8x32xf32>
    %586 = arith.divf %584, %585 : vector<8x32xf32>
    %587 = vector.extract_strided_slice %567 {offsets = [0, 64], sizes = [8, 32], strides = [1, 1]} : vector<8x128xf32> to vector<8x32xf32>
    %588 = vector.extract_strided_slice %570 {offsets = [0, 64], sizes = [8, 32], strides = [1, 1]} : vector<8x128xf32> to vector<8x32xf32>
    %c0_169 = arith.constant 0 : index
    %c0_170 = arith.constant 0 : index
    %589 = vector.load %arg4[%c0_169, %c0_170] : memref<8x32xf32, #tpu.memory_space<vmem>>, vector<8x32xf32>
    %590 = arith.addf %588, %589 : vector<8x32xf32>
    %591 = arith.mulf %578, %590 : vector<8x32xf32>
    %592 = arith.addf %587, %591 : vector<8x32xf32>
    %593 = math.tanh %592 : vector<8x32xf32>
    %cst_171 = arith.constant 1.000000e+00 : f32
    %594 = vector.broadcast %cst_171 : f32 to vector<8x32xf32>
    %595 = arith.subf %594, %586 : vector<8x32xf32>
    %596 = arith.mulf %595, %593 : vector<8x32xf32>
    %597 = arith.mulf %586, %563 : vector<8x32xf32>
    %598 = arith.addf %596, %597 : vector<8x32xf32>
    %c17_i32 = arith.constant 17 : i32
    %599 = arith.index_cast %c17_i32 : i32 to index
    %c0_172 = arith.constant 0 : index
    %c0_173 = arith.constant 0 : index
    %600 = vector.load %arg2[%599, %c0_172, %c0_173] : memref<19x8x128xbf16, #tpu.memory_space<vmem>>, vector<1x8x128xbf16>
    %601 = vector.shape_cast %600 : vector<1x8x128xbf16> to vector<8x128xbf16>
    %602 = arith.extf %601 : vector<8x128xbf16> to vector<8x128xf32>
    %603 = arith.truncf %598 : vector<8x32xf32> to vector<8x32xbf16>
    %c0_174 = arith.constant 0 : index
    %c0_175 = arith.constant 0 : index
    %604 = vector.load %arg3[%c0_174, %c0_175] : memref<32x128xbf16, #tpu.memory_space<vmem>>, vector<32x128xbf16>
    %cst_176 = arith.constant dense<0.000000e+00> : vector<8x128xf32>
    %605 = tpu.matmul %603, %604, %cst_176 {dimension_numbers = #tpu.dot_dimension_numbers<[1], [0], [0], [1], [0, 0, 1, 1], [], []>} : vector<8x32xbf16>, vector<32x128xbf16>, vector<8x128xf32> -> vector<8x128xf32>
    %606 = vector.extract_strided_slice %602 {offsets = [0, 0], sizes = [8, 32], strides = [1, 1]} : vector<8x128xf32> to vector<8x32xf32>
    %607 = vector.extract_strided_slice %605 {offsets = [0, 0], sizes = [8, 32], strides = [1, 1]} : vector<8x128xf32> to vector<8x32xf32>
    %608 = arith.addf %606, %607 : vector<8x32xf32>
    %609 = arith.negf %608 : vector<8x32xf32>
    %610 = math.exp %609 : vector<8x32xf32>
    %cst_177 = arith.constant 1.000000e+00 : f32
    %611 = vector.broadcast %cst_177 : f32 to vector<8x32xf32>
    %612 = arith.addf %611, %610 : vector<8x32xf32>
    %613 = arith.divf %611, %612 : vector<8x32xf32>
    %614 = vector.extract_strided_slice %602 {offsets = [0, 32], sizes = [8, 32], strides = [1, 1]} : vector<8x128xf32> to vector<8x32xf32>
    %615 = vector.extract_strided_slice %605 {offsets = [0, 32], sizes = [8, 32], strides = [1, 1]} : vector<8x128xf32> to vector<8x32xf32>
    %616 = arith.addf %614, %615 : vector<8x32xf32>
    %617 = arith.negf %616 : vector<8x32xf32>
    %618 = math.exp %617 : vector<8x32xf32>
    %cst_178 = arith.constant 1.000000e+00 : f32
    %619 = vector.broadcast %cst_178 : f32 to vector<8x32xf32>
    %620 = arith.addf %619, %618 : vector<8x32xf32>
    %621 = arith.divf %619, %620 : vector<8x32xf32>
    %622 = vector.extract_strided_slice %602 {offsets = [0, 64], sizes = [8, 32], strides = [1, 1]} : vector<8x128xf32> to vector<8x32xf32>
    %623 = vector.extract_strided_slice %605 {offsets = [0, 64], sizes = [8, 32], strides = [1, 1]} : vector<8x128xf32> to vector<8x32xf32>
    %c0_179 = arith.constant 0 : index
    %c0_180 = arith.constant 0 : index
    %624 = vector.load %arg4[%c0_179, %c0_180] : memref<8x32xf32, #tpu.memory_space<vmem>>, vector<8x32xf32>
    %625 = arith.addf %623, %624 : vector<8x32xf32>
    %626 = arith.mulf %613, %625 : vector<8x32xf32>
    %627 = arith.addf %622, %626 : vector<8x32xf32>
    %628 = math.tanh %627 : vector<8x32xf32>
    %cst_181 = arith.constant 1.000000e+00 : f32
    %629 = vector.broadcast %cst_181 : f32 to vector<8x32xf32>
    %630 = arith.subf %629, %621 : vector<8x32xf32>
    %631 = arith.mulf %630, %628 : vector<8x32xf32>
    %632 = arith.mulf %621, %598 : vector<8x32xf32>
    %633 = arith.addf %631, %632 : vector<8x32xf32>
    %c18_i32 = arith.constant 18 : i32
    %634 = arith.index_cast %c18_i32 : i32 to index
    %c0_182 = arith.constant 0 : index
    %c0_183 = arith.constant 0 : index
    %635 = vector.load %arg2[%634, %c0_182, %c0_183] : memref<19x8x128xbf16, #tpu.memory_space<vmem>>, vector<1x8x128xbf16>
    %636 = vector.shape_cast %635 : vector<1x8x128xbf16> to vector<8x128xbf16>
    %637 = arith.extf %636 : vector<8x128xbf16> to vector<8x128xf32>
    %638 = arith.truncf %633 : vector<8x32xf32> to vector<8x32xbf16>
    %c0_184 = arith.constant 0 : index
    %c0_185 = arith.constant 0 : index
    %639 = vector.load %arg3[%c0_184, %c0_185] : memref<32x128xbf16, #tpu.memory_space<vmem>>, vector<32x128xbf16>
    %cst_186 = arith.constant dense<0.000000e+00> : vector<8x128xf32>
    %640 = tpu.matmul %638, %639, %cst_186 {dimension_numbers = #tpu.dot_dimension_numbers<[1], [0], [0], [1], [0, 0, 1, 1], [], []>} : vector<8x32xbf16>, vector<32x128xbf16>, vector<8x128xf32> -> vector<8x128xf32>
    %641 = vector.extract_strided_slice %637 {offsets = [0, 0], sizes = [8, 32], strides = [1, 1]} : vector<8x128xf32> to vector<8x32xf32>
    %642 = vector.extract_strided_slice %640 {offsets = [0, 0], sizes = [8, 32], strides = [1, 1]} : vector<8x128xf32> to vector<8x32xf32>
    %643 = arith.addf %641, %642 : vector<8x32xf32>
    %644 = arith.negf %643 : vector<8x32xf32>
    %645 = math.exp %644 : vector<8x32xf32>
    %cst_187 = arith.constant 1.000000e+00 : f32
    %646 = vector.broadcast %cst_187 : f32 to vector<8x32xf32>
    %647 = arith.addf %646, %645 : vector<8x32xf32>
    %648 = arith.divf %646, %647 : vector<8x32xf32>
    %649 = vector.extract_strided_slice %637 {offsets = [0, 32], sizes = [8, 32], strides = [1, 1]} : vector<8x128xf32> to vector<8x32xf32>
    %650 = vector.extract_strided_slice %640 {offsets = [0, 32], sizes = [8, 32], strides = [1, 1]} : vector<8x128xf32> to vector<8x32xf32>
    %651 = arith.addf %649, %650 : vector<8x32xf32>
    %652 = arith.negf %651 : vector<8x32xf32>
    %653 = math.exp %652 : vector<8x32xf32>
    %cst_188 = arith.constant 1.000000e+00 : f32
    %654 = vector.broadcast %cst_188 : f32 to vector<8x32xf32>
    %655 = arith.addf %654, %653 : vector<8x32xf32>
    %656 = arith.divf %654, %655 : vector<8x32xf32>
    %657 = vector.extract_strided_slice %637 {offsets = [0, 64], sizes = [8, 32], strides = [1, 1]} : vector<8x128xf32> to vector<8x32xf32>
    %658 = vector.extract_strided_slice %640 {offsets = [0, 64], sizes = [8, 32], strides = [1, 1]} : vector<8x128xf32> to vector<8x32xf32>
    %c0_189 = arith.constant 0 : index
    %c0_190 = arith.constant 0 : index
    %659 = vector.load %arg4[%c0_189, %c0_190] : memref<8x32xf32, #tpu.memory_space<vmem>>, vector<8x32xf32>
    %660 = arith.addf %658, %659 : vector<8x32xf32>
    %661 = arith.mulf %648, %660 : vector<8x32xf32>
    %662 = arith.addf %657, %661 : vector<8x32xf32>
    %663 = math.tanh %662 : vector<8x32xf32>
    %cst_191 = arith.constant 1.000000e+00 : f32
    %664 = vector.broadcast %cst_191 : f32 to vector<8x32xf32>
    %665 = arith.subf %664, %656 : vector<8x32xf32>
    %666 = arith.mulf %665, %663 : vector<8x32xf32>
    %667 = arith.mulf %656, %633 : vector<8x32xf32>
    %668 = arith.addf %666, %667 : vector<8x32xf32>
    %c19_i32 = arith.constant 19 : i32
    %c0_192 = arith.constant 0 : index
    %c0_193 = arith.constant 0 : index
    %669 = vector.load %arg6[%c0_192, %c0_193] : memref<8x32xf32, #tpu.memory_space<vmem>>, vector<8x32xf32>
    tpu.vector_store %arg6[%c0_192, %c0_193], %668 {strides = array<i32>} : memref<8x32xf32, #tpu.memory_space<vmem>>, vector<8x32xf32>,
    %c1_i32_194 = arith.constant 1 : i32
    %670 = arith.cmpi eq, %arg1, %c1_i32_194 : i32
    %671 = arith.extui %670 : i1 to i32
    %c0_i32_195 = arith.constant 0 : i32
    %672 = arith.cmpi ne, %671, %c0_i32_195 : i32
    scf.if %672 {
      %c0_196 = arith.constant 0 : index
      %c0_197 = arith.constant 0 : index
      %673 = vector.load %arg5[%c0_196, %c0_197] : memref<8x32xf32, #tpu.memory_space<vmem>>, vector<8x32xf32>
      tpu.vector_store %arg5[%c0_196, %c0_197], %668 {strides = array<i32>} : memref<8x32xf32, #tpu.memory_space<vmem>>, vector<8x32xf32>,
    } else {
    }
    return
  }
  func.func @transform_0(%arg0: i32, %arg1: i32) -> (i32, i32, i32) {
    %c0_i32 = arith.constant 0 : i32
    %c0_i32_0 = arith.constant 0 : i32
    return %arg1, %arg0, %c0_i32 : i32, i32, i32
  }
  func.func @transform_1(%arg0: i32, %arg1: i32) -> (i32, i32) {
    %c0_i32 = arith.constant 0 : i32
    %c0_i32_0 = arith.constant 0 : i32
    %c0_i32_1 = arith.constant 0 : i32
    return %c0_i32, %c0_i32_0 : i32, i32
  }
  func.func @transform_2(%arg0: i32, %arg1: i32) -> (i32, i32) {
    %c0_i32 = arith.constant 0 : i32
    %c0_i32_0 = arith.constant 0 : i32
    %c0_i32_1 = arith.constant 0 : i32
    return %c0_i32, %c0_i32_0 : i32, i32
  }
  func.func @transform_3(%arg0: i32, %arg1: i32) -> (i32, i32) {
    %c0_i32 = arith.constant 0 : i32
    %c0_i32_0 = arith.constant 0 : i32
    return %arg0, %c0_i32 : i32, i32
  }
}

</mosaic_0001>

<bundles_post_ra>
// kernel: tpu_custom_call.1
= control target key start
LH: loop header
LB: loop body
LE: loop exit
PB: predicated region body
PF: predicated region fallthrough
CT: control target
= control target key end

     0   :  { %8 = vsyncpa [#allocation4], 0  ;;  %s2994_s0 = inlined_call_operand.hbm [shape: bf16[38,8,128], index: 0, kind: input, shape index: {}]   ;;  %s2995_s1 = inlined_call_operand.hbm [shape: bf16[32,128], index: 1, kind: input, shape index: {}]   ;;  %s2996_s2 = inlined_call_operand.hbm [shape: f32[8,32], index: 2, kind: input, shape index: {}]   ;;  %s2997_s3 = inlined_call_operand.hbm [shape: f32[8,32], index: 3, kind: output, shape index: {}]  }
   0x1   :  { %10 = vsyncpa [#allocation4 + $0x1], 0 }
   0x2   :  { %11 = vsyncpa [#allocation7], 0 }
   0x3   :  { %12 = vsyncpa [#allocation5], 0  ;;  %s2517_s12 = smov 0   ;;  %s2519_s13 = smov 0  }
   0x4   :  { %s2521_s14 = smov 0   ;;  %s2523_s15 = smov 0  }
   0x5   :  { %s2525_s16 = smov 0   ;;  %s2527_s17 = smov 0  }
   0x6 LB: > { %s1819_s18 = sadd.s32 4294967295, %s2483_s17   ;;  %p52_p0 = scmp.ne.s32.totalorder %s2467_s13, %s2463_s12  ;;  %s2483_s17 = sphi %s2527_s17, %s18_s17   ;;  %s2479_s16 = sphi %s2525_s16, %s3015_s16   ;;  %s2475_s15 = sphi %s2523_s15, %s3014_s15   ;;  %s2471_s14 = sphi %s2521_s14, %s3013_s14   ;;  %s2467_s13 = sphi %s2519_s13, %s3012_s13   ;;  %s2463_s12 = sphi %s2517_s12, %s3011_s12  }
   0x7   : > { %p2549_p1 = scmp.eq.s32.totalorder %s1819_s18, 0  ;;  %p1820_p2 = scmp.ge.s32.totalorder %s2483_s17, 1 }
   0x8   : > { %p131_p3 = scmp.lt.s32.totalorder %s2483_s17, 3  ;;  %s2485_s22 = smov [#allocation6]  }
   0x9   : > { %s3002_s19 = scalar_select %p2549_p1, 1, 0 }
   0xa   : > { %p2557_p4 = por %p2549_p1, %p52_p0  ;;  %p2561_p5 = pnand %p1820_p2, %p131_p3 }
   0xb   : > { %s143_s23 = sshll.u32 %s2485_s22, 4  ;;  %s2486_s25 = smov [#allocation8]   ;;  %s144_s23 = int_to_ptr.vmem [resolvable:$true] %s143_s23 }
   0xc   : > { %s3003_s20 = scalar_select %p2557_p4, 1, 0 }
   0xd   : > { %s3004_s21 = scalar_select %p2561_p5, 1, 0 }
   0xe   : > { %p2118_p6 = pneg %p2561_p5  ;;  %s157_s26 = sshll.u32 %s2486_s25, 4  ;;  %s2573_s26 = int_to_ptr.vmem [resolvable:$true] %s157_s26 }
   0xf   : > { %s2313_s29 = scalar_lea.hbm %s2995_s1, 256 }
  0x10   : > { %p2569_p7 = pnand %p2118_p6, %p2549_p1  ;;  %p2314_p8 = scmp.ne.s32.totalorder %s2995_s1, %s2313_s29 }
  0x11   : > { %p2320_p12 = scmp.lt.u32.totalorder %s2313_s29, %s2995_s1 }
  0x12   : > { %p2315_p9 = pneg %p2569_p7 }
  0x14   : > { %p2316_p10 = pnand %p2315_p9, %p2314_p8 }
  0x16   : > { %p2317_p11 = pneg %p2316_p10 }
  0x18   : > { %p2322_p13 = pnand %p2320_p12, %p2317_p11 }
  0x1a   : > { %2325 = shalt.err (!%p2322_p13)
}
  0x1b   : > { %s2326_s7 = scalar_lea.vmem %s144_s23, 256  ;;  %p2334_p6 = scmp.lt.s32.totalorder %s144_s23, %s144_s23 }
  0x1c   : > { %p2327_p0 = scmp.ne.s32.totalorder %s144_s23, %s2326_s7  ;;  %p2335_p1 = scmp.lt.s32.totalorder %s2326_s7, %s2326_s7 }
  0x1e   : > { %p2329_p2 = pnand %p2327_p0, %p2315_p9  ;;  %p2336_p4 = por %p2335_p1, %p2334_p6 }
  0x20   : > { %p2330_p3 = pneg %p2329_p2 }
  0x22   : > { %p2337_p5 = pnand %p2336_p4, %p2330_p3 }
  0x24   : > { %2340 = shalt.err (!%p2337_p5)
}
  0x25   : > { %s2487_s8 = smov 64   ;;  %s2488_s9 = smov 4  }
  0x26   : > { %2121 = dma.hbm_to_vmem [thread:$0]  (!%p2569_p7), %s2995_s1, 256, %s144_s23, [#allocation7], %s2487_s8, %s2487_s8, %s2488_s9  }
  0x27   : > { %s2341_s25 = scalar_lea.hbm %s2996_s2, 128 }
  0x28   : > { %p2342_p1 = scmp.ne.s32.totalorder %s2996_s2, %s2341_s25  ;;  %p2348_p8 = scmp.lt.u32.totalorder %s2341_s25, %s2996_s2 }
  0x2a   : > { %p2344_p4 = pnand %p2342_p1, %p2315_p9 }
  0x2c   : > { %p2345_p5 = pneg %p2344_p4 }
  0x2e   : > { %p2350_p10 = pnand %p2348_p8, %p2345_p5 }
  0x30   : > { %2353 = shalt.err (!%p2350_p10)
}
  0x31   : > { %s2354_s23 = scalar_lea.vmem %s2573_s26, 128  ;;  %p2362_p0 = scmp.lt.s32.totalorder %s2573_s26, %s2573_s26 }
  0x32   : > { %p2355_p11 = scmp.ne.s32.totalorder %s2573_s26, %s2354_s23  ;;  %p2363_p2 = scmp.lt.s32.totalorder %s2354_s23, %s2354_s23 }
  0x34   : > { %p2357_p12 = pnand %p2355_p11, %p2315_p9  ;;  %p2364_p3 = por %p2363_p2, %p2362_p0 }
  0x36   : > { %p2358_p13 = pneg %p2357_p12 }
  0x38   : > { %p2365_p6 = pnand %p2364_p3, %p2358_p13 }
  0x3a   : > { %2368 = shalt.err (!%p2365_p6)
}
  0x3b   : > { %2124 = dma.hbm_to_vmem [thread:$0]  (!%p2569_p7), %s2996_s2, 128, %s2573_s26, [#allocation7]  }
  0x3c   : > { %s27_s6 = sadd.s32 1, %s2479_s16  ;;  %s39_s7 = sadd.s32 1, %s2471_s14 }
  0x3d   : > { %p28_p9 = scmp.ge.s32.totalorder %s27_s6, 2  ;;  %p46_p1 = scmp.ne.s32.totalorder %s2471_s14, %s2467_s13 }
  0x3e   : > { %p47_p4 = scmp.eq.s32.totalorder %s2483_s17, 0  ;;  %p2131_p5 = scmp.lt.s32.totalorder %s2483_s17, 2 }
  0x3f   : > { %s3017_s6 = smov (%p28_p9, %s27_s6), 0  ;;  %s168_s24 = sand.u32 1, %s2471_s14  }
  0x40   : > { %p48_p8 = por %p47_p4, %p46_p1  ;;  %s34_s10 = ssub.s32 %s2479_s16, %s3017_s6 }
  0x41   : > { %p37_p10 = scmp.eq.s32.totalorder %s34_s10, 0  ;;  %s2102_s11 = smul.u32 76, %s168_s24 }
  0x42   : > { %s1892_s12 = smul.u32 1216, %s2479_s16  ;;  %p2637_p11 = pnand %p2131_p5, %p48_p8 }
  0x43   : > { %s2642_s26 = scalar_select %p37_p10, %s2471_s14, %s39_s7  }
  0x44   : > { %s2647_s28 = scalar_lea.hbm %s2994_s0, %s1892_s12  ;;  %s172_s29 = scalar_lea.vmem [#allocation3], %s2102_s11 }
  0x45   : > { %s180_s30 = sshll.u32 %s172_s29, 4  ;;  %s2651_s23 = scalar_lea.sflag [#allocation4], %s168_s24  ;;  %s2649_s30 = int_to_ptr.vmem [resolvable:$true] %s180_s30 }
  0x46   : > { %s2369_s4 = scalar_lea.hbm %s2647_s28, 1216  ;;  %p2371_p12 = pneg %p2637_p11 }
  0x47   : > { %p2370_p7 = scmp.ne.s32.totalorder %s2647_s28, %s2369_s4  ;;  %s2374_s10 = scalar_lea.hbm %s2994_s0, 2432 }
  0x48   : > { %p2375_p2 = scmp.lt.u32.totalorder %s2647_s28, %s2994_s0  ;;  %p2376_p3 = scmp.lt.u32.totalorder %s2374_s10, %s2369_s4 }
  0x49   : > { %p2372_p13 = pnand %p2371_p12, %p2370_p7  ;;  %p2378_p9 = scmp.lt.u32.totalorder %s2369_s4, %s2647_s28 }
  0x4a   : > { %p2377_p6 = por %p2376_p3, %p2375_p2 }
  0x4b   : > { %p2373_p0 = pneg %p2372_p13 }
  0x4c   : > { %p2379_p1 = por %p2378_p9, %p2377_p6 }
  0x4e   : > { %p2380_p4 = pnand %p2379_p1, %p2373_p0 }
  0x50   : > { %2383 = shalt.err (!%p2380_p4)
}
  0x51   : > { %s2384_s24 = scalar_lea.vmem %s2649_s30, 1216  ;;  %s2489_s11 = smov [#allocation3]  }
  0x52   : > { %p2385_p5 = scmp.ne.s32.totalorder %s2649_s30, %s2384_s24  ;;  %s2389_s27 = sshll.u32 %s2489_s11, 4  ;;  %s2390_s27 = int_to_ptr.vmem [resolvable:$false] %s2389_s27 }
  0x53   : > { %s2391_s29 = scalar_lea.vmem %s2390_s27, 2432  ;;  %p2392_p7 = scmp.lt.s32.totalorder %s2649_s30, %s2390_s27 }
  0x54   : > { %p2387_p8 = pnand %p2385_p5, %p2371_p12  ;;  %p2393_p13 = scmp.lt.s32.totalorder %s2391_s29, %s2384_s24 }
  0x56   : > { %p2388_p10 = pneg %p2387_p8  ;;  %p2394_p2 = por %p2393_p13, %p2392_p7 }
  0x58   : > { %p2395_p3 = pnand %p2394_p2, %p2388_p10 }
  0x5a   : > { %2398 = shalt.err (!%p2395_p3)
}
  0x5b   : > { %2128 = dma.hbm_to_vmem [thread:$0]  (!%p2637_p11), %s2647_s28, 1216, %s2649_s30, %s2651_s23, %s2487_s8, %s2487_s8, %s2488_s9  }
  0x5c   : > { %p3007_p12 = scmp.ne.s32.totalorder %s3004_s21, 0 }
  0x5d   : > { %s194_s4 = sand.u32 (!%p3007_p12), 1, %s2467_s13   ;;  %p3008_p0 = scmp.ne.s32.totalorder (!%p3007_p12), %s3003_s20, 0 }
  0x5e   : > { %192 = sbr.rel (%p3007_p12) target bundleno = 13352 (0x3428), region = 32  ;;  %s195_s7 = scalar_lea.sflag (!%p3007_p12), [#allocation4], %s194_s4 }
  0x5f   : > { %s2103_s5 = smul.u32 (!%p3007_p12), 76, %s194_s4 }
  0x61   : > { %s2685_s10 = scalar_lea.vmem (!%p3007_p12), [#allocation3], %s2103_s5 }
  0x65   : > { %2450 = dma.done.wait (%p3008_p0), %s195_s7, 1216  }
  0x66   : > { %2452 = vsyncadd (%p3008_p0), %s195_s7, 4294966080  ;;  %p3009_p6 = scmp.ne.s32.totalorder %s3002_s19, 0 }
  0x68   : > { %2454 = dma.done.wait (%p3009_p6), [#allocation7], 384  }
  0x69   : > { %2456 = vsyncadd (%p3009_p6), [#allocation7], 4294966912  ;;  %p1828_p11 = scmp.ne.s32.totalorder %s2475_s15, 0 }
  0x6a   : > { %vm230_vm0 = vcmask (!%p1828_p11), 261120   ;;  %v2490_v0 = vmov (!%p1828_p11), 0.0  }
  0x6b   : > { %229 = sbr.rel (%p1828_p11) target bundleno = 114 (0x72), region = 48  ;;  %231 = vst.msk [vmem:[#allocation2] sm:$0xff] (!%p1828_p11), %vm230_vm0, %v2490_v0 }
  0x72 PF: > { %v2696_v1 = vld [vmem:[#allocation6] sm:$0xff]   ;;  %v2491_v2 = vmov 0.0   ;;  %v2701_v3 = vld [vmem:[#allocation6 + $0x8] sm:$0xff]   ;;  %vm2492_vm1 = vmmov 0   ;;  %v303_v5 = vld [vmem:[#allocation8] sm:$0xff]  ;;  %s2493_s19 = smov 64  }
  0x73   : > { %1950 = vmatprep.subr.bf16.mxu0 %v2491_v2  ;;  %1958 = vmatprep.subr.bf16.mxu1 %v2491_v2  ;;  %v232_v4 = vld [vmem:[#allocation2] sm:$0xff]  ;;  %vm252_vm2 = vcmask 261120   ;;  %s2494_s20 = smov 32   ;;  %v233_v13 = vld [vmem:[%s2685_s10] sm:$0xff]   ;;  %s2495_s21 = smov 96  }
  0x74   : > { %1951 = vmatpush3.bf16.msra.mxu0 %v2696_v1  ;;  %1954 = vmatprep.mubr.msk.bf16.mxu0 %vm2492_vm1, %v2491_v2  ;;  %v235_v6 = vpack.c.bf16 %v232_v4, %v232_v4  ;;  %v234_v14 = vunpack.c.l.bf16 %v233_v13  ;;  %v334_v38 = vunpack.c.h.bf16 %v233_v13  ;;  %v1836_v61 = vld [vmem:[%s2685_s10 + $0x8] sm:$0xff]   ;;  %p1887_p9 = scmp.ne.s32.totalorder %s2475_s15, 1 }
  0x75   : > { %1952 = vmatprep.subr.bf16.mxu0 %v2491_v2  ;;  %305 = vrot.lane.b32.xlu0 %v303_v5, %s2493_s19  ;;  %v411_v62 = vunpack.c.l.bf16 %v1836_v61 }
  0x76   : > { %1959 = vmatpush3.bf16.msra.mxu1 %v2696_v1  ;;  %1962 = vmatprep.mubr.msk.bf16.mxu1 %vm2492_vm1, %v2491_v2 }
  0x77   : > { %1960 = vmatprep.subr.bf16.mxu1 %v2491_v2 }
  0x78   : > { %1953 = vmatpush3.bf16.msra.mxu0 %v2701_v3 }
  0x79   : > { %1966 = vmatprep.subr.bf16.mxu0 %v2491_v2 }
  0x7a   : > { %1961 = vmatpush3.bf16.msra.mxu1 %v2701_v3 }
  0x7b   : > { %1955 = vmatmul.mubr.msk.bf16.vlgmr.msra.gmra.mrb[0].mxu0 %vm252_vm2, %v235_v6  ;;  %1974 = vmatprep.subr.bf16.mxu1 %v2491_v2 }
  0x7c   : > { %1967 = vmatpush3.bf16.msra.mxu0 %v2696_v1  ;;  %1970 = vmatprep.mubr.msk.bf16.mxu0 %vm2492_vm1, %v2491_v2 }
  0x7d   : > { %1968 = vmatprep.subr.bf16.mxu0 %v2491_v2 }
  0x80   : > { %1969 = vmatpush3.bf16.msra.mxu0 %v2701_v3 }
  0x81   : > { %1982 = vmatprep.subr.bf16.mxu0 %v2491_v2 }
  0xe7   : > { %v2722_v7 = vpop.permute.xlu0 %305 }
 0x14e   : > { %v290_v8 = vpop.f32.mrb[0].mxu0 }
 0x14f   : > { %v308_v9 = vadd.f32 %v2722_v7, %v290_v8  ;;  %v1956_v10 = vpop.f32.mrb[1].mxu0  ;;  %v296_v15 = vadd.f32 %v290_v8, %v234_v14 }
 0x150   : > { %v293_v11 = vpop.f32.mrb[2].mxu0 }
 0x151   : > { %310 = vrot.lane.b32.xlu0 %v308_v9, %s2493_s19  ;;  %v1957_v12 = vpop.f32.mrb[3].mxu0  ;;  %v1832_v16 = vmul.f32 -1.442695, %v296_v15 }
 0x153   : > { %2197 = vpow2.f32 %v1832_v16 }
 0x155   : > { %327 = vrot.lane.b32.xlu0 %v232_v4, %s2494_s20 }
 0x15d   : > { %v2198_v17 = vpop.eup %2197 }
 0x15e   : > { %v300_v18 = vadd.f32 1.0, %v2198_v17 }
 0x160   : > { %2199 = vrcp.f32 %v300_v18 }
 0x16a   : > { %v2200_v19 = vpop.eup %2199 }
 0x16b   : > { %v320_v26 = vsub.f32 1.0, %v2200_v19 }
 0x1c3   : > { %v311_v20 = vpop.permute.xlu0 %310 }
 0x1c4   : > { %v313_v21 = vmul.f32 %v2200_v19, %v311_v20 }
 0x1c6   : > { %315 = vrot.lane.b32.xlu1 %v313_v21, %s2493_s19 }
 0x1c7   : > { %v328_v25 = vpop.permute.xlu0 %327 }
 0x1c8   : > { %v330_v28 = vmul.f32 %v2200_v19, %v328_v25  ;;  %v488_v25 = vunpack.c.h.bf16 %v1836_v61 }
 0x238   : > { %v316_v22 = vpop.permute.xlu1 %315 }
 0x239   : > { %v318_v23 = vadd.f32 %v316_v22, %v234_v14 }
 0x23b   : > { %2201 = vtanh.f32 %v318_v23 }
 0x245   : > { %v2202_v24 = vpop.eup %2201 }
 0x246   : > { %322 = vrot.lane.b32.xlu1 %v2202_v24, %s2495_s21 }
 0x2b8   : > { %v323_v27 = vpop.permute.xlu1 %322 }
 0x2b9   : > { %v325_v29 = vmul.f32 %v323_v27, %v320_v26 }
 0x2bb   : > { %v331_v30 = vadd.f32 %v330_v28, %v325_v29 }
 0x2bd   : > { %v335_v31 = vpack.c.bf16 %v331_v30, %v331_v30 }
 0x2bf   : > { %337 = vrot.lane.b32.xlu1 %v335_v31, %s2495_s21 }
 0x331   : > { %v338_v32 = vpop.permute.xlu1 %337 }
 0x332   : > { %1963 = vmatmul.mubr.msk.bf16.vlgmr.msra.gmra.mrb[0].mxu1 %vm252_vm2, %v338_v32 }
 0x333   : > { %1975 = vmatpush3.bf16.msra.mxu1 %v2696_v1  ;;  %1978 = vmatprep.mubr.msk.bf16.mxu1 %vm2492_vm1, %v2491_v2 }
 0x334   : > { %1976 = vmatprep.subr.bf16.mxu1 %v2491_v2 }
 0x337   : > { %1977 = vmatpush3.bf16.msra.mxu1 %v2701_v3 }
 0x338   : > { %1990 = vmatprep.subr.bf16.mxu1 %v2491_v2 }
 0x405   : > { %v376_v33 = vpop.f32.mrb[0].mxu1 }
 0x406   : > { %v389_v34 = vadd.f32 %v376_v33, %v2722_v7  ;;  %v1964_v35 = vpop.f32.mrb[1].mxu1  ;;  %v382_v39 = vadd.f32 %v376_v33, %v334_v38 }
 0x407   : > { %v379_v36 = vpop.f32.mrb[2].mxu1 }
 0x408   : > { %391 = vrot.lane.b32.xlu0 %v389_v34, %s2493_s19  ;;  %v1965_v37 = vpop.f32.mrb[3].mxu1  ;;  %v1835_v40 = vmul.f32 -1.442695, %v382_v39 }
 0x40a   : > { %2203 = vpow2.f32 %v1835_v40 }
 0x414   : > { %v2204_v41 = vpop.eup %2203 }
 0x415   : > { %v386_v42 = vadd.f32 1.0, %v2204_v41 }
 0x417   : > { %2205 = vrcp.f32 %v386_v42 }
 0x421   : > { %v2206_v43 = vpop.eup %2205 }
 0x422   : > { %v401_v49 = vsub.f32 1.0, %v2206_v43  ;;  %v407_v51 = vmul.f32 %v2206_v43, %v331_v30 }
 0x47a   : > { %v392_v44 = vpop.permute.xlu0 %391 }
 0x47b   : > { %v394_v45 = vmul.f32 %v2206_v43, %v392_v44 }
 0x47d   : > { %396 = vrot.lane.b32.xlu1 %v394_v45, %s2493_s19 }
 0x4ef   : > { %v397_v46 = vpop.permute.xlu1 %396 }
 0x4f0   : > { %v399_v47 = vadd.f32 %v397_v46, %v334_v38 }
 0x4f2   : > { %2207 = vtanh.f32 %v399_v47 }
 0x4fc   : > { %v2208_v48 = vpop.eup %2207 }
 0x4fd   : > { %403 = vrot.lane.b32.xlu0 %v2208_v48, %s2495_s21  ;;  %v1842_v48 = vld [vmem:[%s2685_s10 + $0x10] sm:$0xff]  }
 0x56f   : > { %v404_v50 = vpop.permute.xlu0 %403 }
 0x570   : > { %v406_v52 = vmul.f32 %v404_v50, %v401_v49  ;;  %v565_v49 = vunpack.c.l.bf16 %v1842_v48 }
 0x572   : > { %v408_v53 = vadd.f32 %v407_v51, %v406_v52 }
 0x574   : > { %v412_v54 = vpack.c.bf16 %v408_v53, %v408_v53 }
 0x576   : > { %414 = vrot.lane.b32.xlu1 %v412_v54, %s2495_s21 }
 0x5e8   : > { %v415_v55 = vpop.permute.xlu1 %414 }
 0x5e9   : > { %1971 = vmatmul.mubr.msk.bf16.vlgmr.msra.gmra.mrb[4].mxu0 %vm252_vm2, %v415_v55 }
 0x5ea   : > { %1983 = vmatpush3.bf16.msra.mxu0 %v2696_v1  ;;  %1986 = vmatprep.mubr.msk.bf16.mxu0 %vm2492_vm1, %v2491_v2 }
 0x5eb   : > { %1984 = vmatprep.subr.bf16.mxu0 %v2491_v2 }
 0x5ee   : > { %1985 = vmatpush3.bf16.msra.mxu0 %v2701_v3 }
 0x5ef   : > { %1998 = vmatprep.subr.bf16.mxu0 %v2491_v2 }
 0x6bc   : > { %v453_v56 = vpop.f32.mrb[4].mxu0 }
 0x6bd   : > { %v466_v57 = vadd.f32 %v453_v56, %v2722_v7  ;;  %v1972_v58 = vpop.f32.mrb[5].mxu0  ;;  %v459_v63 = vadd.f32 %v453_v56, %v411_v62 }
 0x6be   : > { %v456_v59 = vpop.f32.mrb[6].mxu0 }
 0x6bf   : > { %468 = vrot.lane.b32.xlu0 %v466_v57, %s2493_s19  ;;  %v1973_v60 = vpop.f32.mrb[7].mxu0  ;;  %v1838_v0 = vmul.f32 -1.442695, %v459_v63 }
 0x6c1   : > { %2209 = vpow2.f32 %v1838_v0 }
 0x6cb   : > { %v2210_v4 = vpop.eup %2209 }
 0x6cc   : > { %v463_v5 = vadd.f32 1.0, %v2210_v4 }
 0x6ce   : > { %2211 = vrcp.f32 %v463_v5 }
 0x6d8   : > { %v2212_v6 = vpop.eup %2211 }
 0x6d9   : > { %v478_v13 = vsub.f32 1.0, %v2212_v6  ;;  %v484_v15 = vmul.f32 %v2212_v6, %v408_v53 }
 0x731   : > { %v469_v8 = vpop.permute.xlu0 %468 }
 0x732   : > { %v471_v9 = vmul.f32 %v2212_v6, %v469_v8 }
 0x734   : > { %473 = vrot.lane.b32.xlu1 %v471_v9, %s2493_s19 }
 0x7a6   : > { %v474_v10 = vpop.permute.xlu1 %473 }
 0x7a7   : > { %v476_v11 = vadd.f32 %v474_v10, %v411_v62 }
 0x7a9   : > { %2213 = vtanh.f32 %v476_v11 }
 0x7b3   : > { %v2214_v12 = vpop.eup %2213 }
 0x7b4   : > { %480 = vrot.lane.b32.xlu0 %v2214_v12, %s2495_s21  ;;  %v642_v12 = vunpack.c.h.bf16 %v1842_v48 }
 0x826   : > { %v481_v14 = vpop.permute.xlu0 %480 }
 0x827   : > { %v483_v16 = vmul.f32 %v481_v14, %v478_v13 }
 0x829   : > { %v485_v17 = vadd.f32 %v484_v15, %v483_v16 }
 0x82b   : > { %v489_v18 = vpack.c.bf16 %v485_v17, %v485_v17 }
 0x82d   : > { %491 = vrot.lane.b32.xlu1 %v489_v18, %s2495_s21 }
 0x89f   : > { %v492_v19 = vpop.permute.xlu1 %491 }
 0x8a0   : > { %1979 = vmatmul.mubr.msk.bf16.vlgmr.msra.gmra.mrb[4].mxu1 %vm252_vm2, %v492_v19 }
 0x8a1   : > { %1991 = vmatpush3.bf16.msra.mxu1 %v2696_v1  ;;  %1994 = vmatprep.mubr.msk.bf16.mxu1 %vm2492_vm1, %v2491_v2 }
 0x8a2   : > { %1992 = vmatprep.subr.bf16.mxu1 %v2491_v2 }
 0x8a5   : > { %1993 = vmatpush3.bf16.msra.mxu1 %v2701_v3 }
 0x8a6   : > { %2006 = vmatprep.subr.bf16.mxu1 %v2491_v2 }
 0x973   : > { %v530_v20 = vpop.f32.mrb[4].mxu1 }
 0x974   : > { %v543_v21 = vadd.f32 %v530_v20, %v2722_v7  ;;  %v1980_v22 = vpop.f32.mrb[5].mxu1  ;;  %v536_v26 = vadd.f32 %v530_v20, %v488_v25 }
 0x975   : > { %v533_v23 = vpop.f32.mrb[6].mxu1 }
 0x976   : > { %545 = vrot.lane.b32.xlu0 %v543_v21, %s2493_s19  ;;  %v1981_v24 = vpop.f32.mrb[7].mxu1  ;;  %v1841_v27 = vmul.f32 -1.442695, %v536_v26 }
 0x978   : > { %2215 = vpow2.f32 %v1841_v27 }
 0x982   : > { %v2216_v28 = vpop.eup %2215 }
 0x983   : > { %v540_v29 = vadd.f32 1.0, %v2216_v28 }
 0x985   : > { %2217 = vrcp.f32 %v540_v29 }
 0x98f   : > { %v2218_v30 = vpop.eup %2217 }
 0x990   : > { %v555_v36 = vsub.f32 1.0, %v2218_v30  ;;  %v561_v38 = vmul.f32 %v2218_v30, %v485_v17 }
 0x9e8   : > { %v546_v31 = vpop.permute.xlu0 %545 }
 0x9e9   : > { %v548_v32 = vmul.f32 %v2218_v30, %v546_v31 }
 0x9eb   : > { %550 = vrot.lane.b32.xlu1 %v548_v32, %s2493_s19 }
 0xa5d   : > { %v551_v33 = vpop.permute.xlu1 %550 }
 0xa5e   : > { %v553_v34 = vadd.f32 %v551_v33, %v488_v25 }
 0xa60   : > { %2219 = vtanh.f32 %v553_v34 }
 0xa6a   : > { %v2220_v35 = vpop.eup %2219 }
 0xa6b   : > { %557 = vrot.lane.b32.xlu0 %v2220_v35, %s2495_s21  ;;  %v1848_v35 = vld [vmem:[%s2685_s10 + $0x18] sm:$0xff]  }
 0xadd   : > { %v558_v37 = vpop.permute.xlu0 %557 }
 0xade   : > { %v560_v39 = vmul.f32 %v558_v37, %v555_v36  ;;  %v719_v36 = vunpack.c.l.bf16 %v1848_v35 }
 0xae0   : > { %v562_v40 = vadd.f32 %v561_v38, %v560_v39 }
 0xae2   : > { %v566_v41 = vpack.c.bf16 %v562_v40, %v562_v40 }
 0xae4   : > { %568 = vrot.lane.b32.xlu1 %v566_v41, %s2495_s21 }
 0xb56   : > { %v569_v42 = vpop.permute.xlu1 %568 }
 0xb57   : > { %1987 = vmatmul.mubr.msk.bf16.vlgmr.msra.gmra.mrb[8].mxu0 %vm252_vm2, %v569_v42 }
 0xb58   : > { %1999 = vmatpush3.bf16.msra.mxu0 %v2696_v1  ;;  %2002 = vmatprep.mubr.msk.bf16.mxu0 %vm2492_vm1, %v2491_v2 }
 0xb59   : > { %2000 = vmatprep.subr.bf16.mxu0 %v2491_v2 }
 0xb5c   : > { %2001 = vmatpush3.bf16.msra.mxu0 %v2701_v3 }
 0xb5d   : > { %2014 = vmatprep.subr.bf16.mxu0 %v2491_v2 }
 0xc2a   : > { %v607_v43 = vpop.f32.mrb[8].mxu0 }
 0xc2b   : > { %v620_v44 = vadd.f32 %v607_v43, %v2722_v7  ;;  %v1988_v45 = vpop.f32.mrb[9].mxu0  ;;  %v613_v50 = vadd.f32 %v607_v43, %v565_v49 }
 0xc2c   : > { %v610_v46 = vpop.f32.mrb[10].mxu0 }
 0xc2d   : > { %622 = vrot.lane.b32.xlu0 %v620_v44, %s2493_s19  ;;  %v1989_v47 = vpop.f32.mrb[11].mxu0  ;;  %v1844_v51 = vmul.f32 -1.442695, %v613_v50 }
 0xc2f   : > { %2221 = vpow2.f32 %v1844_v51 }
 0xc39   : > { %v2222_v52 = vpop.eup %2221 }
 0xc3a   : > { %v617_v53 = vadd.f32 1.0, %v2222_v52 }
 0xc3c   : > { %2223 = vrcp.f32 %v617_v53 }
 0xc46   : > { %v2224_v54 = vpop.eup %2223 }
 0xc47   : > { %v632_v60 = vsub.f32 1.0, %v2224_v54  ;;  %v638_v62 = vmul.f32 %v2224_v54, %v562_v40 }
 0xc9f   : > { %v623_v55 = vpop.permute.xlu0 %622 }
 0xca0   : > { %v625_v56 = vmul.f32 %v2224_v54, %v623_v55 }
 0xca2   : > { %627 = vrot.lane.b32.xlu1 %v625_v56, %s2493_s19 }
 0xd14   : > { %v628_v57 = vpop.permute.xlu1 %627 }
 0xd15   : > { %v630_v58 = vadd.f32 %v628_v57, %v565_v49 }
 0xd17   : > { %2225 = vtanh.f32 %v630_v58 }
 0xd21   : > { %v2226_v59 = vpop.eup %2225 }
 0xd22   : > { %634 = vrot.lane.b32.xlu0 %v2226_v59, %s2495_s21  ;;  %v796_v59 = vunpack.c.h.bf16 %v1848_v35 }
 0xd94   : > { %v635_v61 = vpop.permute.xlu0 %634 }
 0xd95   : > { %v637_v63 = vmul.f32 %v635_v61, %v632_v60 }
 0xd97   : > { %v639_v0 = vadd.f32 %v638_v62, %v637_v63 }
 0xd99   : > { %v643_v4 = vpack.c.bf16 %v639_v0, %v639_v0 }
 0xd9b   : > { %645 = vrot.lane.b32.xlu1 %v643_v4, %s2495_s21 }
 0xe0d   : > { %v646_v5 = vpop.permute.xlu1 %645 }
 0xe0e   : > { %1995 = vmatmul.mubr.msk.bf16.vlgmr.msra.gmra.mrb[8].mxu1 %vm252_vm2, %v646_v5 }
 0xe0f   : > { %2007 = vmatpush3.bf16.msra.mxu1 %v2696_v1  ;;  %2010 = vmatprep.mubr.msk.bf16.mxu1 %vm2492_vm1, %v2491_v2 }
 0xe10   : > { %2008 = vmatprep.subr.bf16.mxu1 %v2491_v2 }
 0xe13   : > { %2009 = vmatpush3.bf16.msra.mxu1 %v2701_v3 }
 0xe14   : > { %2022 = vmatprep.subr.bf16.mxu1 %v2491_v2 }
 0xee1   : > { %v684_v6 = vpop.f32.mrb[8].mxu1 }
 0xee2   : > { %v697_v8 = vadd.f32 %v684_v6, %v2722_v7  ;;  %v1996_v9 = vpop.f32.mrb[9].mxu1  ;;  %v690_v13 = vadd.f32 %v684_v6, %v642_v12 }
 0xee3   : > { %v687_v10 = vpop.f32.mrb[10].mxu1 }
 0xee4   : > { %699 = vrot.lane.b32.xlu0 %v697_v8, %s2493_s19  ;;  %v1997_v11 = vpop.f32.mrb[11].mxu1  ;;  %v1847_v14 = vmul.f32 -1.442695, %v690_v13 }
 0xee6   : > { %2227 = vpow2.f32 %v1847_v14 }
 0xef0   : > { %v2228_v15 = vpop.eup %2227 }
 0xef1   : > { %v694_v16 = vadd.f32 1.0, %v2228_v15 }
 0xef3   : > { %2229 = vrcp.f32 %v694_v16 }
 0xefd   : > { %v2230_v17 = vpop.eup %2229 }
 0xefe   : > { %v709_v23 = vsub.f32 1.0, %v2230_v17  ;;  %v715_v25 = vmul.f32 %v2230_v17, %v639_v0 }
 0xf56   : > { %v700_v18 = vpop.permute.xlu0 %699 }
 0xf57   : > { %v702_v19 = vmul.f32 %v2230_v17, %v700_v18 }
 0xf59   : > { %704 = vrot.lane.b32.xlu1 %v702_v19, %s2493_s19 }
 0xfcb   : > { %v705_v20 = vpop.permute.xlu1 %704 }
 0xfcc   : > { %v707_v21 = vadd.f32 %v705_v20, %v642_v12 }
 0xfce   : > { %2231 = vtanh.f32 %v707_v21 }
 0xfd8   : > { %v2232_v22 = vpop.eup %2231 }
 0xfd9   : > { %711 = vrot.lane.b32.xlu0 %v2232_v22, %s2495_s21  ;;  %v1854_v22 = vld [vmem:[%s2685_s10 + $0x20] sm:$0xff]  }
0x104b   : > { %v712_v24 = vpop.permute.xlu0 %711 }
0x104c   : > { %v714_v26 = vmul.f32 %v712_v24, %v709_v23  ;;  %v873_v23 = vunpack.c.l.bf16 %v1854_v22 }
0x104e   : > { %v716_v27 = vadd.f32 %v715_v25, %v714_v26 }
0x1050   : > { %v720_v28 = vpack.c.bf16 %v716_v27, %v716_v27 }
0x1052   : > { %722 = vrot.lane.b32.xlu1 %v720_v28, %s2495_s21 }
0x10c4   : > { %v723_v29 = vpop.permute.xlu1 %722 }
0x10c5   : > { %2003 = vmatmul.mubr.msk.bf16.vlgmr.msra.gmra.mrb[12].mxu0 %vm252_vm2, %v723_v29 }
0x10c6   : > { %2015 = vmatpush3.bf16.msra.mxu0 %v2696_v1  ;;  %2018 = vmatprep.mubr.msk.bf16.mxu0 %vm2492_vm1, %v2491_v2 }
0x10c7   : > { %2016 = vmatprep.subr.bf16.mxu0 %v2491_v2 }
0x10ca   : > { %2017 = vmatpush3.bf16.msra.mxu0 %v2701_v3 }
0x10cb   : > { %2030 = vmatprep.subr.bf16.mxu0 %v2491_v2 }
0x1198   : > { %v761_v30 = vpop.f32.mrb[12].mxu0 }
0x1199   : > { %v774_v31 = vadd.f32 %v761_v30, %v2722_v7  ;;  %v2004_v32 = vpop.f32.mrb[13].mxu0  ;;  %v767_v37 = vadd.f32 %v761_v30, %v719_v36 }
0x119a   : > { %v764_v33 = vpop.f32.mrb[14].mxu0 }
0x119b   : > { %776 = vrot.lane.b32.xlu0 %v774_v31, %s2493_s19  ;;  %v2005_v34 = vpop.f32.mrb[15].mxu0  ;;  %v1850_v38 = vmul.f32 -1.442695, %v767_v37 }
0x119d   : > { %2233 = vpow2.f32 %v1850_v38 }
0x11a7   : > { %v2234_v39 = vpop.eup %2233 }
0x11a8   : > { %v771_v40 = vadd.f32 1.0, %v2234_v39 }
0x11aa   : > { %2235 = vrcp.f32 %v771_v40 }
0x11b4   : > { %v2236_v41 = vpop.eup %2235 }
0x11b5   : > { %v786_v47 = vsub.f32 1.0, %v2236_v41  ;;  %v792_v49 = vmul.f32 %v2236_v41, %v716_v27 }
0x120d   : > { %v777_v42 = vpop.permute.xlu0 %776 }
0x120e   : > { %v779_v43 = vmul.f32 %v2236_v41, %v777_v42 }
0x1210   : > { %781 = vrot.lane.b32.xlu1 %v779_v43, %s2493_s19 }
0x1282   : > { %v782_v44 = vpop.permute.xlu1 %781 }
0x1283   : > { %v784_v45 = vadd.f32 %v782_v44, %v719_v36 }
0x1285   : > { %2237 = vtanh.f32 %v784_v45 }
0x128f   : > { %v2238_v46 = vpop.eup %2237 }
0x1290   : > { %788 = vrot.lane.b32.xlu0 %v2238_v46, %s2495_s21  ;;  %v950_v46 = vunpack.c.h.bf16 %v1854_v22 }
0x1302   : > { %v789_v48 = vpop.permute.xlu0 %788 }
0x1303   : > { %v791_v50 = vmul.f32 %v789_v48, %v786_v47 }
0x1305   : > { %v793_v51 = vadd.f32 %v792_v49, %v791_v50 }
0x1307   : > { %v797_v52 = vpack.c.bf16 %v793_v51, %v793_v51 }
0x1309   : > { %799 = vrot.lane.b32.xlu1 %v797_v52, %s2495_s21 }
0x137b   : > { %v800_v53 = vpop.permute.xlu1 %799 }
0x137c   : > { %2011 = vmatmul.mubr.msk.bf16.vlgmr.msra.gmra.mrb[12].mxu1 %vm252_vm2, %v800_v53 }
0x137d   : > { %2023 = vmatpush3.bf16.msra.mxu1 %v2696_v1  ;;  %2026 = vmatprep.mubr.msk.bf16.mxu1 %vm2492_vm1, %v2491_v2 }
0x137e   : > { %2024 = vmatprep.subr.bf16.mxu1 %v2491_v2 }
0x1381   : > { %2025 = vmatpush3.bf16.msra.mxu1 %v2701_v3 }
0x1382   : > { %2038 = vmatprep.subr.bf16.mxu1 %v2491_v2 }
0x144f   : > { %v838_v54 = vpop.f32.mrb[12].mxu1 }
0x1450   : > { %v851_v55 = vadd.f32 %v838_v54, %v2722_v7  ;;  %v2012_v56 = vpop.f32.mrb[13].mxu1  ;;  %v844_v60 = vadd.f32 %v838_v54, %v796_v59 }
0x1451   : > { %v841_v57 = vpop.f32.mrb[14].mxu1 }
0x1452   : > { %853 = vrot.lane.b32.xlu0 %v851_v55, %s2493_s19  ;;  %v2013_v58 = vpop.f32.mrb[15].mxu1  ;;  %v1853_v61 = vmul.f32 -1.442695, %v844_v60 }
0x1454   : > { %2239 = vpow2.f32 %v1853_v61 }
0x145e   : > { %v2240_v62 = vpop.eup %2239 }
0x145f   : > { %v848_v63 = vadd.f32 1.0, %v2240_v62 }
0x1461   : > { %2241 = vrcp.f32 %v848_v63 }
0x146b   : > { %v2242_v0 = vpop.eup %2241 }
0x146c   : > { %v863_v10 = vsub.f32 1.0, %v2242_v0  ;;  %v869_v12 = vmul.f32 %v2242_v0, %v793_v51 }
0x14c4   : > { %v854_v4 = vpop.permute.xlu0 %853 }
0x14c5   : > { %v856_v5 = vmul.f32 %v2242_v0, %v854_v4 }
0x14c7   : > { %858 = vrot.lane.b32.xlu1 %v856_v5, %s2493_s19 }
0x1539   : > { %v859_v6 = vpop.permute.xlu1 %858 }
0x153a   : > { %v861_v8 = vadd.f32 %v859_v6, %v796_v59 }
0x153c   : > { %2243 = vtanh.f32 %v861_v8 }
0x1546   : > { %v2244_v9 = vpop.eup %2243 }
0x1547   : > { %865 = vrot.lane.b32.xlu0 %v2244_v9, %s2495_s21  ;;  %v1860_v9 = vld [vmem:[%s2685_s10 + $0x28] sm:$0xff]  }
0x15b9   : > { %v866_v11 = vpop.permute.xlu0 %865 }
0x15ba   : > { %v868_v13 = vmul.f32 %v866_v11, %v863_v10  ;;  %v1027_v10 = vunpack.c.l.bf16 %v1860_v9 }
0x15bc   : > { %v870_v14 = vadd.f32 %v869_v12, %v868_v13 }
0x15be   : > { %v874_v15 = vpack.c.bf16 %v870_v14, %v870_v14 }
0x15c0   : > { %876 = vrot.lane.b32.xlu1 %v874_v15, %s2495_s21 }
0x1632   : > { %v877_v16 = vpop.permute.xlu1 %876 }
0x1633   : > { %2019 = vmatmul.mubr.msk.bf16.vlgmr.msra.gmra.mrb[16].mxu0 %vm252_vm2, %v877_v16 }
0x1634   : > { %2031 = vmatpush3.bf16.msra.mxu0 %v2696_v1  ;;  %2034 = vmatprep.mubr.msk.bf16.mxu0 %vm2492_vm1, %v2491_v2 }
0x1635   : > { %2032 = vmatprep.subr.bf16.mxu0 %v2491_v2 }
0x1638   : > { %2033 = vmatpush3.bf16.msra.mxu0 %v2701_v3 }
0x1639   : > { %2046 = vmatprep.subr.bf16.mxu0 %v2491_v2 }
0x1706   : > { %v915_v17 = vpop.f32.mrb[16].mxu0 }
0x1707   : > { %v928_v18 = vadd.f32 %v915_v17, %v2722_v7  ;;  %v2020_v19 = vpop.f32.mrb[17].mxu0  ;;  %v921_v24 = vadd.f32 %v915_v17, %v873_v23 }
0x1708   : > { %v918_v20 = vpop.f32.mrb[18].mxu0 }
0x1709   : > { %930 = vrot.lane.b32.xlu0 %v928_v18, %s2493_s19  ;;  %v2021_v21 = vpop.f32.mrb[19].mxu0  ;;  %v1856_v25 = vmul.f32 -1.442695, %v921_v24 }
0x170b   : > { %2245 = vpow2.f32 %v1856_v25 }
0x1715   : > { %v2246_v26 = vpop.eup %2245 }
0x1716   : > { %v925_v27 = vadd.f32 1.0, %v2246_v26 }
0x1718   : > { %2247 = vrcp.f32 %v925_v27 }
0x1722   : > { %v2248_v28 = vpop.eup %2247 }
0x1723   : > { %v940_v34 = vsub.f32 1.0, %v2248_v28  ;;  %v946_v36 = vmul.f32 %v2248_v28, %v870_v14 }
0x177b   : > { %v931_v29 = vpop.permute.xlu0 %930 }
0x177c   : > { %v933_v30 = vmul.f32 %v2248_v28, %v931_v29 }
0x177e   : > { %935 = vrot.lane.b32.xlu1 %v933_v30, %s2493_s19 }
0x17f0   : > { %v936_v31 = vpop.permute.xlu1 %935 }
0x17f1   : > { %v938_v32 = vadd.f32 %v936_v31, %v873_v23 }
0x17f3   : > { %2249 = vtanh.f32 %v938_v32 }
0x17fd   : > { %v2250_v33 = vpop.eup %2249 }
0x17fe   : > { %942 = vrot.lane.b32.xlu0 %v2250_v33, %s2495_s21  ;;  %v1104_v33 = vunpack.c.h.bf16 %v1860_v9 }
0x1870   : > { %v943_v35 = vpop.permute.xlu0 %942 }
0x1871   : > { %v945_v37 = vmul.f32 %v943_v35, %v940_v34 }
0x1873   : > { %v947_v38 = vadd.f32 %v946_v36, %v945_v37 }
0x1875   : > { %v951_v39 = vpack.c.bf16 %v947_v38, %v947_v38 }
0x1877   : > { %953 = vrot.lane.b32.xlu1 %v951_v39, %s2495_s21 }
0x18e9   : > { %v954_v40 = vpop.permute.xlu1 %953 }
0x18ea   : > { %2027 = vmatmul.mubr.msk.bf16.vlgmr.msra.gmra.mrb[16].mxu1 %vm252_vm2, %v954_v40 }
0x18eb   : > { %2039 = vmatpush3.bf16.msra.mxu1 %v2696_v1  ;;  %2042 = vmatprep.mubr.msk.bf16.mxu1 %vm2492_vm1, %v2491_v2 }
0x18ec   : > { %2040 = vmatprep.subr.bf16.mxu1 %v2491_v2 }
0x18ef   : > { %2041 = vmatpush3.bf16.msra.mxu1 %v2701_v3 }
0x18f0   : > { %2054 = vmatprep.subr.bf16.mxu1 %v2491_v2 }
0x19bd   : > { %v992_v41 = vpop.f32.mrb[16].mxu1 }
0x19be   : > { %v1005_v42 = vadd.f32 %v992_v41, %v2722_v7  ;;  %v2028_v43 = vpop.f32.mrb[17].mxu1  ;;  %v998_v47 = vadd.f32 %v992_v41, %v950_v46 }
0x19bf   : > { %v995_v44 = vpop.f32.mrb[18].mxu1 }
0x19c0   : > { %1007 = vrot.lane.b32.xlu0 %v1005_v42, %s2493_s19  ;;  %v2029_v45 = vpop.f32.mrb[19].mxu1  ;;  %v1859_v48 = vmul.f32 -1.442695, %v998_v47 }
0x19c2   : > { %2251 = vpow2.f32 %v1859_v48 }
0x19cc   : > { %v2252_v49 = vpop.eup %2251 }
0x19cd   : > { %v1002_v50 = vadd.f32 1.0, %v2252_v49 }
0x19cf   : > { %2253 = vrcp.f32 %v1002_v50 }
0x19d9   : > { %v2254_v51 = vpop.eup %2253 }
0x19da   : > { %v1017_v57 = vsub.f32 1.0, %v2254_v51  ;;  %v1023_v59 = vmul.f32 %v2254_v51, %v947_v38 }
0x1a32   : > { %v1008_v52 = vpop.permute.xlu0 %1007 }
0x1a33   : > { %v1010_v53 = vmul.f32 %v2254_v51, %v1008_v52 }
0x1a35   : > { %1012 = vrot.lane.b32.xlu1 %v1010_v53, %s2493_s19 }
0x1aa7   : > { %v1013_v54 = vpop.permute.xlu1 %1012 }
0x1aa8   : > { %v1015_v55 = vadd.f32 %v1013_v54, %v950_v46 }
0x1aaa   : > { %2255 = vtanh.f32 %v1015_v55 }
0x1ab4   : > { %v2256_v56 = vpop.eup %2255 }
0x1ab5   : > { %1019 = vrot.lane.b32.xlu0 %v2256_v56, %s2495_s21  ;;  %v1866_v56 = vld [vmem:[%s2685_s10 + $0x30] sm:$0xff]  }
0x1b27   : > { %v1020_v58 = vpop.permute.xlu0 %1019 }
0x1b28   : > { %v1022_v60 = vmul.f32 %v1020_v58, %v1017_v57  ;;  %v1181_v57 = vunpack.c.l.bf16 %v1866_v56 }
0x1b2a   : > { %v1024_v61 = vadd.f32 %v1023_v59, %v1022_v60 }
0x1b2c   : > { %v1028_v62 = vpack.c.bf16 %v1024_v61, %v1024_v61 }
0x1b2e   : > { %1030 = vrot.lane.b32.xlu1 %v1028_v62, %s2495_s21 }
0x1ba0   : > { %v1031_v63 = vpop.permute.xlu1 %1030 }
0x1ba1   : > { %2035 = vmatmul.mubr.msk.bf16.vlgmr.msra.gmra.mrb[20].mxu0 %vm252_vm2, %v1031_v63 }
0x1ba2   : > { %2047 = vmatpush3.bf16.msra.mxu0 %v2696_v1  ;;  %2050 = vmatprep.mubr.msk.bf16.mxu0 %vm2492_vm1, %v2491_v2 }
0x1ba3   : > { %2048 = vmatprep.subr.bf16.mxu0 %v2491_v2 }
0x1ba6   : > { %2049 = vmatpush3.bf16.msra.mxu0 %v2701_v3 }
0x1ba7   : > { %2062 = vmatprep.subr.bf16.mxu0 %v2491_v2 }
0x1c74   : > { %v1069_v0 = vpop.f32.mrb[20].mxu0 }
0x1c75   : > { %v1082_v4 = vadd.f32 %v1069_v0, %v2722_v7  ;;  %v2036_v5 = vpop.f32.mrb[21].mxu0  ;;  %v1075_v11 = vadd.f32 %v1069_v0, %v1027_v10 }
0x1c76   : > { %v1072_v6 = vpop.f32.mrb[22].mxu0 }
0x1c77   : > { %1084 = vrot.lane.b32.xlu0 %v1082_v4, %s2493_s19  ;;  %v2037_v8 = vpop.f32.mrb[23].mxu0  ;;  %v1862_v12 = vmul.f32 -1.442695, %v1075_v11 }
0x1c79   : > { %2257 = vpow2.f32 %v1862_v12 }
0x1c83   : > { %v2258_v13 = vpop.eup %2257 }
0x1c84   : > { %v1079_v14 = vadd.f32 1.0, %v2258_v13 }
0x1c86   : > { %2259 = vrcp.f32 %v1079_v14 }
0x1c90   : > { %v2260_v15 = vpop.eup %2259 }
0x1c91   : > { %v1094_v21 = vsub.f32 1.0, %v2260_v15  ;;  %v1100_v23 = vmul.f32 %v2260_v15, %v1024_v61 }
0x1ce9   : > { %v1085_v16 = vpop.permute.xlu0 %1084 }
0x1cea   : > { %v1087_v17 = vmul.f32 %v2260_v15, %v1085_v16 }
0x1cec   : > { %1089 = vrot.lane.b32.xlu1 %v1087_v17, %s2493_s19 }
0x1d5e   : > { %v1090_v18 = vpop.permute.xlu1 %1089 }
0x1d5f   : > { %v1092_v19 = vadd.f32 %v1090_v18, %v1027_v10 }
0x1d61   : > { %2261 = vtanh.f32 %v1092_v19 }
0x1d6b   : > { %v2262_v20 = vpop.eup %2261 }
0x1d6c   : > { %1096 = vrot.lane.b32.xlu0 %v2262_v20, %s2495_s21  ;;  %v1258_v20 = vunpack.c.h.bf16 %v1866_v56 }
0x1dde   : > { %v1097_v22 = vpop.permute.xlu0 %1096 }
0x1ddf   : > { %v1099_v24 = vmul.f32 %v1097_v22, %v1094_v21 }
0x1de1   : > { %v1101_v25 = vadd.f32 %v1100_v23, %v1099_v24 }
0x1de3   : > { %v1105_v26 = vpack.c.bf16 %v1101_v25, %v1101_v25 }
0x1de5   : > { %1107 = vrot.lane.b32.xlu1 %v1105_v26, %s2495_s21 }
0x1e57   : > { %v1108_v27 = vpop.permute.xlu1 %1107 }
0x1e58   : > { %2043 = vmatmul.mubr.msk.bf16.vlgmr.msra.gmra.mrb[20].mxu1 %vm252_vm2, %v1108_v27 }
0x1e59   : > { %2055 = vmatpush3.bf16.msra.mxu1 %v2696_v1  ;;  %2058 = vmatprep.mubr.msk.bf16.mxu1 %vm2492_vm1, %v2491_v2 }
0x1e5a   : > { %2056 = vmatprep.subr.bf16.mxu1 %v2491_v2 }
0x1e5d   : > { %2057 = vmatpush3.bf16.msra.mxu1 %v2701_v3 }
0x1e5e   : > { %2070 = vmatprep.subr.bf16.mxu1 %v2491_v2 }
0x1f2b   : > { %v1146_v28 = vpop.f32.mrb[20].mxu1 }
0x1f2c   : > { %v1159_v29 = vadd.f32 %v1146_v28, %v2722_v7  ;;  %v2044_v30 = vpop.f32.mrb[21].mxu1  ;;  %v1152_v34 = vadd.f32 %v1146_v28, %v1104_v33 }
0x1f2d   : > { %v1149_v31 = vpop.f32.mrb[22].mxu1 }
0x1f2e   : > { %1161 = vrot.lane.b32.xlu0 %v1159_v29, %s2493_s19  ;;  %v2045_v32 = vpop.f32.mrb[23].mxu1  ;;  %v1865_v35 = vmul.f32 -1.442695, %v1152_v34 }
0x1f30   : > { %2263 = vpow2.f32 %v1865_v35 }
0x1f3a   : > { %v2264_v36 = vpop.eup %2263 }
0x1f3b   : > { %v1156_v37 = vadd.f32 1.0, %v2264_v36  ;;  %v2893_v36 = vld [vmem:[#allocation6] sm:$0xff]  }
0x1f3d   : > { %2265 = vrcp.f32 %v1156_v37  ;;  %v2899_v37 = vld [vmem:[#allocation6 + $0x8] sm:$0xff]  }
0x1f47   : > { %v2266_v38 = vpop.eup %2265 }
0x1f48   : > { %v1171_v44 = vsub.f32 1.0, %v2266_v38  ;;  %v1177_v46 = vmul.f32 %v2266_v38, %v1101_v25 }
0x1fa0   : > { %v1162_v39 = vpop.permute.xlu0 %1161 }
0x1fa1   : > { %v1164_v40 = vmul.f32 %v2266_v38, %v1162_v39 }
0x1fa3   : > { %1166 = vrot.lane.b32.xlu1 %v1164_v40, %s2493_s19 }
0x2015   : > { %v1167_v41 = vpop.permute.xlu1 %1166 }
0x2016   : > { %v1169_v42 = vadd.f32 %v1167_v41, %v1104_v33 }
0x2018   : > { %2267 = vtanh.f32 %v1169_v42 }
0x2022   : > { %v2268_v43 = vpop.eup %2267 }
0x2023   : > { %1173 = vrot.lane.b32.xlu0 %v2268_v43, %s2495_s21  ;;  %v1872_v43 = vld [vmem:[%s2685_s10 + $0x38] sm:$0xff]  }
0x2095   : > { %v1174_v45 = vpop.permute.xlu0 %1173 }
0x2096   : > { %v1176_v47 = vmul.f32 %v1174_v45, %v1171_v44  ;;  %v1335_v44 = vunpack.c.l.bf16 %v1872_v43 }
0x2098   : > { %v1178_v48 = vadd.f32 %v1177_v46, %v1176_v47 }
0x209a   : > { %v1182_v49 = vpack.c.bf16 %v1178_v48, %v1178_v48 }
0x209c   : > { %1184 = vrot.lane.b32.xlu1 %v1182_v49, %s2495_s21 }
0x210e   : > { %v1185_v50 = vpop.permute.xlu1 %1184 }
0x210f   : > { %2051 = vmatmul.mubr.msk.bf16.vlgmr.msra.gmra.mrb[24].mxu0 %vm252_vm2, %v1185_v50 }
0x2110   : > { %2063 = vmatpush3.bf16.msra.mxu0 %v2696_v1  ;;  %2066 = vmatprep.mubr.msk.bf16.mxu0 %vm2492_vm1, %v2491_v2 }
0x2111   : > { %2064 = vmatprep.subr.bf16.mxu0 %v2491_v2 }
0x2114   : > { %2065 = vmatpush3.bf16.msra.mxu0 %v2701_v3 }
0x2115   : > { %2078 = vmatprep.subr.bf16.mxu0 %v2491_v2 }
0x21e2   : > { %v1223_v51 = vpop.f32.mrb[24].mxu0 }
0x21e3   : > { %v1236_v52 = vadd.f32 %v1223_v51, %v2722_v7  ;;  %v2052_v53 = vpop.f32.mrb[25].mxu0  ;;  %v1229_v58 = vadd.f32 %v1223_v51, %v1181_v57 }
0x21e4   : > { %v1226_v54 = vpop.f32.mrb[26].mxu0 }
0x21e5   : > { %1238 = vrot.lane.b32.xlu0 %v1236_v52, %s2493_s19  ;;  %v2053_v55 = vpop.f32.mrb[27].mxu0  ;;  %v1868_v59 = vmul.f32 -1.442695, %v1229_v58 }
0x21e7   : > { %2269 = vpow2.f32 %v1868_v59 }
0x21f1   : > { %v2270_v60 = vpop.eup %2269 }
0x21f2   : > { %v1233_v61 = vadd.f32 1.0, %v2270_v60 }
0x21f4   : > { %2271 = vrcp.f32 %v1233_v61 }
0x21fe   : > { %v2272_v62 = vpop.eup %2271 }
0x21ff   : > { %v1248_v8 = vsub.f32 1.0, %v2272_v62  ;;  %v1254_v10 = vmul.f32 %v2272_v62, %v1178_v48 }
0x2257   : > { %v1239_v63 = vpop.permute.xlu0 %1238 }
0x2258   : > { %v1241_v0 = vmul.f32 %v2272_v62, %v1239_v63 }
0x225a   : > { %1243 = vrot.lane.b32.xlu1 %v1241_v0, %s2493_s19 }
0x22cc   : > { %v1244_v4 = vpop.permute.xlu1 %1243 }
0x22cd   : > { %v1246_v5 = vadd.f32 %v1244_v4, %v1181_v57 }
0x22cf   : > { %2273 = vtanh.f32 %v1246_v5 }
0x22d9   : > { %v2274_v6 = vpop.eup %2273 }
0x22da   : > { %1250 = vrot.lane.b32.xlu0 %v2274_v6, %s2495_s21  ;;  %v1412_v6 = vunpack.c.h.bf16 %v1872_v43 }
0x234c   : > { %v1251_v9 = vpop.permute.xlu0 %1250 }
0x234d   : > { %v1253_v11 = vmul.f32 %v1251_v9, %v1248_v8 }
0x234f   : > { %v1255_v12 = vadd.f32 %v1254_v10, %v1253_v11 }
0x2351   : > { %v1259_v13 = vpack.c.bf16 %v1255_v12, %v1255_v12 }
0x2353   : > { %1261 = vrot.lane.b32.xlu1 %v1259_v13, %s2495_s21 }
0x23c5   : > { %v1262_v14 = vpop.permute.xlu1 %1261 }
0x23c6   : > { %2059 = vmatmul.mubr.msk.bf16.vlgmr.msra.gmra.mrb[24].mxu1 %vm252_vm2, %v1262_v14 }
0x23c7   : > { %2071 = vmatpush3.bf16.msra.mxu1 %v2696_v1  ;;  %2074 = vmatprep.mubr.msk.bf16.mxu1 %vm2492_vm1, %v2491_v2 }
0x23c8   : > { %2072 = vmatprep.subr.bf16.mxu1 %v2491_v2 }
0x23cb   : > { %2073 = vmatpush3.bf16.msra.mxu1 %v2701_v3 }
0x23cc   : > { %2086 = vmatprep.subr.bf16.mxu1 %v2491_v2 }
0x2499   : > { %v1300_v15 = vpop.f32.mrb[24].mxu1 }
0x249a   : > { %v1313_v16 = vadd.f32 %v1300_v15, %v2722_v7  ;;  %v2060_v17 = vpop.f32.mrb[25].mxu1  ;;  %v1306_v21 = vadd.f32 %v1300_v15, %v1258_v20 }
0x249b   : > { %v1303_v18 = vpop.f32.mrb[26].mxu1 }
0x249c   : > { %1315 = vrot.lane.b32.xlu0 %v1313_v16, %s2493_s19  ;;  %v2061_v19 = vpop.f32.mrb[27].mxu1  ;;  %v1871_v1 = vmul.f32 -1.442695, %v1306_v21 }
0x249e   : > { %2275 = vpow2.f32 %v1871_v1 }
0x24a8   : > { %v2276_v22 = vpop.eup %2275 }
0x24a9   : > { %v1310_v23 = vadd.f32 1.0, %v2276_v22 }
0x24ab   : > { %2277 = vrcp.f32 %v1310_v23 }
0x24b5   : > { %v2278_v24 = vpop.eup %2277 }
0x24b6   : > { %v1325_v29 = vsub.f32 1.0, %v2278_v24  ;;  %v1331_v31 = vmul.f32 %v2278_v24, %v1255_v12 }
0x250e   : > { %v1316_v25 = vpop.permute.xlu0 %1315 }
0x250f   : > { %v1318_v3 = vmul.f32 %v2278_v24, %v1316_v25 }
0x2511   : > { %1320 = vrot.lane.b32.xlu1 %v1318_v3, %s2493_s19 }
0x2583   : > { %v1321_v26 = vpop.permute.xlu1 %1320 }
0x2584   : > { %v1323_v27 = vadd.f32 %v1321_v26, %v1258_v20 }
0x2586   : > { %2279 = vtanh.f32 %v1323_v27 }
0x2590   : > { %v2280_v28 = vpop.eup %2279 }
0x2591   : > { %1327 = vrot.lane.b32.xlu0 %v2280_v28, %s2495_s21  ;;  %v1878_v28 = vld [vmem:[%s2685_s10 + $0x40] sm:$0xff]  }
0x2603   : > { %v1328_v30 = vpop.permute.xlu0 %1327 }
0x2604   : > { %v1330_v32 = vmul.f32 %v1328_v30, %v1325_v29  ;;  %v1489_v29 = vunpack.c.l.bf16 %v1878_v28 }
0x2606   : > { %v1332_v33 = vadd.f32 %v1331_v31, %v1330_v32 }
0x2608   : > { %v1336_v34 = vpack.c.bf16 %v1332_v33, %v1332_v33 }
0x260a   : > { %1338 = vrot.lane.b32.xlu1 %v1336_v34, %s2495_s21 }
0x267c   : > { %v1339_v35 = vpop.permute.xlu1 %1338 }
0x267d   : > { %2067 = vmatmul.mubr.msk.bf16.vlgmr.msra.gmra.mrb[28].mxu0 %vm252_vm2, %v1339_v35 }
0x267e   : > { %2079 = vmatpush3.bf16.msra.mxu0 %v2893_v36  ;;  %2082 = vmatprep.mubr.msk.bf16.mxu0 %vm2492_vm1, %v2491_v2 }
0x267f   : > { %2080 = vmatprep.subr.bf16.mxu0 %v2491_v2 }
0x2682   : > { %2081 = vmatpush3.bf16.msra.mxu0 %v2899_v37 }
0x2683   : > { %2094 = vmatprep.subr.bf16.mxu0 %v2491_v2 }
0x2750   : > { %v1377_v38 = vpop.f32.mrb[28].mxu0 }
0x2751   : > { %v1390_v39 = vadd.f32 %v1377_v38, %v2722_v7  ;;  %v2068_v40 = vpop.f32.mrb[29].mxu0  ;;  %v1383_v45 = vadd.f32 %v1377_v38, %v1335_v44 }
0x2752   : > { %v1380_v41 = vpop.f32.mrb[30].mxu0 }
0x2753   : > { %1392 = vrot.lane.b32.xlu0 %v1390_v39, %s2493_s19  ;;  %v2069_v42 = vpop.f32.mrb[31].mxu0  ;;  %v1874_v46 = vmul.f32 -1.442695, %v1383_v45 }
0x2755   : > { %2281 = vpow2.f32 %v1874_v46 }
0x275f   : > { %v2282_v47 = vpop.eup %2281 }
0x2760   : > { %v1387_v48 = vadd.f32 1.0, %v2282_v47 }
0x2762   : > { %2283 = vrcp.f32 %v1387_v48 }
0x276c   : > { %v2284_v49 = vpop.eup %2283 }
0x276d   : > { %v1402_v55 = vsub.f32 1.0, %v2284_v49  ;;  %v1408_v57 = vmul.f32 %v2284_v49, %v1332_v33 }
0x27c5   : > { %v1393_v50 = vpop.permute.xlu0 %1392 }
0x27c6   : > { %v1395_v51 = vmul.f32 %v2284_v49, %v1393_v50 }
0x27c8   : > { %1397 = vrot.lane.b32.xlu1 %v1395_v51, %s2493_s19  ;;  %v1566_v51 = vunpack.c.h.bf16 %v1878_v28 }
0x283a   : > { %v1398_v52 = vpop.permute.xlu1 %1397 }
0x283b   : > { %v1400_v53 = vadd.f32 %v1398_v52, %v1335_v44 }
0x283d   : > { %2285 = vtanh.f32 %v1400_v53 }
0x2847   : > { %v2286_v54 = vpop.eup %2285 }
0x2848   : > { %1404 = vrot.lane.b32.xlu0 %v2286_v54, %s2495_s21 }
0x28ba   : > { %v1405_v56 = vpop.permute.xlu0 %1404 }
0x28bb   : > { %v1407_v58 = vmul.f32 %v1405_v56, %v1402_v55 }
0x28bd   : > { %v1409_v59 = vadd.f32 %v1408_v57, %v1407_v58 }
0x28bf   : > { %v1413_v60 = vpack.c.bf16 %v1409_v59, %v1409_v59 }
0x28c1   : > { %1415 = vrot.lane.b32.xlu1 %v1413_v60, %s2495_s21 }
0x2933   : > { %v1416_v61 = vpop.permute.xlu1 %1415 }
0x2934   : > { %2075 = vmatmul.mubr.msk.bf16.vlgmr.msra.gmra.mrb[28].mxu1 %vm252_vm2, %v1416_v61 }
0x2935   : > { %2087 = vmatpush3.bf16.msra.mxu1 %v2893_v36  ;;  %2090 = vmatprep.mubr.msk.bf16.mxu1 %vm2492_vm1, %v2491_v2 }
0x2936   : > { %2088 = vmatprep.subr.bf16.mxu1 %v2491_v2 }
0x2939   : > { %2089 = vmatpush3.bf16.msra.mxu1 %v2899_v37 }
0x2a07   : > { %v1454_v62 = vpop.f32.mrb[28].mxu1 }
0x2a08   : > { %v1467_v63 = vadd.f32 %v1454_v62, %v2722_v7  ;;  %v2076_v0 = vpop.f32.mrb[29].mxu1  ;;  %v1460_v8 = vadd.f32 %v1454_v62, %v1412_v6 }
0x2a09   : > { %v1457_v4 = vpop.f32.mrb[30].mxu1 }
0x2a0a   : > { %1469 = vrot.lane.b32.xlu0 %v1467_v63, %s2493_s19  ;;  %v2077_v5 = vpop.f32.mrb[31].mxu1  ;;  %v1877_v9 = vmul.f32 -1.442695, %v1460_v8 }
0x2a0c   : > { %2287 = vpow2.f32 %v1877_v9 }
0x2a16   : > { %v2288_v10 = vpop.eup %2287 }
0x2a17   : > { %v1464_v11 = vadd.f32 1.0, %v2288_v10 }
0x2a19   : > { %2289 = vrcp.f32 %v1464_v11 }
0x2a23   : > { %v2290_v12 = vpop.eup %2289 }
0x2a24   : > { %v1479_v18 = vsub.f32 1.0, %v2290_v12  ;;  %v1485_v20 = vmul.f32 %v2290_v12, %v1409_v59 }
0x2a7c   : > { %v1470_v13 = vpop.permute.xlu0 %1469 }
0x2a7d   : > { %v1472_v14 = vmul.f32 %v2290_v12, %v1470_v13 }
0x2a7f   : > { %1474 = vrot.lane.b32.xlu1 %v1472_v14, %s2493_s19  ;;  %v1884_v14 = vld [vmem:[%s2685_s10 + $0x48] sm:$0xf] }
0x2af1   : > { %v1475_v15 = vpop.permute.xlu1 %1474 }
0x2af2   : > { %v1477_v16 = vadd.f32 %v1475_v15, %v1412_v6  ;;  %v1643_v15 = vunpack.c.l.bf16 %v1884_v14 }
0x2af4   : > { %2291 = vtanh.f32 %v1477_v16 }
0x2afe   : > { %v2292_v17 = vpop.eup %2291 }
0x2aff   : > { %1481 = vrot.lane.b32.xlu0 %v2292_v17, %s2495_s21 }
0x2b71   : > { %v1482_v19 = vpop.permute.xlu0 %1481 }
0x2b72   : > { %v1484_v21 = vmul.f32 %v1482_v19, %v1479_v18 }
0x2b74   : > { %v1486_v1 = vadd.f32 %v1485_v20, %v1484_v21 }
0x2b76   : > { %v1490_v22 = vpack.c.bf16 %v1486_v1, %v1486_v1 }
0x2b78   : > { %1492 = vrot.lane.b32.xlu1 %v1490_v22, %s2495_s21 }
0x2bea   : > { %v1493_v23 = vpop.permute.xlu1 %1492 }
0x2beb   : > { %2083 = vmatmul.mubr.msk.bf16.vlgmr.msra.gmra.mrb[32].mxu0 %vm252_vm2, %v1493_v23 }
0x2bec   : > { %2095 = vmatpush3.bf16.msra.mxu0 %v2893_v36  ;;  %2098 = vmatprep.mubr.msk.bf16.mxu0 %vm2492_vm1, %v2491_v2 }
0x2bed   : > { %2096 = vmatprep.subr.bf16.mxu0 %v2491_v2 }
0x2bf0   : > { %2097 = vmatpush3.bf16.msra.mxu0 %v2899_v37 }
0x2cbe   : > { %v1531_v24 = vpop.f32.mrb[32].mxu0 }
0x2cbf   : > { %v1544_v25 = vadd.f32 %v1531_v24, %v2722_v7  ;;  %v2084_v3 = vpop.f32.mrb[33].mxu0  ;;  %v1537_v30 = vadd.f32 %v1531_v24, %v1489_v29 }
0x2cc0   : > { %v1534_v26 = vpop.f32.mrb[34].mxu0 }
0x2cc1   : > { %1546 = vrot.lane.b32.xlu0 %v1544_v25, %s2493_s19  ;;  %v2085_v27 = vpop.f32.mrb[35].mxu0  ;;  %v1880_v31 = vmul.f32 -1.442695, %v1537_v30 }
0x2cc3   : > { %2293 = vpow2.f32 %v1880_v31 }
0x2ccd   : > { %v2294_v32 = vpop.eup %2293 }
0x2cce   : > { %v1541_v33 = vadd.f32 1.0, %v2294_v32 }
0x2cd0   : > { %2295 = vrcp.f32 %v1541_v33 }
0x2cda   : > { %v2296_v34 = vpop.eup %2295 }
0x2cdb   : > { %v1556_v39 = vsub.f32 1.0, %v2296_v34  ;;  %v1562_v41 = vmul.f32 %v2296_v34, %v1486_v1 }
0x2d33   : > { %v1547_v2 = vpop.permute.xlu0 %1546 }
0x2d34   : > { %v1549_v35 = vmul.f32 %v2296_v34, %v1547_v2 }
0x2d36   : > { %1551 = vrot.lane.b32.xlu1 %v1549_v35, %s2493_s19 }
0x2da8   : > { %v1552_v36 = vpop.permute.xlu1 %1551 }
0x2da9   : > { %v1554_v37 = vadd.f32 %v1552_v36, %v1489_v29 }
0x2dab   : > { %2297 = vtanh.f32 %v1554_v37 }
0x2db5   : > { %v2298_v38 = vpop.eup %2297 }
0x2db6   : > { %1558 = vrot.lane.b32.xlu0 %v2298_v38, %s2495_s21 }
0x2e28   : > { %v1559_v40 = vpop.permute.xlu0 %1558 }
0x2e29   : > { %v1561_v42 = vmul.f32 %v1559_v40, %v1556_v39 }
0x2e2b   : > { %v1563_v43 = vadd.f32 %v1562_v41, %v1561_v42 }
0x2e2d   : > { %v1567_v44 = vpack.c.bf16 %v1563_v43, %v1563_v43 }
0x2e2f   : > { %1569 = vrot.lane.b32.xlu1 %v1567_v44, %s2495_s21 }
0x2ea1   : > { %v1570_v45 = vpop.permute.xlu1 %1569 }
0x2ea2   : > { %2091 = vmatmul.mubr.msk.bf16.vlgmr.msra.gmra.mrb[32].mxu1 %vm252_vm2, %v1570_v45 }
0x2f75   : > { %v1608_v46 = vpop.f32.mrb[32].mxu1 }
0x2f76   : > { %v1621_v47 = vadd.f32 %v1608_v46, %v2722_v7  ;;  %v2092_v48 = vpop.f32.mrb[33].mxu1  ;;  %v1614_v52 = vadd.f32 %v1608_v46, %v1566_v51 }
0x2f77   : > { %v1611_v49 = vpop.f32.mrb[34].mxu1 }
0x2f78   : > { %1623 = vrot.lane.b32.xlu0 %v1621_v47, %s2493_s19  ;;  %v2093_v50 = vpop.f32.mrb[35].mxu1  ;;  %v1883_v53 = vmul.f32 -1.442695, %v1614_v52 }
0x2f7a   : > { %2299 = vpow2.f32 %v1883_v53 }
0x2f84   : > { %v2300_v54 = vpop.eup %2299 }
0x2f85   : > { %v1618_v55 = vadd.f32 1.0, %v2300_v54 }
0x2f87   : > { %2301 = vrcp.f32 %v1618_v55 }
0x2f91   : > { %v2302_v56 = vpop.eup %2301 }
0x2f92   : > { %v1633_v62 = vsub.f32 1.0, %v2302_v56  ;;  %v1639_v0 = vmul.f32 %v2302_v56, %v1563_v43 }
0x2fea   : > { %v1624_v57 = vpop.permute.xlu0 %1623 }
0x2feb   : > { %v1626_v58 = vmul.f32 %v2302_v56, %v1624_v57 }
0x2fed   : > { %1628 = vrot.lane.b32.xlu1 %v1626_v58, %s2493_s19 }
0x305f   : > { %v1629_v59 = vpop.permute.xlu1 %1628 }
0x3060   : > { %v1631_v60 = vadd.f32 %v1629_v59, %v1566_v51 }
0x3062   : > { %2303 = vtanh.f32 %v1631_v60 }
0x306c   : > { %v2304_v61 = vpop.eup %2303 }
0x306d   : > { %1635 = vrot.lane.b32.xlu0 %v2304_v61, %s2495_s21 }
0x30df   : > { %v1636_v63 = vpop.permute.xlu0 %1635 }
0x30e0   : > { %v1638_v4 = vmul.f32 %v1636_v63, %v1633_v62 }
0x30e2   : > { %v1640_v5 = vadd.f32 %v1639_v0, %v1638_v4 }
0x30e4   : > { %v1644_v6 = vpack.c.bf16 %v1640_v5, %v1640_v5 }
0x30e6   : > { %1646 = vrot.lane.b32.xlu1 %v1644_v6, %s2495_s21 }
0x3158   : > { %v1647_v8 = vpop.permute.xlu1 %1646 }
0x3159   : > { %2099 = vmatmul.mubr.msk.bf16.vlgmr.msra.gmra.mrb[36].mxu0 %vm252_vm2, %v1647_v8 }
0x322c   : > { %v1685_v9 = vpop.f32.mrb[36].mxu0 }
0x322d   : > { %v1698_v10 = vadd.f32 %v1685_v9, %v2722_v7  ;;  %v2100_v11 = vpop.f32.mrb[37].mxu0  ;;  %v1691_v16 = vadd.f32 %v1685_v9, %v1643_v15 }
0x322e   : > { %v1688_v12 = vpop.f32.mrb[38].mxu0 }
0x322f   : > { %1700 = vrot.lane.b32.xlu0 %v1698_v10, %s2493_s19  ;;  %v2101_v13 = vpop.f32.mrb[39].mxu0  ;;  %v1886_v17 = vmul.f32 -1.442695, %v1691_v16 }
0x3231   : > { %2305 = vpow2.f32 %v1886_v17 }
0x323b   : > { %v2306_v18 = vpop.eup %2305 }
0x323c   : > { %v1695_v19 = vadd.f32 1.0, %v2306_v18 }
0x323e   : > { %2307 = vrcp.f32 %v1695_v19 }
0x3248   : > { %v2308_v20 = vpop.eup %2307 }
0x3249   : > { %v1710_v24 = vsub.f32 1.0, %v2308_v20  ;;  %v1716_v3 = vmul.f32 %v2308_v20, %v1640_v5 }
0x32a1   : > { %v1701_v21 = vpop.permute.xlu0 %1700 }
0x32a2   : > { %v1703_v1 = vmul.f32 %v2308_v20, %v1701_v21 }
0x32a4   : > { %1705 = vrot.lane.b32.xlu1 %v1703_v1, %s2493_s19 }
0x3316   : > { %v1706_v22 = vpop.permute.xlu1 %1705 }
0x3317   : > { %v1708_v7 = vadd.f32 %v1706_v22, %v1643_v15 }
0x3319   : > { %2309 = vtanh.f32 %v1708_v7 }
0x3323   : > { %v2310_v23 = vpop.eup %2309 }
0x3324   : > { %1712 = vrot.lane.b32.xlu0 %v2310_v23, %s2495_s21 }
0x3396   : > { %v1713_v25 = vpop.permute.xlu0 %1712 }
0x3397   : > { %v1715_v26 = vmul.f32 %v1713_v25, %v1710_v24 }
0x3399   : > { %v1717_v27 = vadd.f32 %v1716_v3, %v1715_v26 }
0x339b   : > { %1719 = vrot.lane.b32.xlu1 %v1717_v27, %s2495_s21 }
0x3408   : > { %1726 = sbr.rel (%p1887_p9) target bundleno = 13327 (0x340f), region = 52 }
0x340d   : > { %v1720_v28 = vpop.permute.xlu1 %1719 }
0x340e   : > { %1722 = vst.msk [vmem:[#allocation2] sm:$0xff] %vm252_vm2, %v1720_v28  ;;  %1727 = vst.msk [vmem:[#allocation9] sm:$0xff] (!%p1887_p9), %vm252_vm2, %v1720_v28 }
0x340f PF: > { %p2950_p1 = scmp.eq.s32.totalorder %s1819_s18, 1  ;;  %s2496_s9 = smov [#allocation9]  }
0x3410   : > { %s1737_s22 = sshll.u32 %s2496_s9, 4  ;;  %s1738_s22 = int_to_ptr.vmem [resolvable:$true] %s1737_s22 }
0x3411   : > { %s2399_s28 = scalar_lea.vmem %s1738_s22, 128  ;;  %p2406_p10 = scmp.lt.s32.totalorder %s1738_s22, %s1738_s22 }
0x3412   : > { %p2400_p4 = scmp.ne.s32.totalorder %s1738_s22, %s2399_s28  ;;  %p2407_p7 = scmp.lt.s32.totalorder %s2399_s28, %s2399_s28 }
0x3414   : > { %p2401_p5 = pnand %p2400_p4, %p2950_p1  ;;  %p2408_p13 = por %p2407_p7, %p2406_p10 }
0x3416   : > { %p2402_p8 = pneg %p2401_p5 }
0x3418   : > { %p2409_p2 = pnand %p2408_p13, %p2402_p8 }
0x341a   : > { %2412 = shalt.err (!%p2409_p2)
}
0x341b   : > { %s2413_s18 = scalar_lea.hbm %s2997_s3, 128 }
0x341c   : > { %p2414_p3 = scmp.ne.s32.totalorder %s2997_s3, %s2413_s18  ;;  %p2419_p6 = scmp.lt.u32.totalorder %s2413_s18, %s2997_s3 }
0x341e   : > { %p2415_p12 = pnand %p2414_p3, %p2950_p1 }
0x3420   : > { %p2416_p0 = pneg %p2415_p12 }
0x3422   : > { %p2421_p11 = pnand %p2419_p6, %p2416_p0 }
0x3424   : > { %2424 = shalt.err (!%p2421_p11)
}
0x3425   : > { %2115 = dma.vmem_to_hbm [thread:$0]  (%p2950_p1), %s1738_s22, 128, %s2997_s3, [#allocation5]  }
0x3426   : > { %2458 = dma.done.wait (%p2950_p1), [#allocation5], 128  }
0x3427   : > { %2460 = vsyncadd (%p2950_p1), [#allocation5], 4294967168 }
0x3428 PF: > { %s18_s17 = sadd.s32 1, %s2483_s17   ;;  %s3011_s12 = smov %s2467_s13 }
0x3429   : > { %p15_p9 = scmp.ge.s32.totalorder %s18_s17, 4   ;;  %s3012_s13 = smov %s2471_s14 }
0x342a   : > { %s3013_s14 = smov %s2642_s26  ;;  %s3014_s15 = smov %s2479_s16 }
0x342b   : > { %s3015_s16 = smov %s3017_s6  ;;  %17 = sbr.rel (!%p15_p9) target bundleno = 6 (0x6), region = 104 }
0x3432   :  { %1750 = vsyncpa [#allocation4], 1 }
0x3433   :  { %1752 = vsyncpa [#allocation4 + $0x1], 1 }
0x3434   :  { %1753 = vsyncpa [#allocation7], 1 }
0x3435   :  { %1754 = vsyncpa [#allocation5], 1 }
0x3436   :  { %1756 = vsyncpa [#allocation5 + $0x1], 1 }

// kernel: tpu_custom_call.1
= control target key start
LH: loop header
LB: loop body
LE: loop exit
PB: predicated region body
PF: predicated region fallthrough
CT: control target
= control target key end

     0   :  { %8 = vsyncpa [#allocation4], 0  ;;  %s2994_s0 = inlined_call_operand.hbm [shape: bf16[38,8,128], index: 0, kind: input, shape index: {}]   ;;  %s2995_s1 = inlined_call_operand.hbm [shape: bf16[32,128], index: 1, kind: input, shape index: {}]   ;;  %s2996_s2 = inlined_call_operand.hbm [shape: f32[8,32], index: 2, kind: input, shape index: {}]   ;;  %s2997_s3 = inlined_call_operand.hbm [shape: f32[8,32], index: 3, kind: output, shape index: {}]  }
   0x1   :  { %10 = vsyncpa [#allocation4 + $0x1], 0 }
   0x2   :  { %11 = vsyncpa [#allocation7], 0 }
   0x3   :  { %12 = vsyncpa [#allocation5], 0  ;;  %s2517_s12 = smov 0   ;;  %s2519_s13 = smov 0  }
   0x4   :  { %s2521_s14 = smov 0   ;;  %s2523_s15 = smov 0  }
   0x5   :  { %s2525_s16 = smov 0   ;;  %s2527_s17 = smov 0  }
   0x6 LB: > { %s1819_s18 = sadd.s32 4294967295, %s2483_s17   ;;  %p52_p0 = scmp.ne.s32.totalorder %s2467_s13, %s2463_s12  ;;  %s2483_s17 = sphi %s2527_s17, %s18_s17   ;;  %s2479_s16 = sphi %s2525_s16, %s3015_s16   ;;  %s2475_s15 = sphi %s2523_s15, %s3014_s15   ;;  %s2471_s14 = sphi %s2521_s14, %s3013_s14   ;;  %s2467_s13 = sphi %s2519_s13, %s3012_s13   ;;  %s2463_s12 = sphi %s2517_s12, %s3011_s12  }
   0x7   : > { %p2549_p1 = scmp.eq.s32.totalorder %s1819_s18, 0  ;;  %p1820_p2 = scmp.ge.s32.totalorder %s2483_s17, 1 }
   0x8   : > { %p131_p3 = scmp.lt.s32.totalorder %s2483_s17, 3  ;;  %s2485_s22 = smov [#allocation6]  }
   0x9   : > { %s3002_s19 = scalar_select %p2549_p1, 1, 0 }
   0xa   : > { %p2557_p4 = por %p2549_p1, %p52_p0  ;;  %p2561_p5 = pnand %p1820_p2, %p131_p3 }
   0xb   : > { %s143_s23 = sshll.u32 %s2485_s22, 4  ;;  %s2486_s25 = smov [#allocation8]   ;;  %s144_s23 = int_to_ptr.vmem [resolvable:$true] %s143_s23 }
   0xc   : > { %s3003_s20 = scalar_select %p2557_p4, 1, 0 }
   0xd   : > { %s3004_s21 = scalar_select %p2561_p5, 1, 0 }
   0xe   : > { %p2118_p6 = pneg %p2561_p5  ;;  %s157_s26 = sshll.u32 %s2486_s25, 4  ;;  %s2573_s26 = int_to_ptr.vmem [resolvable:$true] %s157_s26 }
   0xf   : > { %s2313_s29 = scalar_lea.hbm %s2995_s1, 256 }
  0x10   : > { %p2569_p7 = pnand %p2118_p6, %p2549_p1  ;;  %p2314_p8 = scmp.ne.s32.totalorder %s2995_s1, %s2313_s29 }
  0x11   : > { %p2320_p12 = scmp.lt.u32.totalorder %s2313_s29, %s2995_s1 }
  0x12   : > { %p2315_p9 = pneg %p2569_p7 }
  0x14   : > { %p2316_p10 = pnand %p2315_p9, %p2314_p8 }
  0x16   : > { %p2317_p11 = pneg %p2316_p10 }
  0x18   : > { %p2322_p13 = pnand %p2320_p12, %p2317_p11 }
  0x1a   : > { %2325 = shalt.err (!%p2322_p13)
}
  0x1b   : > { %s2326_s7 = scalar_lea.vmem %s144_s23, 256  ;;  %p2334_p6 = scmp.lt.s32.totalorder %s144_s23, %s144_s23 }
  0x1c   : > { %p2327_p0 = scmp.ne.s32.totalorder %s144_s23, %s2326_s7  ;;  %p2335_p1 = scmp.lt.s32.totalorder %s2326_s7, %s2326_s7 }
  0x1e   : > { %p2329_p2 = pnand %p2327_p0, %p2315_p9  ;;  %p2336_p4 = por %p2335_p1, %p2334_p6 }
  0x20   : > { %p2330_p3 = pneg %p2329_p2 }
  0x22   : > { %p2337_p5 = pnand %p2336_p4, %p2330_p3 }
  0x24   : > { %2340 = shalt.err (!%p2337_p5)
}
  0x25   : > { %s2487_s8 = smov 64   ;;  %s2488_s9 = smov 4  }
  0x26   : > { %2121 = dma.hbm_to_vmem [thread:$0]  (!%p2569_p7), %s2995_s1, 256, %s144_s23, [#allocation7], %s2487_s8, %s2487_s8, %s2488_s9  }
  0x27   : > { %s2341_s25 = scalar_lea.hbm %s2996_s2, 128 }
  0x28   : > { %p2342_p1 = scmp.ne.s32.totalorder %s2996_s2, %s2341_s25  ;;  %p2348_p8 = scmp.lt.u32.totalorder %s2341_s25, %s2996_s2 }
  0x2a   : > { %p2344_p4 = pnand %p2342_p1, %p2315_p9 }
  0x2c   : > { %p2345_p5 = pneg %p2344_p4 }
  0x2e   : > { %p2350_p10 = pnand %p2348_p8, %p2345_p5 }
  0x30   : > { %2353 = shalt.err (!%p2350_p10)
}
  0x31   : > { %s2354_s23 = scalar_lea.vmem %s2573_s26, 128  ;;  %p2362_p0 = scmp.lt.s32.totalorder %s2573_s26, %s2573_s26 }
  0x32   : > { %p2355_p11 = scmp.ne.s32.totalorder %s2573_s26, %s2354_s23  ;;  %p2363_p2 = scmp.lt.s32.totalorder %s2354_s23, %s2354_s23 }
  0x34   : > { %p2357_p12 = pnand %p2355_p11, %p2315_p9  ;;  %p2364_p3 = por %p2363_p2, %p2362_p0 }
  0x36   : > { %p2358_p13 = pneg %p2357_p12 }
  0x38   : > { %p2365_p6 = pnand %p2364_p3, %p2358_p13 }
  0x3a   : > { %2368 = shalt.err (!%p2365_p6)
}
  0x3b   : > { %2124 = dma.hbm_to_vmem [thread:$0]  (!%p2569_p7), %s2996_s2, 128, %s2573_s26, [#allocation7]  }
  0x3c   : > { %s27_s6 = sadd.s32 1, %s2479_s16  ;;  %s39_s7 = sadd.s32 1, %s2471_s14 }
  0x3d   : > { %p28_p9 = scmp.ge.s32.totalorder %s27_s6, 2  ;;  %p46_p1 = scmp.ne.s32.totalorder %s2471_s14, %s2467_s13 }
  0x3e   : > { %p47_p4 = scmp.eq.s32.totalorder %s2483_s17, 0  ;;  %p2131_p5 = scmp.lt.s32.totalorder %s2483_s17, 2 }
  0x3f   : > { %s3017_s6 = smov (%p28_p9, %s27_s6), 0  ;;  %s168_s24 = sand.u32 1, %s2471_s14  }
  0x40   : > { %p48_p8 = por %p47_p4, %p46_p1  ;;  %s34_s10 = ssub.s32 %s2479_s16, %s3017_s6 }
  0x41   : > { %p37_p10 = scmp.eq.s32.totalorder %s34_s10, 0  ;;  %s2102_s11 = smul.u32 76, %s168_s24 }
  0x42   : > { %s1892_s12 = smul.u32 1216, %s2479_s16  ;;  %p2637_p11 = pnand %p2131_p5, %p48_p8 }
  0x43   : > { %s2642_s26 = scalar_select %p37_p10, %s2471_s14, %s39_s7  }
  0x44   : > { %s2647_s28 = scalar_lea.hbm %s2994_s0, %s1892_s12  ;;  %s172_s29 = scalar_lea.vmem [#allocation3], %s2102_s11 }
  0x45   : > { %s180_s30 = sshll.u32 %s172_s29, 4  ;;  %s2651_s23 = scalar_lea.sflag [#allocation4], %s168_s24  ;;  %s2649_s30 = int_to_ptr.vmem [resolvable:$true] %s180_s30 }
  0x46   : > { %s2369_s4 = scalar_lea.hbm %s2647_s28, 1216  ;;  %p2371_p12 = pneg %p2637_p11 }
  0x47   : > { %p2370_p7 = scmp.ne.s32.totalorder %s2647_s28, %s2369_s4  ;;  %s2374_s10 = scalar_lea.hbm %s2994_s0, 2432 }
  0x48   : > { %p2375_p2 = scmp.lt.u32.totalorder %s2647_s28, %s2994_s0  ;;  %p2376_p3 = scmp.lt.u32.totalorder %s2374_s10, %s2369_s4 }
  0x49   : > { %p2372_p13 = pnand %p2371_p12, %p2370_p7  ;;  %p2378_p9 = scmp.lt.u32.totalorder %s2369_s4, %s2647_s28 }
  0x4a   : > { %p2377_p6 = por %p2376_p3, %p2375_p2 }
  0x4b   : > { %p2373_p0 = pneg %p2372_p13 }
  0x4c   : > { %p2379_p1 = por %p2378_p9, %p2377_p6 }
  0x4e   : > { %p2380_p4 = pnand %p2379_p1, %p2373_p0 }
  0x50   : > { %2383 = shalt.err (!%p2380_p4)
}
  0x51   : > { %s2384_s24 = scalar_lea.vmem %s2649_s30, 1216  ;;  %s2489_s11 = smov [#allocation3]  }
  0x52   : > { %p2385_p5 = scmp.ne.s32.totalorder %s2649_s30, %s2384_s24  ;;  %s2389_s27 = sshll.u32 %s2489_s11, 4  ;;  %s2390_s27 = int_to_ptr.vmem [resolvable:$false] %s2389_s27 }
  0x53   : > { %s2391_s29 = scalar_lea.vmem %s2390_s27, 2432  ;;  %p2392_p7 = scmp.lt.s32.totalorder %s2649_s30, %s2390_s27 }
  0x54   : > { %p2387_p8 = pnand %p2385_p5, %p2371_p12  ;;  %p2393_p13 = scmp.lt.s32.totalorder %s2391_s29, %s2384_s24 }
  0x56   : > { %p2388_p10 = pneg %p2387_p8  ;;  %p2394_p2 = por %p2393_p13, %p2392_p7 }
  0x58   : > { %p2395_p3 = pnand %p2394_p2, %p2388_p10 }
  0x5a   : > { %2398 = shalt.err (!%p2395_p3)
}
  0x5b   : > { %2128 = dma.hbm_to_vmem [thread:$0]  (!%p2637_p11), %s2647_s28, 1216, %s2649_s30, %s2651_s23, %s2487_s8, %s2487_s8, %s2488_s9  }
  0x5c   : > { %p3007_p12 = scmp.ne.s32.totalorder %s3004_s21, 0 }
  0x5d   : > { %s194_s4 = sand.u32 (!%p3007_p12), 1, %s2467_s13   ;;  %p3008_p0 = scmp.ne.s32.totalorder (!%p3007_p12), %s3003_s20, 0 }
  0x5e   : > { %192 = sbr.rel (%p3007_p12) target bundleno = 13352 (0x3428), region = 32  ;;  %s195_s7 = scalar_lea.sflag (!%p3007_p12), [#allocation4], %s194_s4 }
  0x5f   : > { %s2103_s5 = smul.u32 (!%p3007_p12), 76, %s194_s4 }
  0x61   : > { %s2685_s10 = scalar_lea.vmem (!%p3007_p12), [#allocation3], %s2103_s5 }
  0x65   : > { %2450 = dma.done.wait (%p3008_p0), %s195_s7, 1216  }
  0x66   : > { %2452 = vsyncadd (%p3008_p0), %s195_s7, 4294966080  ;;  %p3009_p6 = scmp.ne.s32.totalorder %s3002_s19, 0 }
  0x68   : > { %2454 = dma.done.wait (%p3009_p6), [#allocation7], 384  }
  0x69   : > { %2456 = vsyncadd (%p3009_p6), [#allocation7], 4294966912  ;;  %p1828_p11 = scmp.ne.s32.totalorder %s2475_s15, 0 }
  0x6a   : > { %vm230_vm0 = vcmask (!%p1828_p11), 261120   ;;  %v2490_v0 = vmov (!%p1828_p11), 0.0  }
  0x6b   : > { %229 = sbr.rel (%p1828_p11) target bundleno = 114 (0x72), region = 48  ;;  %231 = vst.msk [vmem:[#allocation2] sm:$0xff] (!%p1828_p11), %vm230_vm0, %v2490_v0 }
  0x72 PF: > { %v2696_v1 = vld [vmem:[#allocation6] sm:$0xff]   ;;  %v2491_v2 = vmov 0.0   ;;  %v2701_v3 = vld [vmem:[#allocation6 + $0x8] sm:$0xff]   ;;  %vm2492_vm1 = vmmov 0   ;;  %v303_v5 = vld [vmem:[#allocation8] sm:$0xff]  ;;  %s2493_s19 = smov 64  }
  0x73   : > { %1950 = vmatprep.subr.bf16.mxu0 %v2491_v2  ;;  %1958 = vmatprep.subr.bf16.mxu1 %v2491_v2  ;;  %v232_v4 = vld [vmem:[#allocation2] sm:$0xff]  ;;  %vm252_vm2 = vcmask 261120   ;;  %s2494_s20 = smov 32   ;;  %v233_v13 = vld [vmem:[%s2685_s10] sm:$0xff]   ;;  %s2495_s21 = smov 96  }
  0x74   : > { %1951 = vmatpush3.bf16.msra.mxu0 %v2696_v1  ;;  %1954 = vmatprep.mubr.msk.bf16.mxu0 %vm2492_vm1, %v2491_v2  ;;  %v235_v6 = vpack.c.bf16 %v232_v4, %v232_v4  ;;  %v234_v14 = vunpack.c.l.bf16 %v233_v13  ;;  %v334_v38 = vunpack.c.h.bf16 %v233_v13  ;;  %v1836_v61 = vld [vmem:[%s2685_s10 + $0x8] sm:$0xff]   ;;  %p1887_p9 = scmp.ne.s32.totalorder %s2475_s15, 1 }
  0x75   : > { %1952 = vmatprep.subr.bf16.mxu0 %v2491_v2  ;;  %305 = vrot.lane.b32.xlu0 %v303_v5, %s2493_s19  ;;  %v411_v62 = vunpack.c.l.bf16 %v1836_v61 }
  0x76   : > { %1959 = vmatpush3.bf16.msra.mxu1 %v2696_v1  ;;  %1962 = vmatprep.mubr.msk.bf16.mxu1 %vm2492_vm1, %v2491_v2 }
  0x77   : > { %1960 = vmatprep.subr.bf16.mxu1 %v2491_v2 }
  0x78   : > { %1953 = vmatpush3.bf16.msra.mxu0 %v2701_v3 }
  0x79   : > { %1966 = vmatprep.subr.bf16.mxu0 %v2491_v2 }
  0x7a   : > { %1961 = vmatpush3.bf16.msra.mxu1 %v2701_v3 }
  0x7b   : > { %1955 = vmatmul.mubr.msk.bf16.vlgmr.msra.gmra.mrb[0].mxu0 %vm252_vm2, %v235_v6  ;;  %1974 = vmatprep.subr.bf16.mxu1 %v2491_v2 }
  0x7c   : > { %1967 = vmatpush3.bf16.msra.mxu0 %v2696_v1  ;;  %1970 = vmatprep.mubr.msk.bf16.mxu0 %vm2492_vm1, %v2491_v2 }
  0x7d   : > { %1968 = vmatprep.subr.bf16.mxu0 %v2491_v2 }
  0x80   : > { %1969 = vmatpush3.bf16.msra.mxu0 %v2701_v3 }
  0x81   : > { %1982 = vmatprep.subr.bf16.mxu0 %v2491_v2 }
  0xe7   : > { %v2722_v7 = vpop.permute.xlu0 %305 }
 0x14e   : > { %v290_v8 = vpop.f32.mrb[0].mxu0 }
 0x14f   : > { %v308_v9 = vadd.f32 %v2722_v7, %v290_v8  ;;  %v1956_v10 = vpop.f32.mrb[1].mxu0  ;;  %v296_v15 = vadd.f32 %v290_v8, %v234_v14 }
 0x150   : > { %v293_v11 = vpop.f32.mrb[2].mxu0 }
 0x151   : > { %310 = vrot.lane.b32.xlu0 %v308_v9, %s2493_s19  ;;  %v1957_v12 = vpop.f32.mrb[3].mxu0  ;;  %v1832_v16 = vmul.f32 -1.442695, %v296_v15 }
 0x153   : > { %2197 = vpow2.f32 %v1832_v16 }
 0x155   : > { %327 = vrot.lane.b32.xlu0 %v232_v4, %s2494_s20 }
 0x15d   : > { %v2198_v17 = vpop.eup %2197 }
 0x15e   : > { %v300_v18 = vadd.f32 1.0, %v2198_v17 }
 0x160   : > { %2199 = vrcp.f32 %v300_v18 }
 0x16a   : > { %v2200_v19 = vpop.eup %2199 }
 0x16b   : > { %v320_v26 = vsub.f32 1.0, %v2200_v19 }
 0x1c3   : > { %v311_v20 = vpop.permute.xlu0 %310 }
 0x1c4   : > { %v313_v21 = vmul.f32 %v2200_v19, %v311_v20 }
 0x1c6   : > { %315 = vrot.lane.b32.xlu1 %v313_v21, %s2493_s19 }
 0x1c7   : > { %v328_v25 = vpop.permute.xlu0 %327 }
 0x1c8   : > { %v330_v28 = vmul.f32 %v2200_v19, %v328_v25  ;;  %v488_v25 = vunpack.c.h.bf16 %v1836_v61 }
 0x238   : > { %v316_v22 = vpop.permute.xlu1 %315 }
 0x239   : > { %v318_v23 = vadd.f32 %v316_v22, %v234_v14 }
 0x23b   : > { %2201 = vtanh.f32 %v318_v23 }
 0x245   : > { %v2202_v24 = vpop.eup %2201 }
 0x246   : > { %322 = vrot.lane.b32.xlu1 %v2202_v24, %s2495_s21 }
 0x2b8   : > { %v323_v27 = vpop.permute.xlu1 %322 }
 0x2b9   : > { %v325_v29 = vmul.f32 %v323_v27, %v320_v26 }
 0x2bb   : > { %v331_v30 = vadd.f32 %v330_v28, %v325_v29 }
 0x2bd   : > { %v335_v31 = vpack.c.bf16 %v331_v30, %v331_v30 }
 0x2bf   : > { %337 = vrot.lane.b32.xlu1 %v335_v31, %s2495_s21 }
 0x331   : > { %v338_v32 = vpop.permute.xlu1 %337 }
 0x332   : > { %1963 = vmatmul.mubr.msk.bf16.vlgmr.msra.gmra.mrb[0].mxu1 %vm252_vm2, %v338_v32 }
 0x333   : > { %1975 = vmatpush3.bf16.msra.mxu1 %v2696_v1  ;;  %1978 = vmatprep.mubr.msk.bf16.mxu1 %vm2492_vm1, %v2491_v2 }
 0x334   : > { %1976 = vmatprep.subr.bf16.mxu1 %v2491_v2 }
 0x337   : > { %1977 = vmatpush3.bf16.msra.mxu1 %v2701_v3 }
 0x338   : > { %1990 = vmatprep.subr.bf16.mxu1 %v2491_v2 }
 0x405   : > { %v376_v33 = vpop.f32.mrb[0].mxu1 }
 0x406   : > { %v389_v34 = vadd.f32 %v376_v33, %v2722_v7  ;;  %v1964_v35 = vpop.f32.mrb[1].mxu1  ;;  %v382_v39 = vadd.f32 %v376_v33, %v334_v38 }
 0x407   : > { %v379_v36 = vpop.f32.mrb[2].mxu1 }
 0x408   : > { %391 = vrot.lane.b32.xlu0 %v389_v34, %s2493_s19  ;;  %v1965_v37 = vpop.f32.mrb[3].mxu1  ;;  %v1835_v40 = vmul.f32 -1.442695, %v382_v39 }
 0x40a   : > { %2203 = vpow2.f32 %v1835_v40 }
 0x414   : > { %v2204_v41 = vpop.eup %2203 }
 0x415   : > { %v386_v42 = vadd.f32 1.0, %v2204_v41 }
 0x417   : > { %2205 = vrcp.f32 %v386_v42 }
 0x421   : > { %v2206_v43 = vpop.eup %2205 }
 0x422   : > { %v401_v49 = vsub.f32 1.0, %v2206_v43  ;;  %v407_v51 = vmul.f32 %v2206_v43, %v331_v30 }
 0x47a   : > { %v392_v44 = vpop.permute.xlu0 %391 }
 0x47b   : > { %v394_v45 = vmul.f32 %v2206_v43, %v392_v44 }
 0x47d   : > { %396 = vrot.lane.b32.xlu1 %v394_v45, %s2493_s19 }
 0x4ef   : > { %v397_v46 = vpop.permute.xlu1 %396 }
 0x4f0   : > { %v399_v47 = vadd.f32 %v397_v46, %v334_v38 }
 0x4f2   : > { %2207 = vtanh.f32 %v399_v47 }
 0x4fc   : > { %v2208_v48 = vpop.eup %2207 }
 0x4fd   : > { %403 = vrot.lane.b32.xlu0 %v2208_v48, %s2495_s21  ;;  %v1842_v48 = vld [vmem:[%s2685_s10 + $0x10] sm:$0xff]  }
 0x56f   : > { %v404_v50 = vpop.permute.xlu0 %403 }
 0x570   : > { %v406_v52 = vmul.f32 %v404_v50, %v401_v49  ;;  %v565_v49 = vunpack.c.l.bf16 %v1842_v48 }
 0x572   : > { %v408_v53 = vadd.f32 %v407_v51, %v406_v52 }
 0x574   : > { %v412_v54 = vpack.c.bf16 %v408_v53, %v408_v53 }
 0x576   : > { %414 = vrot.lane.b32.xlu1 %v412_v54, %s2495_s21 }
 0x5e8   : > { %v415_v55 = vpop.permute.xlu1 %414 }
 0x5e9   : > { %1971 = vmatmul.mubr.msk.bf16.vlgmr.msra.gmra.mrb[4].mxu0 %vm252_vm2, %v415_v55 }
 0x5ea   : > { %1983 = vmatpush3.bf16.msra.mxu0 %v2696_v1  ;;  %1986 = vmatprep.mubr.msk.bf16.mxu0 %vm2492_vm1, %v2491_v2 }
 0x5eb   : > { %1984 = vmatprep.subr.bf16.mxu0 %v2491_v2 }
 0x5ee   : > { %1985 = vmatpush3.bf16.msra.mxu0 %v2701_v3 }
 0x5ef   : > { %1998 = vmatprep.subr.bf16.mxu0 %v2491_v2 }
 0x6bc   : > { %v453_v56 = vpop.f32.mrb[4].mxu0 }
 0x6bd   : > { %v466_v57 = vadd.f32 %v453_v56, %v2722_v7  ;;  %v1972_v58 = vpop.f32.mrb[5].mxu0  ;;  %v459_v63 = vadd.f32 %v453_v56, %v411_v62 }
 0x6be   : > { %v456_v59 = vpop.f32.mrb[6].mxu0 }
 0x6bf   : > { %468 = vrot.lane.b32.xlu0 %v466_v57, %s2493_s19  ;;  %v1973_v60 = vpop.f32.mrb[7].mxu0  ;;  %v1838_v0 = vmul.f32 -1.442695, %v459_v63 }
 0x6c1   : > { %2209 = vpow2.f32 %v1838_v0 }
 0x6cb   : > { %v2210_v4 = vpop.eup %2209 }
 0x6cc   : > { %v463_v5 = vadd.f32 1.0, %v2210_v4 }
 0x6ce   : > { %2211 = vrcp.f32 %v463_v5 }
 0x6d8   : > { %v2212_v6 = vpop.eup %2211 }
 0x6d9   : > { %v478_v13 = vsub.f32 1.0, %v2212_v6  ;;  %v484_v15 = vmul.f32 %v2212_v6, %v408_v53 }
 0x731   : > { %v469_v8 = vpop.permute.xlu0 %468 }
 0x732   : > { %v471_v9 = vmul.f32 %v2212_v6, %v469_v8 }
 0x734   : > { %473 = vrot.lane.b32.xlu1 %v471_v9, %s2493_s19 }
 0x7a6   : > { %v474_v10 = vpop.permute.xlu1 %473 }
 0x7a7   : > { %v476_v11 = vadd.f32 %v474_v10, %v411_v62 }
 0x7a9   : > { %2213 = vtanh.f32 %v476_v11 }
 0x7b3   : > { %v2214_v12 = vpop.eup %2213 }
 0x7b4   : > { %480 = vrot.lane.b32.xlu0 %v2214_v12, %s2495_s21  ;;  %v642_v12 = vunpack.c.h.bf16 %v1842_v48 }
 0x826   : > { %v481_v14 = vpop.permute.xlu0 %480 }
 0x827   : > { %v483_v16 = vmul.f32 %v481_v14, %v478_v13 }
 0x829   : > { %v485_v17 = vadd.f32 %v484_v15, %v483_v16 }
 0x82b   : > { %v489_v18 = vpack.c.bf16 %v485_v17, %v485_v17 }
 0x82d   : > { %491 = vrot.lane.b32.xlu1 %v489_v18, %s2495_s21 }
 0x89f   : > { %v492_v19 = vpop.permute.xlu1 %491 }
 0x8a0   : > { %1979 = vmatmul.mubr.msk.bf16.vlgmr.msra.gmra.mrb[4].mxu1 %vm252_vm2, %v492_v19 }
 0x8a1   : > { %1991 = vmatpush3.bf16.msra.mxu1 %v2696_v1  ;;  %1994 = vmatprep.mubr.msk.bf16.mxu1 %vm2492_vm1, %v2491_v2 }
 0x8a2   : > { %1992 = vmatprep.subr.bf16.mxu1 %v2491_v2 }
 0x8a5   : > { %1993 = vmatpush3.bf16.msra.mxu1 %v2701_v3 }
 0x8a6   : > { %2006 = vmatprep.subr.bf16.mxu1 %v2491_v2 }
 0x973   : > { %v530_v20 = vpop.f32.mrb[4].mxu1 }
 0x974   : > { %v543_v21 = vadd.f32 %v530_v20, %v2722_v7  ;;  %v1980_v22 = vpop.f32.mrb[5].mxu1  ;;  %v536_v26 = vadd.f32 %v530_v20, %v488_v25 }
 0x975   : > { %v533_v23 = vpop.f32.mrb[6].mxu1 }
 0x976   : > { %545 = vrot.lane.b32.xlu0 %v543_v21, %s2493_s19  ;;  %v1981_v24 = vpop.f32.mrb[7].mxu1  ;;  %v1841_v27 = vmul.f32 -1.442695, %v536_v26 }
 0x978   : > { %2215 = vpow2.f32 %v1841_v27 }
 0x982   : > { %v2216_v28 = vpop.eup %2215 }
 0x983   : > { %v540_v29 = vadd.f32 1.0, %v2216_v28 }
 0x985   : > { %2217 = vrcp.f32 %v540_v29 }
 0x98f   : > { %v2218_v30 = vpop.eup %2217 }
 0x990   : > { %v555_v36 = vsub.f32 1.0, %v2218_v30  ;;  %v561_v38 = vmul.f32 %v2218_v30, %v485_v17 }
 0x9e8   : > { %v546_v31 = vpop.permute.xlu0 %545 }
 0x9e9   : > { %v548_v32 = vmul.f32 %v2218_v30, %v546_v31 }
 0x9eb   : > { %550 = vrot.lane.b32.xlu1 %v548_v32, %s2493_s19 }
 0xa5d   : > { %v551_v33 = vpop.permute.xlu1 %550 }
 0xa5e   : > { %v553_v34 = vadd.f32 %v551_v33, %v488_v25 }
 0xa60   : > { %2219 = vtanh.f32 %v553_v34 }
 0xa6a   : > { %v2220_v35 = vpop.eup %2219 }
 0xa6b   : > { %557 = vrot.lane.b32.xlu0 %v2220_v35, %s2495_s21  ;;  %v1848_v35 = vld [vmem:[%s2685_s10 + $0x18] sm:$0xff]  }
 0xadd   : > { %v558_v37 = vpop.permute.xlu0 %557 }
 0xade   : > { %v560_v39 = vmul.f32 %v558_v37, %v555_v36  ;;  %v719_v36 = vunpack.c.l.bf16 %v1848_v35 }
 0xae0   : > { %v562_v40 = vadd.f32 %v561_v38, %v560_v39 }
 0xae2   : > { %v566_v41 = vpack.c.bf16 %v562_v40, %v562_v40 }
 0xae4   : > { %568 = vrot.lane.b32.xlu1 %v566_v41, %s2495_s21 }
 0xb56   : > { %v569_v42 = vpop.permute.xlu1 %568 }
 0xb57   : > { %1987 = vmatmul.mubr.msk.bf16.vlgmr.msra.gmra.mrb[8].mxu0 %vm252_vm2, %v569_v42 }
 0xb58   : > { %1999 = vmatpush3.bf16.msra.mxu0 %v2696_v1  ;;  %2002 = vmatprep.mubr.msk.bf16.mxu0 %vm2492_vm1, %v2491_v2 }
 0xb59   : > { %2000 = vmatprep.subr.bf16.mxu0 %v2491_v2 }
 0xb5c   : > { %2001 = vmatpush3.bf16.msra.mxu0 %v2701_v3 }
 0xb5d   : > { %2014 = vmatprep.subr.bf16.mxu0 %v2491_v2 }
 0xc2a   : > { %v607_v43 = vpop.f32.mrb[8].mxu0 }
 0xc2b   : > { %v620_v44 = vadd.f32 %v607_v43, %v2722_v7  ;;  %v1988_v45 = vpop.f32.mrb[9].mxu0  ;;  %v613_v50 = vadd.f32 %v607_v43, %v565_v49 }
 0xc2c   : > { %v610_v46 = vpop.f32.mrb[10].mxu0 }
 0xc2d   : > { %622 = vrot.lane.b32.xlu0 %v620_v44, %s2493_s19  ;;  %v1989_v47 = vpop.f32.mrb[11].mxu0  ;;  %v1844_v51 = vmul.f32 -1.442695, %v613_v50 }
 0xc2f   : > { %2221 = vpow2.f32 %v1844_v51 }
 0xc39   : > { %v2222_v52 = vpop.eup %2221 }
 0xc3a   : > { %v617_v53 = vadd.f32 1.0, %v2222_v52 }
 0xc3c   : > { %2223 = vrcp.f32 %v617_v53 }
 0xc46   : > { %v2224_v54 = vpop.eup %2223 }
 0xc47   : > { %v632_v60 = vsub.f32 1.0, %v2224_v54  ;;  %v638_v62 = vmul.f32 %v2224_v54, %v562_v40 }
 0xc9f   : > { %v623_v55 = vpop.permute.xlu0 %622 }
 0xca0   : > { %v625_v56 = vmul.f32 %v2224_v54, %v623_v55 }
 0xca2   : > { %627 = vrot.lane.b32.xlu1 %v625_v56, %s2493_s19 }
 0xd14   : > { %v628_v57 = vpop.permute.xlu1 %627 }
 0xd15   : > { %v630_v58 = vadd.f32 %v628_v57, %v565_v49 }
 0xd17   : > { %2225 = vtanh.f32 %v630_v58 }
 0xd21   : > { %v2226_v59 = vpop.eup %2225 }
 0xd22   : > { %634 = vrot.lane.b32.xlu0 %v2226_v59, %s2495_s21  ;;  %v796_v59 = vunpack.c.h.bf16 %v1848_v35 }
 0xd94   : > { %v635_v61 = vpop.permute.xlu0 %634 }
 0xd95   : > { %v637_v63 = vmul.f32 %v635_v61, %v632_v60 }
 0xd97   : > { %v639_v0 = vadd.f32 %v638_v62, %v637_v63 }
 0xd99   : > { %v643_v4 = vpack.c.bf16 %v639_v0, %v639_v0 }
 0xd9b   : > { %645 = vrot.lane.b32.xlu1 %v643_v4, %s2495_s21 }
 0xe0d   : > { %v646_v5 = vpop.permute.xlu1 %645 }
 0xe0e   : > { %1995 = vmatmul.mubr.msk.bf16.vlgmr.msra.gmra.mrb[8].mxu1 %vm252_vm2, %v646_v5 }
 0xe0f   : > { %2007 = vmatpush3.bf16.msra.mxu1 %v2696_v1  ;;  %2010 = vmatprep.mubr.msk.bf16.mxu1 %vm2492_vm1, %v2491_v2 }
 0xe10   : > { %2008 = vmatprep.subr.bf16.mxu1 %v2491_v2 }
 0xe13   : > { %2009 = vmatpush3.bf16.msra.mxu1 %v2701_v3 }
 0xe14   : > { %2022 = vmatprep.subr.bf16.mxu1 %v2491_v2 }
 0xee1   : > { %v684_v6 = vpop.f32.mrb[8].mxu1 }
 0xee2   : > { %v697_v8 = vadd.f32 %v684_v6, %v2722_v7  ;;  %v1996_v9 = vpop.f32.mrb[9].mxu1  ;;  %v690_v13 = vadd.f32 %v684_v6, %v642_v12 }
 0xee3   : > { %v687_v10 = vpop.f32.mrb[10].mxu1 }
 0xee4   : > { %699 = vrot.lane.b32.xlu0 %v697_v8, %s2493_s19  ;;  %v1997_v11 = vpop.f32.mrb[11].mxu1  ;;  %v1847_v14 = vmul.f32 -1.442695, %v690_v13 }
 0xee6   : > { %2227 = vpow2.f32 %v1847_v14 }
 0xef0   : > { %v2228_v15 = vpop.eup %2227 }
 0xef1   : > { %v694_v16 = vadd.f32 1.0, %v2228_v15 }
 0xef3   : > { %2229 = vrcp.f32 %v694_v16 }
 0xefd   : > { %v2230_v17 = vpop.eup %2229 }
 0xefe   : > { %v709_v23 = vsub.f32 1.0, %v2230_v17  ;;  %v715_v25 = vmul.f32 %v2230_v17, %v639_v0 }
 0xf56   : > { %v700_v18 = vpop.permute.xlu0 %699 }
 0xf57   : > { %v702_v19 = vmul.f32 %v2230_v17, %v700_v18 }
 0xf59   : > { %704 = vrot.lane.b32.xlu1 %v702_v19, %s2493_s19 }
 0xfcb   : > { %v705_v20 = vpop.permute.xlu1 %704 }
 0xfcc   : > { %v707_v21 = vadd.f32 %v705_v20, %v642_v12 }
 0xfce   : > { %2231 = vtanh.f32 %v707_v21 }
 0xfd8   : > { %v2232_v22 = vpop.eup %2231 }
 0xfd9   : > { %711 = vrot.lane.b32.xlu0 %v2232_v22, %s2495_s21  ;;  %v1854_v22 = vld [vmem:[%s2685_s10 + $0x20] sm:$0xff]  }
0x104b   : > { %v712_v24 = vpop.permute.xlu0 %711 }
0x104c   : > { %v714_v26 = vmul.f32 %v712_v24, %v709_v23  ;;  %v873_v23 = vunpack.c.l.bf16 %v1854_v22 }
0x104e   : > { %v716_v27 = vadd.f32 %v715_v25, %v714_v26 }
0x1050   : > { %v720_v28 = vpack.c.bf16 %v716_v27, %v716_v27 }
0x1052   : > { %722 = vrot.lane.b32.xlu1 %v720_v28, %s2495_s21 }
0x10c4   : > { %v723_v29 = vpop.permute.xlu1 %722 }
0x10c5   : > { %2003 = vmatmul.mubr.msk.bf16.vlgmr.msra.gmra.mrb[12].mxu0 %vm252_vm2, %v723_v29 }
0x10c6   : > { %2015 = vmatpush3.bf16.msra.mxu0 %v2696_v1  ;;  %2018 = vmatprep.mubr.msk.bf16.mxu0 %vm2492_vm1, %v2491_v2 }
0x10c7   : > { %2016 = vmatprep.subr.bf16.mxu0 %v2491_v2 }
0x10ca   : > { %2017 = vmatpush3.bf16.msra.mxu0 %v2701_v3 }
0x10cb   : > { %2030 = vmatprep.subr.bf16.mxu0 %v2491_v2 }
0x1198   : > { %v761_v30 = vpop.f32.mrb[12].mxu0 }
0x1199   : > { %v774_v31 = vadd.f32 %v761_v30, %v2722_v7  ;;  %v2004_v32 = vpop.f32.mrb[13].mxu0  ;;  %v767_v37 = vadd.f32 %v761_v30, %v719_v36 }
0x119a   : > { %v764_v33 = vpop.f32.mrb[14].mxu0 }
0x119b   : > { %776 = vrot.lane.b32.xlu0 %v774_v31, %s2493_s19  ;;  %v2005_v34 = vpop.f32.mrb[15].mxu0  ;;  %v1850_v38 = vmul.f32 -1.442695, %v767_v37 }
0x119d   : > { %2233 = vpow2.f32 %v1850_v38 }
0x11a7   : > { %v2234_v39 = vpop.eup %2233 }
0x11a8   : > { %v771_v40 = vadd.f32 1.0, %v2234_v39 }
0x11aa   : > { %2235 = vrcp.f32 %v771_v40 }
0x11b4   : > { %v2236_v41 = vpop.eup %2235 }
0x11b5   : > { %v786_v47 = vsub.f32 1.0, %v2236_v41  ;;  %v792_v49 = vmul.f32 %v2236_v41, %v716_v27 }
0x120d   : > { %v777_v42 = vpop.permute.xlu0 %776 }
0x120e   : > { %v779_v43 = vmul.f32 %v2236_v41, %v777_v42 }
0x1210   : > { %781 = vrot.lane.b32.xlu1 %v779_v43, %s2493_s19 }
0x1282   : > { %v782_v44 = vpop.permute.xlu1 %781 }
0x1283   : > { %v784_v45 = vadd.f32 %v782_v44, %v719_v36 }
0x1285   : > { %2237 = vtanh.f32 %v784_v45 }
0x128f   : > { %v2238_v46 = vpop.eup %2237 }
0x1290   : > { %788 = vrot.lane.b32.xlu0 %v2238_v46, %s2495_s21  ;;  %v950_v46 = vunpack.c.h.bf16 %v1854_v22 }
0x1302   : > { %v789_v48 = vpop.permute.xlu0 %788 }
0x1303   : > { %v791_v50 = vmul.f32 %v789_v48, %v786_v47 }
0x1305   : > { %v793_v51 = vadd.f32 %v792_v49, %v791_v50 }
0x1307   : > { %v797_v52 = vpack.c.bf16 %v793_v51, %v793_v51 }
0x1309   : > { %799 = vrot.lane.b32.xlu1 %v797_v52, %s2495_s21 }
0x137b   : > { %v800_v53 = vpop.permute.xlu1 %799 }
0x137c   : > { %2011 = vmatmul.mubr.msk.bf16.vlgmr.msra.gmra.mrb[12].mxu1 %vm252_vm2, %v800_v53 }
0x137d   : > { %2023 = vmatpush3.bf16.msra.mxu1 %v2696_v1  ;;  %2026 = vmatprep.mubr.msk.bf16.mxu1 %vm2492_vm1, %v2491_v2 }
0x137e   : > { %2024 = vmatprep.subr.bf16.mxu1 %v2491_v2 }
0x1381   : > { %2025 = vmatpush3.bf16.msra.mxu1 %v2701_v3 }
0x1382   : > { %2038 = vmatprep.subr.bf16.mxu1 %v2491_v2 }
0x144f   : > { %v838_v54 = vpop.f32.mrb[12].mxu1 }
0x1450   : > { %v851_v55 = vadd.f32 %v838_v54, %v2722_v7  ;;  %v2012_v56 = vpop.f32.mrb[13].mxu1  ;;  %v844_v60 = vadd.f32 %v838_v54, %v796_v59 }
0x1451   : > { %v841_v57 = vpop.f32.mrb[14].mxu1 }
0x1452   : > { %853 = vrot.lane.b32.xlu0 %v851_v55, %s2493_s19  ;;  %v2013_v58 = vpop.f32.mrb[15].mxu1  ;;  %v1853_v61 = vmul.f32 -1.442695, %v844_v60 }
0x1454   : > { %2239 = vpow2.f32 %v1853_v61 }
0x145e   : > { %v2240_v62 = vpop.eup %2239 }
0x145f   : > { %v848_v63 = vadd.f32 1.0, %v2240_v62 }
0x1461   : > { %2241 = vrcp.f32 %v848_v63 }
0x146b   : > { %v2242_v0 = vpop.eup %2241 }
0x146c   : > { %v863_v10 = vsub.f32 1.0, %v2242_v0  ;;  %v869_v12 = vmul.f32 %v2242_v0, %v793_v51 }
0x14c4   : > { %v854_v4 = vpop.permute.xlu0 %853 }
0x14c5   : > { %v856_v5 = vmul.f32 %v2242_v0, %v854_v4 }
0x14c7   : > { %858 = vrot.lane.b32.xlu1 %v856_v5, %s2493_s19 }
0x1539   : > { %v859_v6 = vpop.permute.xlu1 %858 }
0x153a   : > { %v861_v8 = vadd.f32 %v859_v6, %v796_v59 }
0x153c   : > { %2243 = vtanh.f32 %v861_v8 }
0x1546   : > { %v2244_v9 = vpop.eup %2243 }
0x1547   : > { %865 = vrot.lane.b32.xlu0 %v2244_v9, %s2495_s21  ;;  %v1860_v9 = vld [vmem:[%s2685_s10 + $0x28] sm:$0xff]  }
0x15b9   : > { %v866_v11 = vpop.permute.xlu0 %865 }
0x15ba   : > { %v868_v13 = vmul.f32 %v866_v11, %v863_v10  ;;  %v1027_v10 = vunpack.c.l.bf16 %v1860_v9 }
0x15bc   : > { %v870_v14 = vadd.f32 %v869_v12, %v868_v13 }
0x15be   : > { %v874_v15 = vpack.c.bf16 %v870_v14, %v870_v14 }
0x15c0   : > { %876 = vrot.lane.b32.xlu1 %v874_v15, %s2495_s21 }
0x1632   : > { %v877_v16 = vpop.permute.xlu1 %876 }
0x1633   : > { %2019 = vmatmul.mubr.msk.bf16.vlgmr.msra.gmra.mrb[16].mxu0 %vm252_vm2, %v877_v16 }
0x1634   : > { %2031 = vmatpush3.bf16.msra.mxu0 %v2696_v1  ;;  %2034 = vmatprep.mubr.msk.bf16.mxu0 %vm2492_vm1, %v2491_v2 }
0x1635   : > { %2032 = vmatprep.subr.bf16.mxu0 %v2491_v2 }
0x1638   : > { %2033 = vmatpush3.bf16.msra.mxu0 %v2701_v3 }
0x1639   : > { %2046 = vmatprep.subr.bf16.mxu0 %v2491_v2 }
0x1706   : > { %v915_v17 = vpop.f32.mrb[16].mxu0 }
0x1707   : > { %v928_v18 = vadd.f32 %v915_v17, %v2722_v7  ;;  %v2020_v19 = vpop.f32.mrb[17].mxu0  ;;  %v921_v24 = vadd.f32 %v915_v17, %v873_v23 }
0x1708   : > { %v918_v20 = vpop.f32.mrb[18].mxu0 }
0x1709   : > { %930 = vrot.lane.b32.xlu0 %v928_v18, %s2493_s19  ;;  %v2021_v21 = vpop.f32.mrb[19].mxu0  ;;  %v1856_v25 = vmul.f32 -1.442695, %v921_v24 }
0x170b   : > { %2245 = vpow2.f32 %v1856_v25 }
0x1715   : > { %v2246_v26 = vpop.eup %2245 }
0x1716   : > { %v925_v27 = vadd.f32 1.0, %v2246_v26 }
0x1718   : > { %2247 = vrcp.f32 %v925_v27 }
0x1722   : > { %v2248_v28 = vpop.eup %2247 }
0x1723   : > { %v940_v34 = vsub.f32 1.0, %v2248_v28  ;;  %v946_v36 = vmul.f32 %v2248_v28, %v870_v14 }
0x177b   : > { %v931_v29 = vpop.permute.xlu0 %930 }
0x177c   : > { %v933_v30 = vmul.f32 %v2248_v28, %v931_v29 }
0x177e   : > { %935 = vrot.lane.b32.xlu1 %v933_v30, %s2493_s19 }
0x17f0   : > { %v936_v31 = vpop.permute.xlu1 %935 }
0x17f1   : > { %v938_v32 = vadd.f32 %v936_v31, %v873_v23 }
0x17f3   : > { %2249 = vtanh.f32 %v938_v32 }
0x17fd   : > { %v2250_v33 = vpop.eup %2249 }
0x17fe   : > { %942 = vrot.lane.b32.xlu0 %v2250_v33, %s2495_s21  ;;  %v1104_v33 = vunpack.c.h.bf16 %v1860_v9 }
0x1870   : > { %v943_v35 = vpop.permute.xlu0 %942 }
0x1871   : > { %v945_v37 = vmul.f32 %v943_v35, %v940_v34 }
0x1873   : > { %v947_v38 = vadd.f32 %v946_v36, %v945_v37 }
0x1875   : > { %v951_v39 = vpack.c.bf16 %v947_v38, %v947_v38 }
0x1877   : > { %953 = vrot.lane.b32.xlu1 %v951_v39, %s2495_s21 }
0x18e9   : > { %v954_v40 = vpop.permute.xlu1 %953 }
0x18ea   : > { %2027 = vmatmul.mubr.msk.bf16.vlgmr.msra.gmra.mrb[16].mxu1 %vm252_vm2, %v954_v40 }
0x18eb   : > { %2039 = vmatpush3.bf16.msra.mxu1 %v2696_v1  ;;  %2042 = vmatprep.mubr.msk.bf16.mxu1 %vm2492_vm1, %v2491_v2 }
0x18ec   : > { %2040 = vmatprep.subr.bf16.mxu1 %v2491_v2 }
0x18ef   : > { %2041 = vmatpush3.bf16.msra.mxu1 %v2701_v3 }
0x18f0   : > { %2054 = vmatprep.subr.bf16.mxu1 %v2491_v2 }
0x19bd   : > { %v992_v41 = vpop.f32.mrb[16].mxu1 }
0x19be   : > { %v1005_v42 = vadd.f32 %v992_v41, %v2722_v7  ;;  %v2028_v43 = vpop.f32.mrb[17].mxu1  ;;  %v998_v47 = vadd.f32 %v992_v41, %v950_v46 }
0x19bf   : > { %v995_v44 = vpop.f32.mrb[18].mxu1 }
0x19c0   : > { %1007 = vrot.lane.b32.xlu0 %v1005_v42, %s2493_s19  ;;  %v2029_v45 = vpop.f32.mrb[19].mxu1  ;;  %v1859_v48 = vmul.f32 -1.442695, %v998_v47 }
0x19c2   : > { %2251 = vpow2.f32 %v1859_v48 }
0x19cc   : > { %v2252_v49 = vpop.eup %2251 }
0x19cd   : > { %v1002_v50 = vadd.f32 1.0, %v2252_v49 }
0x19cf   : > { %2253 = vrcp.f32 %v1002_v50 }
0x19d9   : > { %v2254_v51 = vpop.eup %2253 }
0x19da   : > { %v1017_v57 = vsub.f32 1.0, %v2254_v51  ;;  %v1023_v59 = vmul.f32 %v2254_v51, %v947_v38 }
0x1a32   : > { %v1008_v52 = vpop.permute.xlu0 %1007 }
0x1a33   : > { %v1010_v53 = vmul.f32 %v2254_v51, %v1008_v52 }
0x1a35   : > { %1012 = vrot.lane.b32.xlu1 %v1010_v53, %s2493_s19 }
0x1aa7   : > { %v1013_v54 = vpop.permute.xlu1 %1012 }
0x1aa8   : > { %v1015_v55 = vadd.f32 %v1013_v54, %v950_v46 }
0x1aaa   : > { %2255 = vtanh.f32 %v1015_v55 }
0x1ab4   : > { %v2256_v56 = vpop.eup %2255 }
0x1ab5   : > { %1019 = vrot.lane.b32.xlu0 %v2256_v56, %s2495_s21  ;;  %v1866_v56 = vld [vmem:[%s2685_s10 + $0x30] sm:$0xff]  }
0x1b27   : > { %v1020_v58 = vpop.permute.xlu0 %1019 }
0x1b28   : > { %v1022_v60 = vmul.f32 %v1020_v58, %v1017_v57  ;;  %v1181_v57 = vunpack.c.l.bf16 %v1866_v56 }
0x1b2a   : > { %v1024_v61 = vadd.f32 %v1023_v59, %v1022_v60 }
0x1b2c   : > { %v1028_v62 = vpack.c.bf16 %v1024_v61, %v1024_v61 }
0x1b2e   : > { %1030 = vrot.lane.b32.xlu1 %v1028_v62, %s2495_s21 }
0x1ba0   : > { %v1031_v63 = vpop.permute.xlu1 %1030 }
0x1ba1   : > { %2035 = vmatmul.mubr.msk.bf16.vlgmr.msra.gmra.mrb[20].mxu0 %vm252_vm2, %v1031_v63 }
0x1ba2   : > { %2047 = vmatpush3.bf16.msra.mxu0 %v2696_v1  ;;  %2050 = vmatprep.mubr.msk.bf16.mxu0 %vm2492_vm1, %v2491_v2 }
0x1ba3   : > { %2048 = vmatprep.subr.bf16.mxu0 %v2491_v2 }
0x1ba6   : > { %2049 = vmatpush3.bf16.msra.mxu0 %v2701_v3 }
0x1ba7   : > { %2062 = vmatprep.subr.bf16.mxu0 %v2491_v2 }
0x1c74   : > { %v1069_v0 = vpop.f32.mrb[20].mxu0 }
0x1c75   : > { %v1082_v4 = vadd.f32 %v1069_v0, %v2722_v7  ;;  %v2036_v5 = vpop.f32.mrb[21].mxu0  ;;  %v1075_v11 = vadd.f32 %v1069_v0, %v1027_v10 }
0x1c76   : > { %v1072_v6 = vpop.f32.mrb[22].mxu0 }
0x1c77   : > { %1084 = vrot.lane.b32.xlu0 %v1082_v4, %s2493_s19  ;;  %v2037_v8 = vpop.f32.mrb[23].mxu0  ;;  %v1862_v12 = vmul.f32 -1.442695, %v1075_v11 }
0x1c79   : > { %2257 = vpow2.f32 %v1862_v12 }
0x1c83   : > { %v2258_v13 = vpop.eup %2257 }
0x1c84   : > { %v1079_v14 = vadd.f32 1.0, %v2258_v13 }
0x1c86   : > { %2259 = vrcp.f32 %v1079_v14 }
0x1c90   : > { %v2260_v15 = vpop.eup %2259 }
0x1c91   : > { %v1094_v21 = vsub.f32 1.0, %v2260_v15  ;;  %v1100_v23 = vmul.f32 %v2260_v15, %v1024_v61 }
0x1ce9   : > { %v1085_v16 = vpop.permute.xlu0 %1084 }
0x1cea   : > { %v1087_v17 = vmul.f32 %v2260_v15, %v1085_v16 }
0x1cec   : > { %1089 = vrot.lane.b32.xlu1 %v1087_v17, %s2493_s19 }
0x1d5e   : > { %v1090_v18 = vpop.permute.xlu1 %1089 }
0x1d5f   : > { %v1092_v19 = vadd.f32 %v1090_v18, %v1027_v10 }
0x1d61   : > { %2261 = vtanh.f32 %v1092_v19 }
0x1d6b   : > { %v2262_v20 = vpop.eup %2261 }
0x1d6c   : > { %1096 = vrot.lane.b32.xlu0 %v2262_v20, %s2495_s21  ;;  %v1258_v20 = vunpack.c.h.bf16 %v1866_v56 }
0x1dde   : > { %v1097_v22 = vpop.permute.xlu0 %1096 }
0x1ddf   : > { %v1099_v24 = vmul.f32 %v1097_v22, %v1094_v21 }
0x1de1   : > { %v1101_v25 = vadd.f32 %v1100_v23, %v1099_v24 }
0x1de3   : > { %v1105_v26 = vpack.c.bf16 %v1101_v25, %v1101_v25 }
0x1de5   : > { %1107 = vrot.lane.b32.xlu1 %v1105_v26, %s2495_s21 }
0x1e57   : > { %v1108_v27 = vpop.permute.xlu1 %1107 }
0x1e58   : > { %2043 = vmatmul.mubr.msk.bf16.vlgmr.msra.gmra.mrb[20].mxu1 %vm252_vm2, %v1108_v27 }
0x1e59   : > { %2055 = vmatpush3.bf16.msra.mxu1 %v2696_v1  ;;  %2058 = vmatprep.mubr.msk.bf16.mxu1 %vm2492_vm1, %v2491_v2 }
0x1e5a   : > { %2056 = vmatprep.subr.bf16.mxu1 %v2491_v2 }
0x1e5d   : > { %2057 = vmatpush3.bf16.msra.mxu1 %v2701_v3 }
0x1e5e   : > { %2070 = vmatprep.subr.bf16.mxu1 %v2491_v2 }
0x1f2b   : > { %v1146_v28 = vpop.f32.mrb[20].mxu1 }
0x1f2c   : > { %v1159_v29 = vadd.f32 %v1146_v28, %v2722_v7  ;;  %v2044_v30 = vpop.f32.mrb[21].mxu1  ;;  %v1152_v34 = vadd.f32 %v1146_v28, %v1104_v33 }
0x1f2d   : > { %v1149_v31 = vpop.f32.mrb[22].mxu1 }
0x1f2e   : > { %1161 = vrot.lane.b32.xlu0 %v1159_v29, %s2493_s19  ;;  %v2045_v32 = vpop.f32.mrb[23].mxu1  ;;  %v1865_v35 = vmul.f32 -1.442695, %v1152_v34 }
0x1f30   : > { %2263 = vpow2.f32 %v1865_v35 }
0x1f3a   : > { %v2264_v36 = vpop.eup %2263 }
0x1f3b   : > { %v1156_v37 = vadd.f32 1.0, %v2264_v36  ;;  %v2893_v36 = vld [vmem:[#allocation6] sm:$0xff]  }
0x1f3d   : > { %2265 = vrcp.f32 %v1156_v37  ;;  %v2899_v37 = vld [vmem:[#allocation6 + $0x8] sm:$0xff]  }
0x1f47   : > { %v2266_v38 = vpop.eup %2265 }
0x1f48   : > { %v1171_v44 = vsub.f32 1.0, %v2266_v38  ;;  %v1177_v46 = vmul.f32 %v2266_v38, %v1101_v25 }
0x1fa0   : > { %v1162_v39 = vpop.permute.xlu0 %1161 }
0x1fa1   : > { %v1164_v40 = vmul.f32 %v2266_v38, %v1162_v39 }
0x1fa3   : > { %1166 = vrot.lane.b32.xlu1 %v1164_v40, %s2493_s19 }
0x2015   : > { %v1167_v41 = vpop.permute.xlu1 %1166 }
0x2016   : > { %v1169_v42 = vadd.f32 %v1167_v41, %v1104_v33 }
0x2018   : > { %2267 = vtanh.f32 %v1169_v42 }
0x2022   : > { %v2268_v43 = vpop.eup %2267 }
0x2023   : > { %1173 = vrot.lane.b32.xlu0 %v2268_v43, %s2495_s21  ;;  %v1872_v43 = vld [vmem:[%s2685_s10 + $0x38] sm:$0xff]  }
0x2095   : > { %v1174_v45 = vpop.permute.xlu0 %1173 }
0x2096   : > { %v1176_v47 = vmul.f32 %v1174_v45, %v1171_v44  ;;  %v1335_v44 = vunpack.c.l.bf16 %v1872_v43 }
0x2098   : > { %v1178_v48 = vadd.f32 %v1177_v46, %v1176_v47 }
0x209a   : > { %v1182_v49 = vpack.c.bf16 %v1178_v48, %v1178_v48 }
0x209c   : > { %1184 = vrot.lane.b32.xlu1 %v1182_v49, %s2495_s21 }
0x210e   : > { %v1185_v50 = vpop.permute.xlu1 %1184 }
0x210f   : > { %2051 = vmatmul.mubr.msk.bf16.vlgmr.msra.gmra.mrb[24].mxu0 %vm252_vm2, %v1185_v50 }
0x2110   : > { %2063 = vmatpush3.bf16.msra.mxu0 %v2696_v1  ;;  %2066 = vmatprep.mubr.msk.bf16.mxu0 %vm2492_vm1, %v2491_v2 }
0x2111   : > { %2064 = vmatprep.subr.bf16.mxu0 %v2491_v2 }
0x2114   : > { %2065 = vmatpush3.bf16.msra.mxu0 %v2701_v3 }
0x2115   : > { %2078 = vmatprep.subr.bf16.mxu0 %v2491_v2 }
0x21e2   : > { %v1223_v51 = vpop.f32.mrb[24].mxu0 }
0x21e3   : > { %v1236_v52 = vadd.f32 %v1223_v51, %v2722_v7  ;;  %v2052_v53 = vpop.f32.mrb[25].mxu0  ;;  %v1229_v58 = vadd.f32 %v1223_v51, %v1181_v57 }
0x21e4   : > { %v1226_v54 = vpop.f32.mrb[26].mxu0 }
0x21e5   : > { %1238 = vrot.lane.b32.xlu0 %v1236_v52, %s2493_s19  ;;  %v2053_v55 = vpop.f32.mrb[27].mxu0  ;;  %v1868_v59 = vmul.f32 -1.442695, %v1229_v58 }
0x21e7   : > { %2269 = vpow2.f32 %v1868_v59 }
0x21f1   : > { %v2270_v60 = vpop.eup %2269 }
0x21f2   : > { %v1233_v61 = vadd.f32 1.0, %v2270_v60 }
0x21f4   : > { %2271 = vrcp.f32 %v1233_v61 }
0x21fe   : > { %v2272_v62 = vpop.eup %2271 }
0x21ff   : > { %v1248_v8 = vsub.f32 1.0, %v2272_v62  ;;  %v1254_v10 = vmul.f32 %v2272_v62, %v1178_v48 }
0x2257   : > { %v1239_v63 = vpop.permute.xlu0 %1238 }
0x2258   : > { %v1241_v0 = vmul.f32 %v2272_v62, %v1239_v63 }
0x225a   : > { %1243 = vrot.lane.b32.xlu1 %v1241_v0, %s2493_s19 }
0x22cc   : > { %v1244_v4 = vpop.permute.xlu1 %1243 }
0x22cd   : > { %v1246_v5 = vadd.f32 %v1244_v4, %v1181_v57 }
0x22cf   : > { %2273 = vtanh.f32 %v1246_v5 }
0x22d9   : > { %v2274_v6 = vpop.eup %2273 }
0x22da   : > { %1250 = vrot.lane.b32.xlu0 %v2274_v6, %s2495_s21  ;;  %v1412_v6 = vunpack.c.h.bf16 %v1872_v43 }
0x234c   : > { %v1251_v9 = vpop.permute.xlu0 %1250 }
0x234d   : > { %v1253_v11 = vmul.f32 %v1251_v9, %v1248_v8 }
0x234f   : > { %v1255_v12 = vadd.f32 %v1254_v10, %v1253_v11 }
0x2351   : > { %v1259_v13 = vpack.c.bf16 %v1255_v12, %v1255_v12 }
0x2353   : > { %1261 = vrot.lane.b32.xlu1 %v1259_v13, %s2495_s21 }
0x23c5   : > { %v1262_v14 = vpop.permute.xlu1 %1261 }
0x23c6   : > { %2059 = vmatmul.mubr.msk.bf16.vlgmr.msra.gmra.mrb[24].mxu1 %vm252_vm2, %v1262_v14 }
0x23c7   : > { %2071 = vmatpush3.bf16.msra.mxu1 %v2696_v1  ;;  %2074 = vmatprep.mubr.msk.bf16.mxu1 %vm2492_vm1, %v2491_v2 }
0x23c8   : > { %2072 = vmatprep.subr.bf16.mxu1 %v2491_v2 }
0x23cb   : > { %2073 = vmatpush3.bf16.msra.mxu1 %v2701_v3 }
0x23cc   : > { %2086 = vmatprep.subr.bf16.mxu1 %v2491_v2 }
0x2499   : > { %v1300_v15 = vpop.f32.mrb[24].mxu1 }
0x249a   : > { %v1313_v16 = vadd.f32 %v1300_v15, %v2722_v7  ;;  %v2060_v17 = vpop.f32.mrb[25].mxu1  ;;  %v1306_v21 = vadd.f32 %v1300_v15, %v1258_v20 }
0x249b   : > { %v1303_v18 = vpop.f32.mrb[26].mxu1 }
0x249c   : > { %1315 = vrot.lane.b32.xlu0 %v1313_v16, %s2493_s19  ;;  %v2061_v19 = vpop.f32.mrb[27].mxu1  ;;  %v1871_v1 = vmul.f32 -1.442695, %v1306_v21 }
0x249e   : > { %2275 = vpow2.f32 %v1871_v1 }
0x24a8   : > { %v2276_v22 = vpop.eup %2275 }
0x24a9   : > { %v1310_v23 = vadd.f32 1.0, %v2276_v22 }
0x24ab   : > { %2277 = vrcp.f32 %v1310_v23 }
0x24b5   : > { %v2278_v24 = vpop.eup %2277 }
0x24b6   : > { %v1325_v29 = vsub.f32 1.0, %v2278_v24  ;;  %v1331_v31 = vmul.f32 %v2278_v24, %v1255_v12 }
0x250e   : > { %v1316_v25 = vpop.permute.xlu0 %1315 }
0x250f   : > { %v1318_v3 = vmul.f32 %v2278_v24, %v1316_v25 }
0x2511   : > { %1320 = vrot.lane.b32.xlu1 %v1318_v3, %s2493_s19 }
0x2583   : > { %v1321_v26 = vpop.permute.xlu1 %1320 }
0x2584   : > { %v1323_v27 = vadd.f32 %v1321_v26, %v1258_v20 }
0x2586   : > { %2279 = vtanh.f32 %v1323_v27 }
0x2590   : > { %v2280_v28 = vpop.eup %2279 }
0x2591   : > { %1327 = vrot.lane.b32.xlu0 %v2280_v28, %s2495_s21  ;;  %v1878_v28 = vld [vmem:[%s2685_s10 + $0x40] sm:$0xff]  }
0x2603   : > { %v1328_v30 = vpop.permute.xlu0 %1327 }
0x2604   : > { %v1330_v32 = vmul.f32 %v1328_v30, %v1325_v29  ;;  %v1489_v29 = vunpack.c.l.bf16 %v1878_v28 }
0x2606   : > { %v1332_v33 = vadd.f32 %v1331_v31, %v1330_v32 }
0x2608   : > { %v1336_v34 = vpack.c.bf16 %v1332_v33, %v1332_v33 }
0x260a   : > { %1338 = vrot.lane.b32.xlu1 %v1336_v34, %s2495_s21 }
0x267c   : > { %v1339_v35 = vpop.permute.xlu1 %1338 }
0x267d   : > { %2067 = vmatmul.mubr.msk.bf16.vlgmr.msra.gmra.mrb[28].mxu0 %vm252_vm2, %v1339_v35 }
0x267e   : > { %2079 = vmatpush3.bf16.msra.mxu0 %v2893_v36  ;;  %2082 = vmatprep.mubr.msk.bf16.mxu0 %vm2492_vm1, %v2491_v2 }
0x267f   : > { %2080 = vmatprep.subr.bf16.mxu0 %v2491_v2 }
0x2682   : > { %2081 = vmatpush3.bf16.msra.mxu0 %v2899_v37 }
0x2683   : > { %2094 = vmatprep.subr.bf16.mxu0 %v2491_v2 }
0x2750   : > { %v1377_v38 = vpop.f32.mrb[28].mxu0 }
0x2751   : > { %v1390_v39 = vadd.f32 %v1377_v38, %v2722_v7  ;;  %v2068_v40 = vpop.f32.mrb[29].mxu0  ;;  %v1383_v45 = vadd.f32 %v1377_v38, %v1335_v44 }
0x2752   : > { %v1380_v41 = vpop.f32.mrb[30].mxu0 }
0x2753   : > { %1392 = vrot.lane.b32.xlu0 %v1390_v39, %s2493_s19  ;;  %v2069_v42 = vpop.f32.mrb[31].mxu0  ;;  %v1874_v46 = vmul.f32 -1.442695, %v1383_v45 }
0x2755   : > { %2281 = vpow2.f32 %v1874_v46 }
0x275f   : > { %v2282_v47 = vpop.eup %2281 }
0x2760   : > { %v1387_v48 = vadd.f32 1.0, %v2282_v47 }
0x2762   : > { %2283 = vrcp.f32 %v1387_v48 }
0x276c   : > { %v2284_v49 = vpop.eup %2283 }
0x276d   : > { %v1402_v55 = vsub.f32 1.0, %v2284_v49  ;;  %v1408_v57 = vmul.f32 %v2284_v49, %v1332_v33 }
0x27c5   : > { %v1393_v50 = vpop.permute.xlu0 %1392 }
0x27c6   : > { %v1395_v51 = vmul.f32 %v2284_v49, %v1393_v50 }
0x27c8   : > { %1397 = vrot.lane.b32.xlu1 %v1395_v51, %s2493_s19  ;;  %v1566_v51 = vunpack.c.h.bf16 %v1878_v28 }
0x283a   : > { %v1398_v52 = vpop.permute.xlu1 %1397 }
0x283b   : > { %v1400_v53 = vadd.f32 %v1398_v52, %v1335_v44 }
0x283d   : > { %2285 = vtanh.f32 %v1400_v53 }
0x2847   : > { %v2286_v54 = vpop.eup %2285 }
0x2848   : > { %1404 = vrot.lane.b32.xlu0 %v2286_v54, %s2495_s21 }
0x28ba   : > { %v1405_v56 = vpop.permute.xlu0 %1404 }
0x28bb   : > { %v1407_v58 = vmul.f32 %v1405_v56, %v1402_v55 }
0x28bd   : > { %v1409_v59 = vadd.f32 %v1408_v57, %v1407_v58 }
0x28bf   : > { %v1413_v60 = vpack.c.bf16 %v1409_v59, %v1409_v59 }
0x28c1   : > { %1415 = vrot.lane.b32.xlu1 %v1413_v60, %s2495_s21 }
0x2933   : > { %v1416_v61 = vpop.permute.xlu1 %1415 }
0x2934   : > { %2075 = vmatmul.mubr.msk.bf16.vlgmr.msra.gmra.mrb[28].mxu1 %vm252_vm2, %v1416_v61 }
0x2935   : > { %2087 = vmatpush3.bf16.msra.mxu1 %v2893_v36  ;;  %2090 = vmatprep.mubr.msk.bf16.mxu1 %vm2492_vm1, %v2491_v2 }
0x2936   : > { %2088 = vmatprep.subr.bf16.mxu1 %v2491_v2 }
0x2939   : > { %2089 = vmatpush3.bf16.msra.mxu1 %v2899_v37 }
0x2a07   : > { %v1454_v62 = vpop.f32.mrb[28].mxu1 }
0x2a08   : > { %v1467_v63 = vadd.f32 %v1454_v62, %v2722_v7  ;;  %v2076_v0 = vpop.f32.mrb[29].mxu1  ;;  %v1460_v8 = vadd.f32 %v1454_v62, %v1412_v6 }
0x2a09   : > { %v1457_v4 = vpop.f32.mrb[30].mxu1 }
0x2a0a   : > { %1469 = vrot.lane.b32.xlu0 %v1467_v63, %s2493_s19  ;;  %v2077_v5 = vpop.f32.mrb[31].mxu1  ;;  %v1877_v9 = vmul.f32 -1.442695, %v1460_v8 }
0x2a0c   : > { %2287 = vpow2.f32 %v1877_v9 }
0x2a16   : > { %v2288_v10 = vpop.eup %2287 }
0x2a17   : > { %v1464_v11 = vadd.f32 1.0, %v2288_v10 }
0x2a19   : > { %2289 = vrcp.f32 %v1464_v11 }
0x2a23   : > { %v2290_v12 = vpop.eup %2289 }
0x2a24   : > { %v1479_v18 = vsub.f32 1.0, %v2290_v12  ;;  %v1485_v20 = vmul.f32 %v2290_v12, %v1409_v59 }
0x2a7c   : > { %v1470_v13 = vpop.permute.xlu0 %1469 }
0x2a7d   : > { %v1472_v14 = vmul.f32 %v2290_v12, %v1470_v13 }
0x2a7f   : > { %1474 = vrot.lane.b32.xlu1 %v1472_v14, %s2493_s19  ;;  %v1884_v14 = vld [vmem:[%s2685_s10 + $0x48] sm:$0xf] }
0x2af1   : > { %v1475_v15 = vpop.permute.xlu1 %1474 }
0x2af2   : > { %v1477_v16 = vadd.f32 %v1475_v15, %v1412_v6  ;;  %v1643_v15 = vunpack.c.l.bf16 %v1884_v14 }
0x2af4   : > { %2291 = vtanh.f32 %v1477_v16 }
0x2afe   : > { %v2292_v17 = vpop.eup %2291 }
0x2aff   : > { %1481 = vrot.lane.b32.xlu0 %v2292_v17, %s2495_s21 }
0x2b71   : > { %v1482_v19 = vpop.permute.xlu0 %1481 }
0x2b72   : > { %v1484_v21 = vmul.f32 %v1482_v19, %v1479_v18 }
0x2b74   : > { %v1486_v1 = vadd.f32 %v1485_v20, %v1484_v21 }
0x2b76   : > { %v1490_v22 = vpack.c.bf16 %v1486_v1, %v1486_v1 }
0x2b78   : > { %1492 = vrot.lane.b32.xlu1 %v1490_v22, %s2495_s21 }
0x2bea   : > { %v1493_v23 = vpop.permute.xlu1 %1492 }
0x2beb   : > { %2083 = vmatmul.mubr.msk.bf16.vlgmr.msra.gmra.mrb[32].mxu0 %vm252_vm2, %v1493_v23 }
0x2bec   : > { %2095 = vmatpush3.bf16.msra.mxu0 %v2893_v36  ;;  %2098 = vmatprep.mubr.msk.bf16.mxu0 %vm2492_vm1, %v2491_v2 }
0x2bed   : > { %2096 = vmatprep.subr.bf16.mxu0 %v2491_v2 }
0x2bf0   : > { %2097 = vmatpush3.bf16.msra.mxu0 %v2899_v37 }
0x2cbe   : > { %v1531_v24 = vpop.f32.mrb[32].mxu0 }
0x2cbf   : > { %v1544_v25 = vadd.f32 %v1531_v24, %v2722_v7  ;;  %v2084_v3 = vpop.f32.mrb[33].mxu0  ;;  %v1537_v30 = vadd.f32 %v1531_v24, %v1489_v29 }
0x2cc0   : > { %v1534_v26 = vpop.f32.mrb[34].mxu0 }
0x2cc1   : > { %1546 = vrot.lane.b32.xlu0 %v1544_v25, %s2493_s19  ;;  %v2085_v27 = vpop.f32.mrb[35].mxu0  ;;  %v1880_v31 = vmul.f32 -1.442695, %v1537_v30 }
0x2cc3   : > { %2293 = vpow2.f32 %v1880_v31 }
0x2ccd   : > { %v2294_v32 = vpop.eup %2293 }
0x2cce   : > { %v1541_v33 = vadd.f32 1.0, %v2294_v32 }
0x2cd0   : > { %2295 = vrcp.f32 %v1541_v33 }
0x2cda   : > { %v2296_v34 = vpop.eup %2295 }
0x2cdb   : > { %v1556_v39 = vsub.f32 1.0, %v2296_v34  ;;  %v1562_v41 = vmul.f32 %v2296_v34, %v1486_v1 }
0x2d33   : > { %v1547_v2 = vpop.permute.xlu0 %1546 }
0x2d34   : > { %v1549_v35 = vmul.f32 %v2296_v34, %v1547_v2 }
0x2d36   : > { %1551 = vrot.lane.b32.xlu1 %v1549_v35, %s2493_s19 }
0x2da8   : > { %v1552_v36 = vpop.permute.xlu1 %1551 }
0x2da9   : > { %v1554_v37 = vadd.f32 %v1552_v36, %v1489_v29 }
0x2dab   : > { %2297 = vtanh.f32 %v1554_v37 }
0x2db5   : > { %v2298_v38 = vpop.eup %2297 }
0x2db6   : > { %1558 = vrot.lane.b32.xlu0 %v2298_v38, %s2495_s21 }
0x2e28   : > { %v1559_v40 = vpop.permute.xlu0 %1558 }
0x2e29   : > { %v1561_v42 = vmul.f32 %v1559_v40, %v1556_v39 }
0x2e2b   : > { %v1563_v43 = vadd.f32 %v1562_v41, %v1561_v42 }
0x2e2d   : > { %v1567_v44 = vpack.c.bf16 %v1563_v43, %v1563_v43 }
0x2e2f   : > { %1569 = vrot.lane.b32.xlu1 %v1567_v44, %s2495_s21 }
0x2ea1   : > { %v1570_v45 = vpop.permute.xlu1 %1569 }
0x2ea2   : > { %2091 = vmatmul.mubr.msk.bf16.vlgmr.msra.gmra.mrb[32].mxu1 %vm252_vm2, %v1570_v45 }
0x2f75   : > { %v1608_v46 = vpop.f32.mrb[32].mxu1 }
0x2f76   : > { %v1621_v47 = vadd.f32 %v1608_v46, %v2722_v7  ;;  %v2092_v48 = vpop.f32.mrb[33].mxu1  ;;  %v1614_v52 = vadd.f32 %v1608_v46, %v1566_v51 }
0x2f77   : > { %v1611_v49 = vpop.f32.mrb[34].mxu1 }
0x2f78   : > { %1623 = vrot.lane.b32.xlu0 %v1621_v47, %s2493_s19  ;;  %v2093_v50 = vpop.f32.mrb[35].mxu1  ;;  %v1883_v53 = vmul.f32 -1.442695, %v1614_v52 }
0x2f7a   : > { %2299 = vpow2.f32 %v1883_v53 }
0x2f84   : > { %v2300_v54 = vpop.eup %2299 }
0x2f85   : > { %v1618_v55 = vadd.f32 1.0, %v2300_v54 }
0x2f87   : > { %2301 = vrcp.f32 %v1618_v55 }
0x2f91   : > { %v2302_v56 = vpop.eup %2301 }
0x2f92   : > { %v1633_v62 = vsub.f32 1.0, %v2302_v56  ;;  %v1639_v0 = vmul.f32 %v2302_v56, %v1563_v43 }
0x2fea   : > { %v1624_v57 = vpop.permute.xlu0 %1623 }
0x2feb   : > { %v1626_v58 = vmul.f32 %v2302_v56, %v1624_v57 }
0x2fed   : > { %1628 = vrot.lane.b32.xlu1 %v1626_v58, %s2493_s19 }
0x305f   : > { %v1629_v59 = vpop.permute.xlu1 %1628 }
0x3060   : > { %v1631_v60 = vadd.f32 %v1629_v59, %v1566_v51 }
0x3062   : > { %2303 = vtanh.f32 %v1631_v60 }
0x306c   : > { %v2304_v61 = vpop.eup %2303 }
0x306d   : > { %1635 = vrot.lane.b32.xlu0 %v2304_v61, %s2495_s21 }
0x30df   : > { %v1636_v63 = vpop.permute.xlu0 %1635 }
0x30e0   : > { %v1638_v4 = vmul.f32 %v1636_v63, %v1633_v62 }
0x30e2   : > { %v1640_v5 = vadd.f32 %v1639_v0, %v1638_v4 }
0x30e4   : > { %v1644_v6 = vpack.c.bf16 %v1640_v5, %v1640_v5 }
0x30e6   : > { %1646 = vrot.lane.b32.xlu1 %v1644_v6, %s2495_s21 }
0x3158   : > { %v1647_v8 = vpop.permute.xlu1 %1646 }
0x3159   : > { %2099 = vmatmul.mubr.msk.bf16.vlgmr.msra.gmra.mrb[36].mxu0 %vm252_vm2, %v1647_v8 }
0x322c   : > { %v1685_v9 = vpop.f32.mrb[36].mxu0 }
0x322d   : > { %v1698_v10 = vadd.f32 %v1685_v9, %v2722_v7  ;;  %v2100_v11 = vpop.f32.mrb[37].mxu0  ;;  %v1691_v16 = vadd.f32 %v1685_v9, %v1643_v15 }
0x322e   : > { %v1688_v12 = vpop.f32.mrb[38].mxu0 }
0x322f   : > { %1700 = vrot.lane.b32.xlu0 %v1698_v10, %s2493_s19  ;;  %v2101_v13 = vpop.f32.mrb[39].mxu0  ;;  %v1886_v17 = vmul.f32 -1.442695, %v1691_v16 }
0x3231   : > { %2305 = vpow2.f32 %v1886_v17 }
0x323b   : > { %v2306_v18 = vpop.eup %2305 }
0x323c   : > { %v1695_v19 = vadd.f32 1.0, %v2306_v18 }
0x323e   : > { %2307 = vrcp.f32 %v1695_v19 }
0x3248   : > { %v2308_v20 = vpop.eup %2307 }
0x3249   : > { %v1710_v24 = vsub.f32 1.0, %v2308_v20  ;;  %v1716_v3 = vmul.f32 %v2308_v20, %v1640_v5 }
0x32a1   : > { %v1701_v21 = vpop.permute.xlu0 %1700 }
0x32a2   : > { %v1703_v1 = vmul.f32 %v2308_v20, %v1701_v21 }
0x32a4   : > { %1705 = vrot.lane.b32.xlu1 %v1703_v1, %s2493_s19 }
0x3316   : > { %v1706_v22 = vpop.permute.xlu1 %1705 }
0x3317   : > { %v1708_v7 = vadd.f32 %v1706_v22, %v1643_v15 }
0x3319   : > { %2309 = vtanh.f32 %v1708_v7 }
0x3323   : > { %v2310_v23 = vpop.eup %2309 }
0x3324   : > { %1712 = vrot.lane.b32.xlu0 %v2310_v23, %s2495_s21 }
0x3396   : > { %v1713_v25 = vpop.permute.xlu0 %1712 }
0x3397   : > { %v1715_v26 = vmul.f32 %v1713_v25, %v1710_v24 }
0x3399   : > { %v1717_v27 = vadd.f32 %v1716_v3, %v1715_v26 }
0x339b   : > { %1719 = vrot.lane.b32.xlu1 %v1717_v27, %s2495_s21 }
0x3408   : > { %1726 = sbr.rel (%p1887_p9) target bundleno = 13327 (0x340f), region = 52 }
0x340d   : > { %v1720_v28 = vpop.permute.xlu1 %1719 }
0x340e   : > { %1722 = vst.msk [vmem:[#allocation2] sm:$0xff] %vm252_vm2, %v1720_v28  ;;  %1727 = vst.msk [vmem:[#allocation9] sm:$0xff] (!%p1887_p9), %vm252_vm2, %v1720_v28 }
0x340f PF: > { %p2950_p1 = scmp.eq.s32.totalorder %s1819_s18, 1  ;;  %s2496_s9 = smov [#allocation9]  }
0x3410   : > { %s1737_s22 = sshll.u32 %s2496_s9, 4  ;;  %s1738_s22 = int_to_ptr.vmem [resolvable:$true] %s1737_s22 }
0x3411   : > { %s2399_s28 = scalar_lea.vmem %s1738_s22, 128  ;;  %p2406_p10 = scmp.lt.s32.totalorder %s1738_s22, %s1738_s22 }
0x3412   : > { %p2400_p4 = scmp.ne.s32.totalorder %s1738_s22, %s2399_s28  ;;  %p2407_p7 = scmp.lt.s32.totalorder %s2399_s28, %s2399_s28 }
0x3414   : > { %p2401_p5 = pnand %p2400_p4, %p2950_p1  ;;  %p2408_p13 = por %p2407_p7, %p2406_p10 }
0x3416   : > { %p2402_p8 = pneg %p2401_p5 }
0x3418   : > { %p2409_p2 = pnand %p2408_p13, %p2402_p8 }
0x341a   : > { %2412 = shalt.err (!%p2409_p2)
}
0x341b   : > { %s2413_s18 = scalar_lea.hbm %s2997_s3, 128 }
0x341c   : > { %p2414_p3 = scmp.ne.s32.totalorder %s2997_s3, %s2413_s18  ;;  %p2419_p6 = scmp.lt.u32.totalorder %s2413_s18, %s2997_s3 }
0x341e   : > { %p2415_p12 = pnand %p2414_p3, %p2950_p1 }
0x3420   : > { %p2416_p0 = pneg %p2415_p12 }
0x3422   : > { %p2421_p11 = pnand %p2419_p6, %p2416_p0 }
0x3424   : > { %2424 = shalt.err (!%p2421_p11)
}
0x3425   : > { %2115 = dma.vmem_to_hbm [thread:$0]  (%p2950_p1), %s1738_s22, 128, %s2997_s3, [#allocation5]  }
0x3426   : > { %2458 = dma.done.wait (%p2950_p1), [#allocation5], 128  }
0x3427   : > { %2460 = vsyncadd (%p2950_p1), [#allocation5], 4294967168 }
0x3428 PF: > { %s18_s17 = sadd.s32 1, %s2483_s17   ;;  %s3011_s12 = smov %s2467_s13 }
0x3429   : > { %p15_p9 = scmp.ge.s32.totalorder %s18_s17, 4   ;;  %s3012_s13 = smov %s2471_s14 }
0x342a   : > { %s3013_s14 = smov %s2642_s26  ;;  %s3014_s15 = smov %s2479_s16 }
0x342b   : > { %s3015_s16 = smov %s3017_s6  ;;  %17 = sbr.rel (!%p15_p9) target bundleno = 6 (0x6), region = 104 }
0x3432   :  { %1750 = vsyncpa [#allocation4], 1 }
0x3433   :  { %1752 = vsyncpa [#allocation4 + $0x1], 1 }
0x3434   :  { %1753 = vsyncpa [#allocation7], 1 }
0x3435   :  { %1754 = vsyncpa [#allocation5], 1 }
0x3436   :  { %1756 = vsyncpa [#allocation5 + $0x1], 1 }

</bundles_post_ra>
